<compile_context>
chip_gen: v6e
topology: v6e:2x2x1
jax: 0.10.0
libtpu: 0.0.40
codegen_flags: <defaults>
</compile_context>

<pallas_src>
import jax
import jax.numpy as jnp
from jax.experimental import pallas as pl
from jax.experimental.pallas import tpu as pltpu

IN_DIM = 726
IN_PAD = 768          # 726 zero-padded up to a multiple of 128 (lane-aligned K)
HID_DIM = 1024
OUT_DIM = 256


def mlp_kernel(x_ref, w1_ref, b1_ref, w2_ref, b2_ref, o_ref):
    # x_ref: (tb, 768) bf16 | w1_ref: (768, 1024) bf16 | b1_ref: (1, 1024) f32
    # w2_ref: (1024, 256) bf16 | b2_ref: (1, 256) f32  | o_ref: (tb, 256) f32
    h = jnp.dot(x_ref[...], w1_ref[...], preferred_element_type=jnp.float32)
    h = jnp.maximum(h + b1_ref[...], 0.0)                       # relu(out1), f32

    o = jnp.dot(h.astype(jnp.bfloat16), w2_ref[...],
                preferred_element_type=jnp.float32)
    o_ref[...] = jnp.maximum(o + b2_ref[...], 0.0)              # relu(out2), f32


def _round_up(n, m):
    return ((n + m - 1) // m) * m


def _build_call(tb, padded_b, single_buffer_weights):
    """Build the pallas_call for a given batch tile / padded batch."""

    def const_spec(shape):
        # Grid-invariant operands (weights/biases): single-buffer to save VMEM.
        if single_buffer_weights:
            return pl.BlockSpec(shape, lambda i: (0, 0),
                                pipeline_mode=pl.Buffered(1))
        return pl.BlockSpec(shape, lambda i: (0, 0))

    flops = 2 * padded_b * (IN_PAD * HID_DIM + HID_DIM * OUT_DIM)
    bytes_accessed = (padded_b * IN_PAD * 2          # x (bf16)
                      + IN_PAD * HID_DIM * 2         # w1 (bf16)
                      + HID_DIM * OUT_DIM * 2        # w2 (bf16)
                      + (HID_DIM + OUT_DIM) * 4      # biases (f32)
                      + padded_b * OUT_DIM * 4)      # output (f32)

    return pl.pallas_call(
        mlp_kernel,
        out_shape=jax.ShapeDtypeStruct((padded_b, OUT_DIM), jnp.float32),
        grid_spec=pltpu.PrefetchScalarGridSpec(
            num_scalar_prefetch=0,
            grid=(padded_b // tb,),
            in_specs=[
                pl.BlockSpec((tb, IN_PAD), lambda i: (i, 0)),
                const_spec((IN_PAD, HID_DIM)),
                const_spec((1, HID_DIM)),
                const_spec((HID_DIM, OUT_DIM)),
                const_spec((1, OUT_DIM)),
            ],
            out_specs=pl.BlockSpec((tb, OUT_DIM), lambda i: (i, 0)),
        ),
        compiler_params=pltpu.CompilerParams(
            dimension_semantics=("parallel",),   # batch axis shards across TCs
        ),
        cost_estimate=pl.CostEstimate(flops=flops, transcendentals=0,
                                      bytes_accessed=bytes_accessed),
    )


def m_k_model_forward(x, w1, b1, w2, b2, *, tb=256):
    """x: [B, 726] f32. w1: [726, 1024], w2: [1024, 256] in [in, out] layout.
    Returns relu(relu(x@w1+b1)@w2+b2)  (== `out2` of the PyTorch module,
    dropout in eval mode)."""
    B = x.shape[0]
    # Batch tile: fill the MXU M-dim at realistic batch sizes, clamp to a
    # multiple of 8 sublanes for tiny batches so the grid stays >= 1.
    tb = max(8, min(tb, _round_up(B, 8)))
    padded_b = _round_up(B, tb)

    # Zero-pad K 726 -> 768 (lane-aligned loads / MXU K-dim) and the batch to
    # a tile multiple; cast matmul operands to bf16 (f32 accumulation inside).
    xp = jnp.pad(x, ((0, padded_b - B), (0, IN_PAD - IN_DIM))).astype(jnp.bfloat16)
    w1p = jnp.pad(w1, ((0, IN_PAD - IN_DIM), (0, 0))).astype(jnp.bfloat16)
    w2b = w2.astype(jnp.bfloat16)
    b1f = b1.reshape(1, HID_DIM).astype(jnp.float32)
    b2f = b2.reshape(1, OUT_DIM).astype(jnp.float32)

    try:
        out = _build_call(tb, padded_b, True)(xp, w1p, b1f, w2b, b2f)
    except Exception:
        # Fallback if single-buffered weight specs are unsupported here.
        out = _build_call(tb, padded_b, False)(xp, w1p, b1f, w2b, b2f)
    return out[:B]


def init_params(key):
    """Deterministic init mimicking nn.Linear default (uniform +/- 1/sqrt(fan_in))."""
    k1, k2, k3, k4 = jax.random.split(key, 4)
    lim1 = 1.0 / jnp.sqrt(jnp.float32(IN_DIM))
    lim2 = 1.0 / jnp.sqrt(jnp.float32(HID_DIM))
    w1 = jax.random.uniform(k1, (IN_DIM, HID_DIM), jnp.float32, -lim1, lim1)
    b1 = jax.random.uniform(k2, (1, HID_DIM), jnp.float32, -lim1, lim1)
    w2 = jax.random.uniform(k3, (HID_DIM, OUT_DIM), jnp.float32, -lim2, lim2)
    b2 = jax.random.uniform(k4, (1, OUT_DIM), jnp.float32, -lim2, lim2)
    return w1, b1, w2, b2


if __name__ == "__main__":
    key = jax.random.PRNGKey(0)
    k_x, k_p = jax.random.split(key)

    B = 8  # small demo batch
    x = jax.random.normal(k_x, (B, IN_DIM), dtype=jnp.float32)
    w1, b1, w2, b2 = init_params(k_p)

    out = m_k_model_forward(x, w1, b1, w2, b2)
    out = jax.block_until_ready(out)

    # Reference with matching numerics (bf16 matmul inputs, f32 accumulation).
    h_ref = jnp.maximum(
        jnp.dot(x.astype(jnp.bfloat16), w1.astype(jnp.bfloat16),
                preferred_element_type=jnp.float32) + b1, 0.0)
    ref = jnp.maximum(
        jnp.dot(h_ref.astype(jnp.bfloat16), w2.astype(jnp.bfloat16),
                preferred_element_type=jnp.float32) + b2, 0.0)

    assert out.shape == (B, OUT_DIM)
    assert jnp.allclose(out, ref, atol=1e-2, rtol=1e-2), \
        float(jnp.max(jnp.abs(out - ref)))

    print("KERNEL_OK")
</pallas_src>

<mosaic_0001>
module attributes {stable_mosaic.version = 11 : i64} {
  func.func @mlp_kernel(%arg0: i32, %arg1: memref<8x768xbf16, #tpu.memory_space<vmem>>, %arg2: memref<768x1024xbf16, #tpu.memory_space<vmem>>, %arg3: memref<1x1024xf32, #tpu.memory_space<vmem>>, %arg4: memref<1024x256xbf16, #tpu.memory_space<vmem>>, %arg5: memref<1x256xf32, #tpu.memory_space<vmem>>, %arg6: memref<8x256xf32, #tpu.memory_space<vmem>>) attributes {dimension_semantics = [#tpu.dimension_semantics<parallel>], iteration_bounds = array<i64: 1>, scalar_prefetch = 0 : i64, scratch_operands = 0 : i64, tpu.core_type = #tpu.core_type<tc>, window_params = [{transform_indices = @transform_0, window_bounds = array<i64: 8, 768>}, {pipeline_mode = #tpu.pipeline_mode<synchronous>, transform_indices = @transform_1, window_bounds = array<i64: 768, 1024>}, {pipeline_mode = #tpu.pipeline_mode<synchronous>, transform_indices = @transform_2, window_bounds = array<i64: 1, 1024>}, {pipeline_mode = #tpu.pipeline_mode<synchronous>, transform_indices = @transform_3, window_bounds = array<i64: 1024, 256>}, {pipeline_mode = #tpu.pipeline_mode<synchronous>, transform_indices = @transform_4, window_bounds = array<i64: 1, 256>}, {transform_indices = @transform_5, window_bounds = array<i64: 8, 256>}]} {
    %c0 = arith.constant 0 : index
    %c0_0 = arith.constant 0 : index
    %0 = vector.load %arg1[%c0, %c0_0] : memref<8x768xbf16, #tpu.memory_space<vmem>>, vector<8x768xbf16>
    %c0_1 = arith.constant 0 : index
    %c0_2 = arith.constant 0 : index
    %1 = vector.load %arg2[%c0_1, %c0_2] : memref<768x1024xbf16, #tpu.memory_space<vmem>>, vector<768x1024xbf16>
    %cst = arith.constant dense<0.000000e+00> : vector<8x1024xf32>
    %2 = tpu.matmul %0, %1, %cst {dimension_numbers = #tpu.dot_dimension_numbers<[1], [0], [0], [1], [0, 0, 1, 1], [], []>} : vector<8x768xbf16>, vector<768x1024xbf16>, vector<8x1024xf32> -> vector<8x1024xf32>
    %c0_3 = arith.constant 0 : index
    %c0_4 = arith.constant 0 : index
    %3 = vector.load %arg3[%c0_3, %c0_4] : memref<1x1024xf32, #tpu.memory_space<vmem>>, vector<1x1024xf32>
    %4 = vector.broadcast %3 : vector<1x1024xf32> to vector<8x1024xf32>
    %5 = arith.addf %2, %4 : vector<8x1024xf32>
    %cst_5 = arith.constant 0.000000e+00 : f32
    %6 = vector.broadcast %cst_5 : f32 to vector<8x1024xf32>
    %7 = arith.maximumf %5, %6 : vector<8x1024xf32>
    %8 = arith.truncf %7 : vector<8x1024xf32> to vector<8x1024xbf16>
    %c0_6 = arith.constant 0 : index
    %c0_7 = arith.constant 0 : index
    %9 = vector.load %arg4[%c0_6, %c0_7] : memref<1024x256xbf16, #tpu.memory_space<vmem>>, vector<1024x256xbf16>
    %cst_8 = arith.constant dense<0.000000e+00> : vector<8x256xf32>
    %10 = tpu.matmul %8, %9, %cst_8 {dimension_numbers = #tpu.dot_dimension_numbers<[1], [0], [0], [1], [0, 0, 1, 1], [], []>} : vector<8x1024xbf16>, vector<1024x256xbf16>, vector<8x256xf32> -> vector<8x256xf32>
    %c0_9 = arith.constant 0 : index
    %c0_10 = arith.constant 0 : index
    %11 = vector.load %arg5[%c0_9, %c0_10] : memref<1x256xf32, #tpu.memory_space<vmem>>, vector<1x256xf32>
    %12 = vector.broadcast %11 : vector<1x256xf32> to vector<8x256xf32>
    %13 = arith.addf %10, %12 : vector<8x256xf32>
    %cst_11 = arith.constant 0.000000e+00 : f32
    %14 = vector.broadcast %cst_11 : f32 to vector<8x256xf32>
    %15 = arith.maximumf %13, %14 : vector<8x256xf32>
    %c0_12 = arith.constant 0 : index
    %c0_13 = arith.constant 0 : index
    %16 = vector.load %arg6[%c0_12, %c0_13] : memref<8x256xf32, #tpu.memory_space<vmem>>, vector<8x256xf32>
    tpu.vector_store %arg6[%c0_12, %c0_13], %15 {strides = array<i32>} : memref<8x256xf32, #tpu.memory_space<vmem>>, vector<8x256xf32>,
    return
  }
  func.func @transform_0(%arg0: i32) -> (i32, i32) {
    %c0_i32 = arith.constant 0 : i32
    %c0_i32_0 = arith.constant 0 : i32
    return %arg0, %c0_i32 : i32, i32
  }
  func.func @transform_1(%arg0: i32) -> (i32, i32) {
    %c0_i32 = arith.constant 0 : i32
    %c0_i32_0 = arith.constant 0 : i32
    %c0_i32_1 = arith.constant 0 : i32
    return %c0_i32, %c0_i32_0 : i32, i32
  }
  func.func @transform_2(%arg0: i32) -> (i32, i32) {
    %c0_i32 = arith.constant 0 : i32
    %c0_i32_0 = arith.constant 0 : i32
    %c0_i32_1 = arith.constant 0 : i32
    return %c0_i32, %c0_i32_0 : i32, i32
  }
  func.func @transform_3(%arg0: i32) -> (i32, i32) {
    %c0_i32 = arith.constant 0 : i32
    %c0_i32_0 = arith.constant 0 : i32
    %c0_i32_1 = arith.constant 0 : i32
    return %c0_i32, %c0_i32_0 : i32, i32
  }
  func.func @transform_4(%arg0: i32) -> (i32, i32) {
    %c0_i32 = arith.constant 0 : i32
    %c0_i32_0 = arith.constant 0 : i32
    %c0_i32_1 = arith.constant 0 : i32
    return %c0_i32, %c0_i32_0 : i32, i32
  }
  func.func @transform_5(%arg0: i32) -> (i32, i32) {
    %c0_i32 = arith.constant 0 : i32
    %c0_i32_0 = arith.constant 0 : i32
    return %arg0, %c0_i32 : i32, i32
  }
}

module attributes {stable_mosaic.version = 11 : i64} {
  func.func @mlp_kernel(%arg0: i32, %arg1: memref<8x768xbf16, #tpu.memory_space<vmem>>, %arg2: memref<768x1024xbf16, #tpu.memory_space<vmem>>, %arg3: memref<1x1024xf32, #tpu.memory_space<vmem>>, %arg4: memref<1024x256xbf16, #tpu.memory_space<vmem>>, %arg5: memref<1x256xf32, #tpu.memory_space<vmem>>, %arg6: memref<8x256xf32, #tpu.memory_space<vmem>>) attributes {dimension_semantics = [#tpu.dimension_semantics<parallel>], iteration_bounds = array<i64: 1>, scalar_prefetch = 0 : i64, scratch_operands = 0 : i64, tpu.core_type = #tpu.core_type<tc>, window_params = [{transform_indices = @transform_0, window_bounds = array<i64: 8, 768>}, {pipeline_mode = #tpu.pipeline_mode<synchronous>, transform_indices = @transform_1, window_bounds = array<i64: 768, 1024>}, {pipeline_mode = #tpu.pipeline_mode<synchronous>, transform_indices = @transform_2, window_bounds = array<i64: 1, 1024>}, {pipeline_mode = #tpu.pipeline_mode<synchronous>, transform_indices = @transform_3, window_bounds = array<i64: 1024, 256>}, {pipeline_mode = #tpu.pipeline_mode<synchronous>, transform_indices = @transform_4, window_bounds = array<i64: 1, 256>}, {transform_indices = @transform_5, window_bounds = array<i64: 8, 256>}]} {
    %c0 = arith.constant 0 : index
    %c0_0 = arith.constant 0 : index
    %0 = vector.load %arg1[%c0, %c0_0] : memref<8x768xbf16, #tpu.memory_space<vmem>>, vector<8x768xbf16>
    %c0_1 = arith.constant 0 : index
    %c0_2 = arith.constant 0 : index
    %1 = vector.load %arg2[%c0_1, %c0_2] : memref<768x1024xbf16, #tpu.memory_space<vmem>>, vector<768x1024xbf16>
    %cst = arith.constant dense<0.000000e+00> : vector<8x1024xf32>
    %2 = tpu.matmul %0, %1, %cst {dimension_numbers = #tpu.dot_dimension_numbers<[1], [0], [0], [1], [0, 0, 1, 1], [], []>} : vector<8x768xbf16>, vector<768x1024xbf16>, vector<8x1024xf32> -> vector<8x1024xf32>
    %c0_3 = arith.constant 0 : index
    %c0_4 = arith.constant 0 : index
    %3 = vector.load %arg3[%c0_3, %c0_4] : memref<1x1024xf32, #tpu.memory_space<vmem>>, vector<1x1024xf32>
    %4 = vector.broadcast %3 : vector<1x1024xf32> to vector<8x1024xf32>
    %5 = arith.addf %2, %4 : vector<8x1024xf32>
    %cst_5 = arith.constant 0.000000e+00 : f32
    %6 = vector.broadcast %cst_5 : f32 to vector<8x1024xf32>
    %7 = arith.maximumf %5, %6 : vector<8x1024xf32>
    %8 = arith.truncf %7 : vector<8x1024xf32> to vector<8x1024xbf16>
    %c0_6 = arith.constant 0 : index
    %c0_7 = arith.constant 0 : index
    %9 = vector.load %arg4[%c0_6, %c0_7] : memref<1024x256xbf16, #tpu.memory_space<vmem>>, vector<1024x256xbf16>
    %cst_8 = arith.constant dense<0.000000e+00> : vector<8x256xf32>
    %10 = tpu.matmul %8, %9, %cst_8 {dimension_numbers = #tpu.dot_dimension_numbers<[1], [0], [0], [1], [0, 0, 1, 1], [], []>} : vector<8x1024xbf16>, vector<1024x256xbf16>, vector<8x256xf32> -> vector<8x256xf32>
    %c0_9 = arith.constant 0 : index
    %c0_10 = arith.constant 0 : index
    %11 = vector.load %arg5[%c0_9, %c0_10] : memref<1x256xf32, #tpu.memory_space<vmem>>, vector<1x256xf32>
    %12 = vector.broadcast %11 : vector<1x256xf32> to vector<8x256xf32>
    %13 = arith.addf %10, %12 : vector<8x256xf32>
    %cst_11 = arith.constant 0.000000e+00 : f32
    %14 = vector.broadcast %cst_11 : f32 to vector<8x256xf32>
    %15 = arith.maximumf %13, %14 : vector<8x256xf32>
    %c0_12 = arith.constant 0 : index
    %c0_13 = arith.constant 0 : index
    %16 = vector.load %arg6[%c0_12, %c0_13] : memref<8x256xf32, #tpu.memory_space<vmem>>, vector<8x256xf32>
    tpu.vector_store %arg6[%c0_12, %c0_13], %15 {strides = array<i32>} : memref<8x256xf32, #tpu.memory_space<vmem>>, vector<8x256xf32>,
    return
  }
  func.func @transform_0(%arg0: i32) -> (i32, i32) {
    %c0_i32 = arith.constant 0 : i32
    %c0_i32_0 = arith.constant 0 : i32
    return %arg0, %c0_i32 : i32, i32
  }
  func.func @transform_1(%arg0: i32) -> (i32, i32) {
    %c0_i32 = arith.constant 0 : i32
    %c0_i32_0 = arith.constant 0 : i32
    %c0_i32_1 = arith.constant 0 : i32
    return %c0_i32, %c0_i32_0 : i32, i32
  }
  func.func @transform_2(%arg0: i32) -> (i32, i32) {
    %c0_i32 = arith.constant 0 : i32
    %c0_i32_0 = arith.constant 0 : i32
    %c0_i32_1 = arith.constant 0 : i32
    return %c0_i32, %c0_i32_0 : i32, i32
  }
  func.func @transform_3(%arg0: i32) -> (i32, i32) {
    %c0_i32 = arith.constant 0 : i32
    %c0_i32_0 = arith.constant 0 : i32
    %c0_i32_1 = arith.constant 0 : i32
    return %c0_i32, %c0_i32_0 : i32, i32
  }
  func.func @transform_4(%arg0: i32) -> (i32, i32) {
    %c0_i32 = arith.constant 0 : i32
    %c0_i32_0 = arith.constant 0 : i32
    %c0_i32_1 = arith.constant 0 : i32
    return %c0_i32, %c0_i32_0 : i32, i32
  }
  func.func @transform_5(%arg0: i32) -> (i32, i32) {
    %c0_i32 = arith.constant 0 : i32
    %c0_i32_0 = arith.constant 0 : i32
    return %arg0, %c0_i32 : i32, i32
  }
}

</mosaic_0001>

<bundles_post_ra>
// kernel: tpu_custom_call.1
= control target key start
LH: loop header
LB: loop body
LE: loop exit
PB: predicated region body
PF: predicated region fallthrough
CT: control target
= control target key end

     0   :  { %10 = vsyncpa [#allocation3], 0  ;;  %s4959_s0 = inlined_call_operand.hbm [shape: bf16[8,768], index: 0, kind: input, shape index: {}]   ;;  %s4960_s1 = inlined_call_operand.hbm [shape: bf16[768,1024], index: 1, kind: input, shape index: {}]   ;;  %s4961_s2 = inlined_call_operand.hbm [shape: f32[1,1024], index: 2, kind: input, shape index: {}]   ;;  %s4962_s3 = inlined_call_operand.hbm [shape: bf16[1024,256], index: 3, kind: input, shape index: {}]   ;;  %s4963_s4 = inlined_call_operand.hbm [shape: f32[1,256], index: 4, kind: input, shape index: {}]   ;;  %s4964_s5 = inlined_call_operand.hbm [shape: f32[8,256], index: 5, kind: output, shape index: {}]  }
   0x1   :  { %11 = vsyncpa [#allocation6], 0 }
   0x2   :  { %12 = vsyncpa [#allocation9], 0 }
   0x3   :  { %13 = vsyncpa [#allocation4], 0  ;;  %s4781_s18 = smov [#allocation5]  }
   0x4   :  { %s29_s19 = sshll.u32 %s4781_s18, 4  ;;  %s30_s19 = int_to_ptr.vmem [resolvable:$true] %s29_s19 }
   0x5   :  { %s4661_s20 = scalar_lea.vmem %s30_s19, 49152  ;;  %p4666_p1 = scmp.lt.s32.totalorder %s30_s19, %s30_s19 }
   0x6   :  { %p4662_p0 = scmp.ne.s32.totalorder %s30_s19, %s4661_s20  ;;  %p4667_p2 = scmp.lt.s32.totalorder %s4661_s20, %s4661_s20 }
   0x8   :  { %p4668_p3 = por %p4667_p2, %p4666_p1 }
   0xa   :  { %p4669_p4 = pnand %p4668_p3, %p4662_p0 }
   0xc   :  { %4672 = shalt.err (!%p4669_p4)
}
   0xd   :  { %s4782_s21 = smov 512   ;;  %s4783_s22 = smov 32  }
   0xe   :  { %35 = dma.hbm_to_vmem [thread:$0]  %s4960_s1, 49152, %s30_s19, [#allocation6], %s4782_s21, %s4782_s21, %s4783_s22  }
   0xf   :  { %s4784_s25 = smov [#allocation8]  }
  0x10   :  { %s51_s26 = sshll.u32 %s4784_s25, 4  ;;  %s52_s26 = int_to_ptr.vmem [resolvable:$true] %s51_s26 }
  0x11   :  { %s4681_s27 = scalar_lea.vmem %s52_s26, 16384  ;;  %p4686_p6 = scmp.lt.s32.totalorder %s52_s26, %s52_s26 }
  0x12   :  { %p4682_p5 = scmp.ne.s32.totalorder %s52_s26, %s4681_s27  ;;  %p4687_p7 = scmp.lt.s32.totalorder %s4681_s27, %s4681_s27 }
  0x14   :  { %p4688_p8 = por %p4687_p7, %p4686_p6 }
  0x16   :  { %p4689_p9 = pnand %p4688_p8, %p4682_p5 }
  0x18   :  { %4692 = shalt.err (!%p4689_p9)
}
  0x19   :  { %s4785_s28 = smov 128   ;;  %s4786_s29 = smov 8  }
  0x1a   :  { %57 = dma.hbm_to_vmem [thread:$0]  %s4962_s3, 16384, %s52_s26, [#allocation9], %s4785_s28, %s4785_s28, %s4786_s29  }
  0x1b   :  { %s4787_s7 = smov [#allocation2]   ;;  %s4788_s9 = smov [#allocation7]  }
  0x1c   :  { %s20_s8 = sshll.u32 %s4787_s7, 4  ;;  %s42_s1 = sshll.u32 %s4788_s9, 4  ;;  %s21_s8 = int_to_ptr.vmem [resolvable:$true] %s20_s8  ;;  %s43_s1 = int_to_ptr.vmem [resolvable:$true] %s42_s1 }
  0x1d   :  { %s4701_s10 = scalar_lea.vmem %s21_s8, 384  ;;  %p4706_p11 = scmp.lt.s32.totalorder %s21_s8, %s21_s8 }
  0x1e   :  { %p4702_p10 = scmp.ne.s32.totalorder %s21_s8, %s4701_s10  ;;  %p4707_p12 = scmp.lt.s32.totalorder %s4701_s10, %s4701_s10 }
  0x20   :  { %p4708_p13 = por %p4707_p12, %p4706_p11 }
  0x22   :  { %p4709_p0 = pnand %p4708_p13, %p4702_p10 }
  0x24   :  { %4712 = shalt.err (!%p4709_p0)
}
  0x25   :  { %23 = dma.hbm_to_vmem [thread:$0]  %s4959_s0, 384, %s21_s8, [#allocation3]  }
  0x26   :  { %s4721_s13 = scalar_lea.vmem %s43_s1, 128  ;;  %p4726_p2 = scmp.lt.s32.totalorder %s43_s1, %s43_s1 }
  0x27   :  { %p4722_p1 = scmp.ne.s32.totalorder %s43_s1, %s4721_s13  ;;  %p4727_p3 = scmp.lt.s32.totalorder %s4721_s13, %s4721_s13 }
  0x29   :  { %p4728_p4 = por %p4727_p3, %p4726_p2 }
  0x2b   :  { %p4729_p5 = pnand %p4728_p4, %p4722_p1 }
  0x2d   :  { %4732 = shalt.err (!%p4729_p5)
}
  0x2e   :  { %45 = dma.hbm_to_vmem [thread:$0]  %s4961_s2, 128, %s43_s1, [#allocation6]  }
  0x2f   :  { %s4789_s15 = smov [#allocation10]  }
  0x30   :  { %s64_s16 = sshll.u32 %s4789_s15, 4  ;;  %s65_s16 = int_to_ptr.vmem [resolvable:$true] %s64_s16 }
  0x31   :  { %s4741_s17 = scalar_lea.vmem %s65_s16, 32  ;;  %p4746_p7 = scmp.lt.s32.totalorder %s65_s16, %s65_s16 }
  0x32   :  { %p4742_p6 = scmp.ne.s32.totalorder %s65_s16, %s4741_s17  ;;  %p4747_p8 = scmp.lt.s32.totalorder %s4741_s17, %s4741_s17 }
  0x34   :  { %p4748_p9 = por %p4747_p8, %p4746_p7 }
  0x36   :  { %p4749_p10 = pnand %p4748_p9, %p4742_p6 }
  0x38   :  { %4752 = shalt.err (!%p4749_p10)
}
  0x39   :  { %67 = dma.hbm_to_vmem [thread:$0]  %s4963_s4, 32, %s65_s16, [#allocation9]  }
  0x3a   :  { %4773 = dma.done.wait [#allocation3], 384  }
  0x3b   :  { %4774 = vsyncadd [#allocation3], 4294966912 }
  0x3c   :  { %4775 = dma.done.wait [#allocation6], 49280  }
  0x3d   :  { %4776 = vsyncadd [#allocation6], 4294918016 }
  0x3e   :  { %4777 = dma.done.wait [#allocation9], 16416  }
  0x3f   :  { %4778 = vsyncadd [#allocation9], 4294950880  ;;  %v142_v0 = vld [vmem:[#allocation5 + $0x1c0] sm:$0xff]  ;;  %v4836_v53 = vld [vmem:[#allocation2] sm:$0xff]  ;;  %s4790_s2 = smov [#allocation11]  }
  0x40   :  { %v146_v1 = vld [vmem:[#allocation5 + $0x1e0] sm:$0xff]  ;;  %v4838_v54 = vld [vmem:[#allocation2 + $0x8] sm:$0xff]  ;;  %v4842_v58 = vcombine.high %v4836_v53, %v4836_v53  ;;  %s3915_s4 = sshll.u32 %s4790_s2, 4  ;;  %s3916_s4 = int_to_ptr.vmem [resolvable:$true] %s3915_s4 }
  0x41   :  { %v270_v2 = vld [vmem:[#allocation5 + $0x5c0] sm:$0xff]  ;;  %v3989_v3 = vcombine.high %v142_v0, %v146_v1  ;;  %v3988_v5 = vcombine.low %v142_v0, %v146_v1  ;;  %v4846_v59 = vcombine.high %v4838_v54, %v4838_v54  ;;  %s4753_s19 = scalar_lea.vmem %s3916_s4, 256  ;;  %p4758_p12 = scmp.lt.s32.totalorder %s3916_s4, %s3916_s4 }
  0x42   :  { %v274_v4 = vld [vmem:[#allocation5 + $0x5e0] sm:$0xff]  ;;  %2485 = vmatprep.mubr.bf16.mxu0 %v4842_v58  ;;  %p4754_p11 = scmp.ne.s32.totalorder %s3916_s4, %s4753_s19  ;;  %p4759_p13 = scmp.lt.s32.totalorder %s4753_s19, %s4753_s19 }
  0x43   :  { %v134_v6 = vld [vmem:[#allocation5 + $0x180] sm:$0xff]  ;;  %v4117_v8 = vcombine.high %v270_v2, %v274_v4  ;;  %v4116_v9 = vcombine.low %v270_v2, %v274_v4  ;;  %2453 = vmatprep.subr.bf16.mxu0 %v3989_v3  ;;  %2526 = vmatprep.mubr.bf16.mxu1 %v4846_v59 }
  0x44   :  { %v138_v7 = vld [vmem:[#allocation5 + $0x1a0] sm:$0xff]  ;;  %2454 = vmatpush1.bf16.msra.mxu0 %v3988_v5  ;;  %p4760_p0 = por %p4759_p13, %p4758_p12 }
  0x45   :  { %v3981_v10 = vcombine.high %v134_v6, %v138_v7  ;;  %v262_v11 = vld [vmem:[#allocation5 + $0x580] sm:$0xff]  ;;  %2494 = vmatprep.subr.bf16.mxu1 %v4117_v8  ;;  %v3980_v18 = vcombine.low %v134_v6, %v138_v7 }
  0x46   :  { %v266_v12 = vld [vmem:[#allocation5 + $0x5a0] sm:$0xff]  ;;  %2495 = vmatpush1.bf16.msra.mxu1 %v4116_v9  ;;  %p4761_p1 = pnand %p4760_p0, %p4754_p11 }
  0x47   :  { %v126_v13 = vld [vmem:[#allocation5 + $0x140] sm:$0xff]  ;;  %v4109_v14 = vcombine.high %v262_v11, %v266_v12  ;;  %2455 = vmatprep.subr.bf16.mxu0 %v3981_v10  ;;  %v4108_v19 = vcombine.low %v262_v11, %v266_v12 }
  0x48   :  { %v130_v15 = vld [vmem:[#allocation5 + $0x160] sm:$0xff]  ;;  %2456 = vmatpush1.bf16.msra.mxu0 %v3980_v18 }
  0x49   :  { %v254_v16 = vld [vmem:[#allocation5 + $0x540] sm:$0xff]  ;;  %v3973_v20 = vcombine.high %v126_v13, %v130_v15  ;;  %2496 = vmatprep.subr.bf16.mxu1 %v4109_v14  ;;  %v3972_v26 = vcombine.low %v126_v13, %v130_v15 }
  0x4a   :  { %v258_v17 = vld [vmem:[#allocation5 + $0x560] sm:$0xff]  ;;  %2497 = vmatpush1.bf16.msra.mxu1 %v4108_v19 }
  0x4b   :  { %v4101_v21 = vcombine.high %v254_v16, %v258_v17  ;;  %v118_v22 = vld [vmem:[#allocation5 + $0x100] sm:$0xff]  ;;  %2457 = vmatprep.subr.bf16.mxu0 %v3973_v20  ;;  %v4100_v27 = vcombine.low %v254_v16, %v258_v17 }
  0x4c   :  { %v122_v23 = vld [vmem:[#allocation5 + $0x120] sm:$0xff]  ;;  %2458 = vmatpush1.bf16.msra.mxu0 %v3972_v26 }
  0x4d   :  { %v246_v24 = vld [vmem:[#allocation5 + $0x500] sm:$0xff]  ;;  %v3965_v28 = vcombine.high %v118_v22, %v122_v23  ;;  %2498 = vmatprep.subr.bf16.mxu1 %v4101_v21  ;;  %v3964_v34 = vcombine.low %v118_v22, %v122_v23 }
  0x4e   :  { %v250_v25 = vld [vmem:[#allocation5 + $0x520] sm:$0xff]  ;;  %2499 = vmatpush1.bf16.msra.mxu1 %v4100_v27 }
  0x4f   :  { %v4093_v29 = vcombine.high %v246_v24, %v250_v25  ;;  %v110_v30 = vld [vmem:[#allocation5 + $0xc0] sm:$0xff]  ;;  %2459 = vmatprep.subr.bf16.mxu0 %v3965_v28  ;;  %v4092_v35 = vcombine.low %v246_v24, %v250_v25 }
  0x50   :  { %v114_v31 = vld [vmem:[#allocation5 + $0xe0] sm:$0xff]  ;;  %2460 = vmatpush1.bf16.msra.mxu0 %v3964_v34 }
  0x51   :  { %v238_v32 = vld [vmem:[#allocation5 + $0x4c0] sm:$0xff]  ;;  %v3957_v36 = vcombine.high %v110_v30, %v114_v31  ;;  %2500 = vmatprep.subr.bf16.mxu1 %v4093_v29  ;;  %v3956_v42 = vcombine.low %v110_v30, %v114_v31 }
  0x52   :  { %v242_v33 = vld [vmem:[#allocation5 + $0x4e0] sm:$0xff]  ;;  %2501 = vmatpush1.bf16.msra.mxu1 %v4092_v35 }
  0x53   :  { %v4085_v37 = vcombine.high %v238_v32, %v242_v33  ;;  %v102_v38 = vld [vmem:[#allocation5 + $0x80] sm:$0xff]  ;;  %2461 = vmatprep.subr.bf16.mxu0 %v3957_v36  ;;  %v4084_v43 = vcombine.low %v238_v32, %v242_v33 }
  0x54   :  { %v106_v39 = vld [vmem:[#allocation5 + $0xa0] sm:$0xff]  ;;  %2462 = vmatpush1.bf16.msra.mxu0 %v3956_v42 }
  0x55   :  { %v230_v40 = vld [vmem:[#allocation5 + $0x480] sm:$0xff]  ;;  %v3949_v44 = vcombine.high %v102_v38, %v106_v39  ;;  %2502 = vmatprep.subr.bf16.mxu1 %v4085_v37  ;;  %v3948_v50 = vcombine.low %v102_v38, %v106_v39 }
  0x56   :  { %v234_v41 = vld [vmem:[#allocation5 + $0x4a0] sm:$0xff]  ;;  %2503 = vmatpush1.bf16.msra.mxu1 %v4084_v43 }
  0x57   :  { %v4077_v45 = vcombine.high %v230_v40, %v234_v41  ;;  %v94_v46 = vld [vmem:[#allocation5 + $0x40] sm:$0xff]  ;;  %2463 = vmatprep.subr.bf16.mxu0 %v3949_v44  ;;  %v4076_v51 = vcombine.low %v230_v40, %v234_v41 }
  0x58   :  { %v98_v47 = vld [vmem:[#allocation5 + $0x60] sm:$0xff]  ;;  %2464 = vmatpush1.bf16.msra.mxu0 %v3948_v50 }
  0x59   :  { %v222_v48 = vld [vmem:[#allocation5 + $0x440] sm:$0xff]  ;;  %v3941_v52 = vcombine.high %v94_v46, %v98_v47  ;;  %2504 = vmatprep.subr.bf16.mxu1 %v4077_v45  ;;  %v3940_v62 = vcombine.low %v94_v46, %v98_v47 }
  0x5a   :  { %v226_v49 = vld [vmem:[#allocation5 + $0x460] sm:$0xff]  ;;  %2505 = vmatpush1.bf16.msra.mxu1 %v4076_v51 }
  0x5b   :  { %v4069_v55 = vcombine.high %v222_v48, %v226_v49  ;;  %v86_v56 = vld [vmem:[#allocation5] sm:$0xff]  ;;  %2465 = vmatprep.subr.bf16.mxu0 %v3941_v52  ;;  %v4068_v63 = vcombine.low %v222_v48, %v226_v49 }
  0x5c   :  { %v90_v57 = vld [vmem:[#allocation5 + $0x20] sm:$0xff]  ;;  %2466 = vmatpush1.bf16.msra.mxu0 %v3940_v62 }
  0x5d   :  { %v214_v60 = vld [vmem:[#allocation5 + $0x400] sm:$0xff]  ;;  %v3933_v0 = vcombine.high %v86_v56, %v90_v57  ;;  %2506 = vmatprep.subr.bf16.mxu1 %v4069_v55  ;;  %v3932_v6 = vcombine.low %v86_v56, %v90_v57 }
  0x5e   :  { %v218_v61 = vld [vmem:[#allocation5 + $0x420] sm:$0xff]  ;;  %2507 = vmatpush1.bf16.msra.mxu1 %v4068_v63 }
  0x5f   :  { %v4061_v1 = vcombine.high %v214_v60, %v218_v61  ;;  %v206_v2 = vld [vmem:[#allocation5 + $0x3c0] sm:$0xff]  ;;  %2467 = vmatprep.subr.bf16.mxu0 %v3933_v0  ;;  %v4060_v7 = vcombine.low %v214_v60, %v218_v61 }
  0x60   :  { %v210_v3 = vld [vmem:[#allocation5 + $0x3e0] sm:$0xff]  ;;  %2468 = vmatpush1.bf16.msra.mxu0 %v3932_v6 }
  0x61   :  { %v334_v4 = vld [vmem:[#allocation5 + $0x7c0] sm:$0xff]  ;;  %v4053_v8 = vcombine.high %v206_v2, %v210_v3  ;;  %2508 = vmatprep.subr.bf16.mxu1 %v4061_v1  ;;  %v4052_v14 = vcombine.low %v206_v2, %v210_v3 }
  0x62   :  { %v338_v5 = vld [vmem:[#allocation5 + $0x7e0] sm:$0xff]  ;;  %2509 = vmatpush1.bf16.msra.mxu1 %v4060_v7 }
  0x63   :  { %v4181_v9 = vcombine.high %v334_v4, %v338_v5  ;;  %v198_v10 = vld [vmem:[#allocation5 + $0x380] sm:$0xff]  ;;  %2469 = vmatprep.subr.bf16.mxu0 %v4053_v8  ;;  %v4180_v15 = vcombine.low %v334_v4, %v338_v5  ;;  %v143_v8 = vld [vmem:[#allocation5 + $0x1c8] sm:$0xff] }
  0x64   :  { %v202_v11 = vld [vmem:[#allocation5 + $0x3a0] sm:$0xff]  ;;  %2470 = vmatpush2.bf16.msra.mxu0 %v4052_v14 }
  0x65   :  { %v326_v12 = vld [vmem:[#allocation5 + $0x780] sm:$0xff]  ;;  %v4045_v16 = vcombine.high %v198_v10, %v202_v11  ;;  %2510 = vmatprep.subr.bf16.mxu1 %v4181_v9  ;;  %v4044_v22 = vcombine.low %v198_v10, %v202_v11  ;;  %v147_v9 = vld [vmem:[#allocation5 + $0x1e8] sm:$0xff] }
  0x66   :  { %v330_v13 = vld [vmem:[#allocation5 + $0x7a0] sm:$0xff]  ;;  %2511 = vmatpush2.bf16.msra.mxu1 %v4180_v15 }
  0x67   :  { %v4173_v17 = vcombine.high %v326_v12, %v330_v13  ;;  %v190_v18 = vld [vmem:[#allocation5 + $0x340] sm:$0xff]  ;;  %2471 = vmatprep.subr.bf16.mxu0 %v4045_v16  ;;  %v4172_v23 = vcombine.low %v326_v12, %v330_v13  ;;  %v3991_v13 = vcombine.high %v143_v8, %v147_v9  ;;  %v4852_v16 = vcombine.low %v4836_v53, %v4836_v53 }
  0x68   :  { %v194_v19 = vld [vmem:[#allocation5 + $0x360] sm:$0xff]  ;;  %2472 = vmatpush2.bf16.msra.mxu0 %v4044_v22  ;;  %v3990_v22 = vcombine.low %v143_v8, %v147_v9 }
  0x69   :  { %v318_v20 = vld [vmem:[#allocation5 + $0x740] sm:$0xff]  ;;  %v4037_v24 = vcombine.high %v190_v18, %v194_v19  ;;  %2512 = vmatprep.subr.bf16.mxu1 %v4173_v17  ;;  %v4036_v30 = vcombine.low %v190_v18, %v194_v19  ;;  %v135_v17 = vld [vmem:[#allocation5 + $0x188] sm:$0xff]  ;;  %v4854_v19 = vld [vmem:[#allocation2 + $0x10] sm:$0xff] }
  0x6a   :  { %v322_v21 = vld [vmem:[#allocation5 + $0x760] sm:$0xff]  ;;  %2513 = vmatpush2.bf16.msra.mxu1 %v4172_v23  ;;  %v139_v18 = vld [vmem:[#allocation5 + $0x1a8] sm:$0xff] }
  0x6b   :  { %v4165_v25 = vcombine.high %v318_v20, %v322_v21  ;;  %v182_v26 = vld [vmem:[#allocation5 + $0x300] sm:$0xff]  ;;  %2473 = vmatprep.subr.bf16.mxu0 %v4037_v24  ;;  %v4164_v31 = vcombine.low %v318_v20, %v322_v21  ;;  %v4858_v20 = vcombine.low %v4838_v54, %v4838_v54  ;;  %v3983_v53 = vcombine.high %v135_v17, %v139_v18 }
  0x6c   :  { %v186_v27 = vld [vmem:[#allocation5 + $0x320] sm:$0xff]  ;;  %2474 = vmatpush2.bf16.msra.mxu0 %v4036_v30 }
  0x6d   :  { %v310_v28 = vld [vmem:[#allocation5 + $0x700] sm:$0xff]  ;;  %v4029_v32 = vcombine.high %v182_v26, %v186_v27  ;;  %2514 = vmatprep.subr.bf16.mxu1 %v4165_v25  ;;  %v4028_v38 = vcombine.low %v182_v26, %v186_v27  ;;  %v127_v26 = vld [vmem:[#allocation5 + $0x148] sm:$0xff] }
  0x6e   :  { %v314_v29 = vld [vmem:[#allocation5 + $0x720] sm:$0xff]  ;;  %2515 = vmatpush2.bf16.msra.mxu1 %v4164_v31  ;;  %v131_v27 = vld [vmem:[#allocation5 + $0x168] sm:$0xff] }
  0x6f   :  { %v4157_v33 = vcombine.high %v310_v28, %v314_v29  ;;  %v174_v34 = vld [vmem:[#allocation5 + $0x2c0] sm:$0xff]  ;;  %2475 = vmatprep.subr.bf16.mxu0 %v4029_v32  ;;  %v4156_v39 = vcombine.low %v310_v28, %v314_v29  ;;  %v4862_v28 = vcombine.high %v4854_v19, %v4854_v19  ;;  %v3982_v29 = vcombine.low %v135_v17, %v139_v18 }
  0x70   :  { %v178_v35 = vld [vmem:[#allocation5 + $0x2e0] sm:$0xff]  ;;  %2476 = vmatpush2.bf16.msra.mxu0 %v4028_v38 }
  0x71   :  { %v302_v36 = vld [vmem:[#allocation5 + $0x6c0] sm:$0xff]  ;;  %v4021_v40 = vcombine.high %v174_v34, %v178_v35  ;;  %2516 = vmatprep.subr.bf16.mxu1 %v4157_v33  ;;  %v4020_v46 = vcombine.low %v174_v34, %v178_v35  ;;  %v119_v33 = vld [vmem:[#allocation5 + $0x108] sm:$0xff]  ;;  %v3975_v34 = vcombine.high %v127_v26, %v131_v27 }
  0x72   :  { %v306_v37 = vld [vmem:[#allocation5 + $0x6e0] sm:$0xff]  ;;  %2517 = vmatpush2.bf16.msra.mxu1 %v4156_v39  ;;  %v123_v35 = vld [vmem:[#allocation5 + $0x128] sm:$0xff] }
  0x73   :  { %v4149_v41 = vcombine.high %v302_v36, %v306_v37  ;;  %v166_v42 = vld [vmem:[#allocation5 + $0x280] sm:$0xff]  ;;  %2477 = vmatprep.subr.bf16.mxu0 %v4021_v40  ;;  %v4148_v47 = vcombine.low %v302_v36, %v306_v37  ;;  %v3974_v37 = vcombine.low %v127_v26, %v131_v27  ;;  %v203_v26 = vld [vmem:[#allocation5 + $0x3a8] sm:$0xff] }
  0x74   :  { %v170_v43 = vld [vmem:[#allocation5 + $0x2a0] sm:$0xff]  ;;  %2478 = vmatpush2.bf16.msra.mxu0 %v4020_v46 }
  0x75   :  { %v294_v44 = vld [vmem:[#allocation5 + $0x680] sm:$0xff]  ;;  %v4013_v48 = vcombine.high %v166_v42, %v170_v43  ;;  %2518 = vmatprep.subr.bf16.mxu1 %v4149_v41  ;;  %v4012_v56 = vcombine.low %v166_v42, %v170_v43  ;;  %v111_v41 = vld [vmem:[#allocation5 + $0xc8] sm:$0xff]  ;;  %v3967_v42 = vcombine.high %v119_v33, %v123_v35 }
  0x76   :  { %v298_v45 = vld [vmem:[#allocation5 + $0x6a0] sm:$0xff]  ;;  %2519 = vmatpush2.bf16.msra.mxu1 %v4148_v47  ;;  %v115_v43 = vld [vmem:[#allocation5 + $0xe8] sm:$0xff] }
  0x77   :  { %v4141_v49 = vcombine.high %v294_v44, %v298_v45  ;;  %v158_v50 = vld [vmem:[#allocation5 + $0x240] sm:$0xff]  ;;  %2479 = vmatprep.subr.bf16.mxu0 %v4013_v48  ;;  %v4140_v57 = vcombine.low %v294_v44, %v298_v45  ;;  %v3966_v45 = vcombine.low %v119_v33, %v123_v35  ;;  %v195_v33 = vld [vmem:[#allocation5 + $0x368] sm:$0xff] }
  0x78   :  { %v162_v51 = vld [vmem:[#allocation5 + $0x260] sm:$0xff]  ;;  %2480 = vmatpush2.bf16.msra.mxu0 %v4012_v56 }
  0x79   :  { %v286_v52 = vld [vmem:[#allocation5 + $0x640] sm:$0xff]  ;;  %v4005_v60 = vcombine.high %v158_v50, %v162_v51  ;;  %2520 = vmatprep.subr.bf16.mxu1 %v4141_v49  ;;  %v4004_v2 = vcombine.low %v158_v50, %v162_v51  ;;  %v103_v49 = vld [vmem:[#allocation5 + $0x88] sm:$0xff]  ;;  %v3959_v50 = vcombine.high %v111_v41, %v115_v43 }
  0x7a   :  { %v290_v55 = vld [vmem:[#allocation5 + $0x660] sm:$0xff]  ;;  %2521 = vmatpush2.bf16.msra.mxu1 %v4140_v57  ;;  %v107_v51 = vld [vmem:[#allocation5 + $0xa8] sm:$0xff] }
  0x7b   :  { %v4133_v61 = vcombine.high %v286_v52, %v290_v55  ;;  %v150_v62 = vld [vmem:[#allocation5 + $0x200] sm:$0xff]  ;;  %2481 = vmatprep.subr.bf16.mxu0 %v4005_v60  ;;  %v4132_v3 = vcombine.low %v286_v52, %v290_v55  ;;  %v3958_v55 = vcombine.low %v111_v41, %v115_v43  ;;  %v187_v41 = vld [vmem:[#allocation5 + $0x328] sm:$0xff] }
  0x7c   :  { %v154_v63 = vld [vmem:[#allocation5 + $0x220] sm:$0xff]  ;;  %2482 = vmatpush2.bf16.msra.mxu0 %v4004_v2 }
  0x7d   :  { %v278_v0 = vld [vmem:[#allocation5 + $0x600] sm:$0xff]  ;;  %v3997_v4 = vcombine.high %v150_v62, %v154_v63  ;;  %2522 = vmatprep.subr.bf16.mxu1 %v4133_v61  ;;  %v3996_v10 = vcombine.low %v150_v62, %v154_v63  ;;  %v95_v61 = vld [vmem:[#allocation5 + $0x48] sm:$0xff]  ;;  %v3951_v62 = vcombine.high %v103_v49, %v107_v51 }
  0x7e   :  { %v282_v1 = vld [vmem:[#allocation5 + $0x620] sm:$0xff]  ;;  %2523 = vmatpush2.bf16.msra.mxu1 %v4132_v3  ;;  %v99_v63 = vld [vmem:[#allocation5 + $0x68] sm:$0xff] }
  0x7f   :  { %v4125_v5 = vcombine.high %v278_v0, %v282_v1  ;;  %v398_v6 = vld [vmem:[#allocation5 + $0x9c0] sm:$0xff]  ;;  %2483 = vmatprep.subr.bf16.mxu0 %v3997_v4  ;;  %v4124_v11 = vcombine.low %v278_v0, %v282_v1  ;;  %v3950_v1 = vcombine.low %v103_v49, %v107_v51  ;;  %v3942_v9 = vcombine.low %v95_v61, %v99_v63  ;;  %v179_v49 = vld [vmem:[#allocation5 + $0x2e8] sm:$0xff] }
  0x80   :  { %v402_v7 = vld [vmem:[#allocation5 + $0x9e0] sm:$0xff]  ;;  %2484 = vmatpush2.bf16.msra.mxu0 %v3996_v10 }
  0x81   :  { %v4245_v12 = vcombine.high %v398_v6, %v402_v7  ;;  %2524 = vmatprep.subr.bf16.mxu1 %v4125_v5  ;;  %v390_v14 = vld [vmem:[#allocation5 + $0x980] sm:$0xff]  ;;  %v4244_v21 = vcombine.low %v398_v6, %v402_v7  ;;  %v87_v5 = vld [vmem:[#allocation5 + $0x8] sm:$0xff]  ;;  %v3943_v6 = vcombine.high %v95_v61, %v99_v63 }
  0x82   :  { %v394_v15 = vld [vmem:[#allocation5 + $0x9a0] sm:$0xff]  ;;  %2525 = vmatpush2.bf16.msra.mxu1 %v4124_v11  ;;  %v91_v7 = vld [vmem:[#allocation5 + $0x28] sm:$0xff] }
  0x83   :  { %2535 = vmatprep.subr.bf16.mxu0 %v4245_v12  ;;  %v4237_v23 = vcombine.high %v390_v14, %v394_v15  ;;  %v382_v24 = vld [vmem:[#allocation5 + $0x940] sm:$0xff]  ;;  %2576 = vmatprep.subr.bf16.mxu1 %v3991_v13  ;;  %v4236_v54 = vcombine.low %v390_v14, %v394_v15  ;;  %v207_v13 = vld [vmem:[#allocation5 + $0x3c8] sm:$0xff]  ;;  %v3935_v14 = vcombine.high %v87_v5, %v91_v7 }
  0x84   :  { %v386_v25 = vld [vmem:[#allocation5 + $0x960] sm:$0xff]  ;;  %2486 = vmatmul.mubr.bf16.vlgmr.msra.gmra.mxu0 %v4852_v16  ;;  %v211_v15 = vld [vmem:[#allocation5 + $0x3e8] sm:$0xff]  ;;  %v3934_v18 = vcombine.low %v87_v5, %v91_v7 }
  0x85   :  { %2527 = vmatmul.mubr.bf16.vlgmr.msra.gmra.mxu1 %v4858_v20  ;;  %2536 = vmatpush1.bf16.msra.mxu0 %v4244_v21  ;;  %v4229_v30 = vcombine.high %v382_v24, %v386_v25  ;;  %v374_v31 = vld [vmem:[#allocation5 + $0x900] sm:$0xff]  ;;  %v4228_v36 = vcombine.low %v382_v24, %v386_v25  ;;  %v199_v24 = vld [vmem:[#allocation5 + $0x388] sm:$0xff]  ;;  %v4055_v25 = vcombine.high %v207_v13, %v211_v15 }
  0x86   :  { %2577 = vmatpush1.bf16.msra.mxu1 %v3990_v22  ;;  %2537 = vmatprep.subr.bf16.mxu0 %v4237_v23  ;;  %v378_v32 = vld [vmem:[#allocation5 + $0x920] sm:$0xff]  ;;  %v4054_v27 = vcombine.low %v207_v13, %v211_v15  ;;  %v4046_v35 = vcombine.low %v199_v24, %v203_v26  ;;  %v171_v61 = vld [vmem:[#allocation5 + $0x2a8] sm:$0xff] }
  0x87   :  { %2578 = vmatprep.subr.bf16.mxu1 %v3983_v53  ;;  %2567 = vmatprep.mubr.bf16.mxu0 %v4862_v28  ;;  %v4221_v38 = vcombine.high %v374_v31, %v378_v32  ;;  %v366_v39 = vld [vmem:[#allocation5 + $0x8c0] sm:$0xff]  ;;  %v4220_v44 = vcombine.low %v374_v31, %v378_v32  ;;  %v191_v31 = vld [vmem:[#allocation5 + $0x348] sm:$0xff]  ;;  %v4047_v32 = vcombine.high %v199_v24, %v203_v26 }
  0x88   :  { %2608 = vmatprep.mubr.bf16.mxu1 %v4842_v58  ;;  %v370_v40 = vld [vmem:[#allocation5 + $0x8e0] sm:$0xff]  ;;  %v4038_v43 = vcombine.low %v191_v31, %v195_v33  ;;  %v163_v5 = vld [vmem:[#allocation5 + $0x268] sm:$0xff] }
  0x89   :  { %2538 = vmatpush1.bf16.msra.mxu0 %v4236_v54  ;;  %v4213_v46 = vcombine.high %v366_v39, %v370_v40  ;;  %v358_v47 = vld [vmem:[#allocation5 + $0x880] sm:$0xff]  ;;  %v4212_v52 = vcombine.low %v366_v39, %v370_v40  ;;  %v183_v39 = vld [vmem:[#allocation5 + $0x308] sm:$0xff]  ;;  %v4039_v40 = vcombine.high %v191_v31, %v195_v33 }
  0x8a   :  { %2579 = vmatpush1.bf16.msra.mxu1 %v3982_v29  ;;  %2539 = vmatprep.subr.bf16.mxu0 %v4229_v30  ;;  %v362_v48 = vld [vmem:[#allocation5 + $0x8a0] sm:$0xff]  ;;  %v4030_v51 = vcombine.low %v183_v39, %v187_v41  ;;  %v155_v13 = vld [vmem:[#allocation5 + $0x228] sm:$0xff] }
  0x8b   :  { %2580 = vmatprep.subr.bf16.mxu1 %v3975_v34  ;;  %v4205_v56 = vcombine.high %v358_v47, %v362_v48  ;;  %v350_v57 = vld [vmem:[#allocation5 + $0x840] sm:$0xff]  ;;  %v4204_v0 = vcombine.low %v358_v47, %v362_v48  ;;  %v175_v47 = vld [vmem:[#allocation5 + $0x2c8] sm:$0xff]  ;;  %v4031_v48 = vcombine.high %v183_v39, %v187_v41 }
  0x8c   :  { %v354_v60 = vld [vmem:[#allocation5 + $0x860] sm:$0xff]  ;;  %v4022_v63 = vcombine.low %v175_v47, %v179_v49  ;;  %v403_v24 = vld [vmem:[#allocation5 + $0x9e8] sm:$0xff] }
  0x8d   :  { %2540 = vmatpush1.bf16.msra.mxu0 %v4228_v36  ;;  %v4197_v2 = vcombine.high %v350_v57, %v354_v60  ;;  %v342_v3 = vld [vmem:[#allocation5 + $0x800] sm:$0xff]  ;;  %v4196_v8 = vcombine.low %v350_v57, %v354_v60  ;;  %v167_v57 = vld [vmem:[#allocation5 + $0x288] sm:$0xff]  ;;  %v4023_v60 = vcombine.high %v175_v47, %v179_v49 }
  0x8e   :  { %2581 = vmatpush1.bf16.msra.mxu1 %v3974_v37  ;;  %2541 = vmatprep.subr.bf16.mxu0 %v4221_v38  ;;  %v346_v4 = vld [vmem:[#allocation5 + $0x820] sm:$0xff]  ;;  %v4014_v7 = vcombine.low %v167_v57, %v171_v61  ;;  %v395_v31 = vld [vmem:[#allocation5 + $0x9a8] sm:$0xff] }
  0x8f   :  { %2582 = vmatprep.subr.bf16.mxu1 %v3967_v42  ;;  %v4189_v10 = vcombine.high %v342_v3, %v346_v4  ;;  %v462_v11 = vld [vmem:[#allocation5 + $0xbc0] sm:$0xff]  ;;  %v4188_v17 = vcombine.low %v342_v3, %v346_v4  ;;  %v159_v3 = vld [vmem:[#allocation5 + $0x248] sm:$0xff]  ;;  %v4015_v4 = vcombine.high %v167_v57, %v171_v61 }
  0x90   :  { %v466_v12 = vld [vmem:[#allocation5 + $0xbe0] sm:$0xff]  ;;  %v4006_v15 = vcombine.low %v159_v3, %v163_v5  ;;  %v383_v39 = vld [vmem:[#allocation5 + $0x948] sm:$0xff] }
  0x91   :  { %2542 = vmatpush1.bf16.msra.mxu0 %v4220_v44  ;;  %v4309_v21 = vcombine.high %v462_v11, %v466_v12  ;;  %v454_v22 = vld [vmem:[#allocation5 + $0xb80] sm:$0xff]  ;;  %v4308_v53 = vcombine.low %v462_v11, %v466_v12  ;;  %v151_v11 = vld [vmem:[#allocation5 + $0x208] sm:$0xff]  ;;  %v4007_v12 = vcombine.high %v159_v3, %v163_v5 }
  0x92   :  { %2583 = vmatpush1.bf16.msra.mxu1 %v3966_v45  ;;  %2543 = vmatprep.subr.bf16.mxu0 %v4213_v46  ;;  %v458_v23 = vld [vmem:[#allocation5 + $0xba0] sm:$0xff]  ;;  %v3998_v26 = vcombine.low %v151_v11, %v155_v13  ;;  %v379_v47 = vld [vmem:[#allocation5 + $0x928] sm:$0xff] }
  0x93   :  { %2584 = vmatprep.subr.bf16.mxu1 %v3959_v50  ;;  %v4301_v54 = vcombine.high %v454_v22, %v458_v23  ;;  %v446_v29 = vld [vmem:[#allocation5 + $0xb40] sm:$0xff]  ;;  %v4300_v34 = vcombine.low %v454_v22, %v458_v23  ;;  %v399_v22 = vld [vmem:[#allocation5 + $0x9c8] sm:$0xff]  ;;  %v3999_v23 = vcombine.high %v151_v11, %v155_v13 }
  0x94   :  { %v450_v30 = vld [vmem:[#allocation5 + $0xb60] sm:$0xff]  ;;  %v371_v57 = vld [vmem:[#allocation5 + $0x8e8] sm:$0xff] }
  0x95   :  { %2544 = vmatpush1.bf16.msra.mxu0 %v4212_v52  ;;  %v4293_v36 = vcombine.high %v446_v29, %v450_v30  ;;  %v438_v37 = vld [vmem:[#allocation5 + $0xb00] sm:$0xff]  ;;  %v4292_v42 = vcombine.low %v446_v29, %v450_v30  ;;  %v391_v29 = vld [vmem:[#allocation5 + $0x988] sm:$0xff]  ;;  %v4247_v30 = vcombine.high %v399_v22, %v403_v24 }
  0x96   :  { %2585 = vmatpush1.bf16.msra.mxu1 %v3958_v55  ;;  %2545 = vmatprep.subr.bf16.mxu0 %v4205_v56  ;;  %v442_v38 = vld [vmem:[#allocation5 + $0xb20] sm:$0xff]  ;;  %v363_v3 = vld [vmem:[#allocation5 + $0x8a8] sm:$0xff] }
  0x97   :  { %2586 = vmatprep.subr.bf16.mxu1 %v3951_v62  ;;  %v4285_v44 = vcombine.high %v438_v37, %v442_v38  ;;  %v430_v45 = vld [vmem:[#allocation5 + $0xac0] sm:$0xff]  ;;  %v4284_v50 = vcombine.low %v438_v37, %v442_v38  ;;  %v255_v37 = vld [vmem:[#allocation5 + $0x548] sm:$0xff] }
  0x98   :  { %v434_v46 = vld [vmem:[#allocation5 + $0xae0] sm:$0xff]  ;;  %v259_v38 = vld [vmem:[#allocation5 + $0x568] sm:$0xff] }
  0x99   :  { %2546 = vmatpush1.bf16.msra.mxu0 %v4204_v0  ;;  %v4277_v52 = vcombine.high %v430_v45, %v434_v46  ;;  %v422_v55 = vld [vmem:[#allocation5 + $0xa80] sm:$0xff]  ;;  %v4276_v62 = vcombine.low %v430_v45, %v434_v46  ;;  %v251_v45 = vld [vmem:[#allocation5 + $0x528] sm:$0xff] }
  0x9a   :  { %2587 = vmatpush1.bf16.msra.mxu1 %v3950_v1  ;;  %2547 = vmatprep.subr.bf16.mxu0 %v4197_v2  ;;  %v426_v56 = vld [vmem:[#allocation5 + $0xaa0] sm:$0xff]  ;;  %v375_v46 = vld [vmem:[#allocation5 + $0x908] sm:$0xff] }
  0x9b   :  { %2588 = vmatprep.subr.bf16.mxu1 %v3943_v6  ;;  %v4269_v0 = vcombine.high %v422_v55, %v426_v56  ;;  %v414_v1 = vld [vmem:[#allocation5 + $0xa40] sm:$0xff]  ;;  %v4268_v6 = vcombine.low %v422_v55, %v426_v56  ;;  %v243_v55 = vld [vmem:[#allocation5 + $0x4e8] sm:$0xff]  ;;  %v4222_v61 = vcombine.low %v375_v46, %v379_v47 }
  0x9c   :  { %v418_v2 = vld [vmem:[#allocation5 + $0xa60] sm:$0xff]  ;;  %v367_v56 = vld [vmem:[#allocation5 + $0x8c8] sm:$0xff] }
  0x9d   :  { %2548 = vmatpush1.bf16.msra.mxu0 %v4196_v8  ;;  %v4261_v8 = vcombine.high %v414_v1, %v418_v2  ;;  %v4214_v5 = vcombine.low %v367_v56, %v371_v57  ;;  %v355_v11 = vld [vmem:[#allocation5 + $0x868] sm:$0xff] }
  0x9e   :  { %2589 = vmatpush1.bf16.msra.mxu1 %v3942_v9  ;;  %2549 = vmatprep.subr.bf16.mxu0 %v4189_v10  ;;  %v406_v9 = vld [vmem:[#allocation5 + $0xa00] sm:$0xff] }
  0x9f   :  { %2590 = vmatprep.subr.bf16.mxu1 %v3935_v14  ;;  %v410_v10 = vld [vmem:[#allocation5 + $0xa20] sm:$0xff]  ;;  %v4260_v14 = vcombine.low %v414_v1, %v418_v2  ;;  %v235_v1 = vld [vmem:[#allocation5 + $0x4a8] sm:$0xff] }
  0xa0   :  { %v359_v2 = vld [vmem:[#allocation5 + $0x888] sm:$0xff] }
  0xa1   :  { %2550 = vmatpush1.bf16.msra.mxu0 %v4188_v17  ;;  %v4253_v17 = vcombine.high %v406_v9, %v410_v10  ;;  %v4206_v13 = vcombine.low %v359_v2, %v363_v3 }
  0xa2   :  { %2591 = vmatpush1.bf16.msra.mxu1 %v3934_v18  ;;  %2551 = vmatprep.subr.bf16.mxu0 %v4309_v21  ;;  %v271_v18 = vld [vmem:[#allocation5 + $0x5c8] sm:$0xff] }
  0xa3   :  { %2592 = vmatprep.subr.bf16.mxu1 %v4055_v25  ;;  %v275_v21 = vld [vmem:[#allocation5 + $0x5e8] sm:$0xff]  ;;  %v4252_v25 = vcombine.low %v406_v9, %v410_v10 }
  0xa4   :  { %v4118_v33 = vcombine.low %v271_v18, %v275_v21  ;;  %v227_v9 = vld [vmem:[#allocation5 + $0x468] sm:$0xff] }
  0xa5   :  { %2552 = vmatpush2.bf16.msra.mxu0 %v4308_v53  ;;  %v4119_v53 = vcombine.high %v271_v18, %v275_v21  ;;  %v351_v10 = vld [vmem:[#allocation5 + $0x848] sm:$0xff] }
  0xa6   :  { %2593 = vmatpush2.bf16.msra.mxu1 %v4054_v27  ;;  %2553 = vmatprep.subr.bf16.mxu0 %v4301_v54  ;;  %v263_v27 = vld [vmem:[#allocation5 + $0x588] sm:$0xff] }
  0xa7   :  { %2594 = vmatprep.subr.bf16.mxu1 %v4047_v32  ;;  %v267_v54 = vld [vmem:[#allocation5 + $0x5a8] sm:$0xff]  ;;  %v4870_v32 = vcombine.low %v4854_v19, %v4854_v19  ;;  %v4238_v19 = vcombine.low %v391_v29, %v395_v31 }
  0xa8   :  { %v4110_v41 = vcombine.low %v263_v27, %v267_v54  ;;  %v219_v18 = vld [vmem:[#allocation5 + $0x428] sm:$0xff] }
  0xa9   :  { %2554 = vmatpush2.bf16.msra.mxu0 %v4300_v34  ;;  %v4246_v34 = vcombine.low %v399_v22, %v403_v24  ;;  %v343_v21 = vld [vmem:[#allocation5 + $0x808] sm:$0xff]  ;;  %v4198_v24 = vcombine.low %v351_v10, %v355_v11 }
  0xaa   :  { %2595 = vmatpush2.bf16.msra.mxu1 %v4046_v35  ;;  %2555 = vmatprep.subr.bf16.mxu0 %v4293_v36  ;;  %v4111_v35 = vcombine.high %v263_v27, %v267_v54  ;;  %v4239_v36 = vcombine.high %v391_v29, %v395_v31  ;;  %v347_v22 = vld [vmem:[#allocation5 + $0x828] sm:$0xff] }
  0xab   :  { %2596 = vmatprep.subr.bf16.mxu1 %v4039_v40  ;;  %v387_v40 = vld [vmem:[#allocation5 + $0x968] sm:$0xff]  ;;  %v4190_v31 = vcombine.low %v343_v21, %v347_v22 }
  0xac   :  { %v4230_v49 = vcombine.low %v383_v39, %v387_v40  ;;  %v339_v27 = vld [vmem:[#allocation5 + $0x7e8] sm:$0xff] }
  0xad   :  { %2556 = vmatpush2.bf16.msra.mxu0 %v4292_v42  ;;  %v4103_v42 = vcombine.high %v255_v37, %v259_v38  ;;  %v463_v54 = vld [vmem:[#allocation5 + $0xbc8] sm:$0xff] }
  0xae   :  { %2597 = vmatpush2.bf16.msra.mxu1 %v4038_v43  ;;  %2557 = vmatprep.subr.bf16.mxu0 %v4285_v44  ;;  %v4231_v43 = vcombine.high %v383_v39, %v387_v40  ;;  %v247_v44 = vld [vmem:[#allocation5 + $0x508] sm:$0xff] }
  0xaf   :  { %2598 = vmatprep.subr.bf16.mxu1 %v4031_v48  ;;  %v4102_v48 = vcombine.low %v255_v37, %v259_v38  ;;  %v467_v29 = vld [vmem:[#allocation5 + $0xbe8] sm:$0xff] }
  0xb0   :  { %v455_v37 = vld [vmem:[#allocation5 + $0xb88] sm:$0xff]  ;;  %v4310_v40 = vcombine.low %v463_v54, %v467_v29 }
  0xb1   :  { %2558 = vmatpush2.bf16.msra.mxu0 %v4284_v50  ;;  %v4095_v50 = vcombine.high %v247_v44, %v251_v45  ;;  %v459_v38 = vld [vmem:[#allocation5 + $0xba8] sm:$0xff] }
  0xb2   :  { %2599 = vmatpush2.bf16.msra.mxu1 %v4030_v51  ;;  %2559 = vmatprep.subr.bf16.mxu0 %v4277_v52  ;;  %v4223_v51 = vcombine.high %v375_v46, %v379_v47  ;;  %v239_v52 = vld [vmem:[#allocation5 + $0x4c8] sm:$0xff]  ;;  %v4302_v47 = vcombine.low %v455_v37, %v459_v38 }
  0xb3   :  { %2600 = vmatprep.subr.bf16.mxu1 %v4023_v60  ;;  %v4094_v60 = vcombine.low %v247_v44, %v251_v45  ;;  %v447_v44 = vld [vmem:[#allocation5 + $0xb48] sm:$0xff] }
  0xb4   :  { %v451_v45 = vld [vmem:[#allocation5 + $0xb68] sm:$0xff] }
  0xb5   :  { %2560 = vmatpush2.bf16.msra.mxu0 %v4276_v62  ;;  %v4087_v62 = vcombine.high %v239_v52, %v243_v55 }
  0xb6   :  { %2601 = vmatpush2.bf16.msra.mxu1 %v4022_v63  ;;  %2561 = vmatprep.subr.bf16.mxu0 %v4269_v0  ;;  %v4215_v63 = vcombine.high %v367_v56, %v371_v57  ;;  %v231_v0 = vld [vmem:[#allocation5 + $0x488] sm:$0xff]  ;;  %v4294_v57 = vcombine.low %v447_v44, %v451_v45 }
  0xb7   :  { %2602 = vmatprep.subr.bf16.mxu1 %v4015_v4  ;;  %v4086_v4 = vcombine.low %v239_v52, %v243_v55  ;;  %v439_v52 = vld [vmem:[#allocation5 + $0xb08] sm:$0xff] }
  0xb8   :  { %v443_v55 = vld [vmem:[#allocation5 + $0xb28] sm:$0xff] }
  0xb9   :  { %2562 = vmatpush2.bf16.msra.mxu0 %v4268_v6  ;;  %v4079_v6 = vcombine.high %v231_v0, %v235_v1 }
  0xba   :  { %2603 = vmatpush2.bf16.msra.mxu1 %v4014_v7  ;;  %2563 = vmatprep.subr.bf16.mxu0 %v4261_v8  ;;  %v4207_v7 = vcombine.high %v359_v2, %v363_v3  ;;  %v223_v8 = vld [vmem:[#allocation5 + $0x448] sm:$0xff]  ;;  %v4286_v3 = vcombine.low %v439_v52, %v443_v55 }
  0xbb   :  { %2604 = vmatprep.subr.bf16.mxu1 %v4007_v12  ;;  %v4078_v12 = vcombine.low %v231_v0, %v235_v1  ;;  %v431_v0 = vld [vmem:[#allocation5 + $0xac8] sm:$0xff] }
  0xbc   :  { %v435_v1 = vld [vmem:[#allocation5 + $0xae8] sm:$0xff] }
  0xbd   :  { %2564 = vmatpush2.bf16.msra.mxu0 %v4260_v14  ;;  %v4071_v14 = vcombine.high %v223_v8, %v227_v9 }
  0xbe   :  { %2605 = vmatpush2.bf16.msra.mxu1 %v4006_v15  ;;  %2565 = vmatprep.subr.bf16.mxu0 %v4253_v17  ;;  %v4199_v15 = vcombine.high %v351_v10, %v355_v11  ;;  %v215_v17 = vld [vmem:[#allocation5 + $0x408] sm:$0xff]  ;;  %v4278_v11 = vcombine.low %v431_v0, %v435_v1 }
  0xbf   :  { %2606 = vmatprep.subr.bf16.mxu1 %v3999_v23  ;;  %v4070_v23 = vcombine.low %v223_v8, %v227_v9  ;;  %v423_v8 = vld [vmem:[#allocation5 + $0xa88] sm:$0xff] }
  0xc0   :  { %v427_v9 = vld [vmem:[#allocation5 + $0xaa8] sm:$0xff] }
  0xc1   :  { %2566 = vmatpush2.bf16.msra.mxu0 %v4252_v25  ;;  %v4063_v25 = vcombine.high %v215_v17, %v219_v18 }
  0xc2   :  { %2607 = vmatpush2.bf16.msra.mxu1 %v3998_v26  ;;  %2617 = vmatprep.subr.bf16.mxu0 %v4119_v53  ;;  %v4191_v26 = vcombine.high %v343_v21, %v347_v22  ;;  %v335_v53 = vld [vmem:[#allocation5 + $0x7c8] sm:$0xff]  ;;  %v4270_v22 = vcombine.low %v423_v8, %v427_v9 }
  0xc3   :  { %2658 = vmatprep.subr.bf16.mxu1 %v4247_v30  ;;  %v4062_v30 = vcombine.low %v215_v17, %v219_v18  ;;  %v4182_v39 = vcombine.low %v335_v53, %v339_v27  ;;  %v415_v17 = vld [vmem:[#allocation5 + $0xa48] sm:$0xff] }
  0xc4   :  { %2568 = vmatmul.mubr.bf16.vlgmr.msra.gmra.mxu0 %v4870_v32  ;;  %v419_v18 = vld [vmem:[#allocation5 + $0xa68] sm:$0xff] }
  0xc5   :  { %2609 = vmatmul.mubr.bf16.vlgmr.msra.gmra.mxu1 %v4852_v16  ;;  %2618 = vmatpush1.bf16.msra.mxu0 %v4118_v33  ;;  %v4183_v33 = vcombine.high %v335_v53, %v339_v27  ;;  %v407_v53 = vld [vmem:[#allocation5 + $0xa08] sm:$0xff] }
  0xc6   :  { %2659 = vmatpush1.bf16.msra.mxu1 %v4246_v34  ;;  %2619 = vmatprep.subr.bf16.mxu0 %v4111_v35  ;;  %v4311_v34 = vcombine.high %v463_v54, %v467_v29  ;;  %v327_v35 = vld [vmem:[#allocation5 + $0x788] sm:$0xff]  ;;  %v4262_v29 = vcombine.low %v415_v17, %v419_v18 }
  0xc7   :  { %2660 = vmatprep.subr.bf16.mxu1 %v4239_v36  ;;  %2649 = vmatprep.mubr.bf16.mxu0 %v4846_v59  ;;  %v331_v36 = vld [vmem:[#allocation5 + $0x7a8] sm:$0xff] }
  0xc8   :  { %2690 = vmatprep.mubr.bf16.mxu1 %v4862_v28  ;;  %v4174_v46 = vcombine.low %v327_v35, %v331_v36  ;;  %v411_v27 = vld [vmem:[#allocation5 + $0xa28] sm:$0xff] }
  0xc9   :  { %2620 = vmatpush1.bf16.msra.mxu0 %v4110_v41  ;;  %v4175_v41 = vcombine.high %v327_v35, %v331_v36  ;;  %v272_v35 = vld [vmem:[#allocation5 + $0x5d0] sm:$0xff] }
  0xca   :  { %2661 = vmatpush1.bf16.msra.mxu1 %v4238_v19  ;;  %2621 = vmatprep.subr.bf16.mxu0 %v4103_v42  ;;  %v4303_v19 = vcombine.high %v455_v37, %v459_v38  ;;  %v319_v42 = vld [vmem:[#allocation5 + $0x748] sm:$0xff]  ;;  %v276_v36 = vld [vmem:[#allocation5 + $0x5f0] sm:$0xff]  ;;  %v4254_v38 = vcombine.low %v407_v53, %v411_v27 }
  0xcb   :  { %2662 = vmatprep.subr.bf16.mxu1 %v4231_v43  ;;  %v323_v43 = vld [vmem:[#allocation5 + $0x768] sm:$0xff] }
  0xcc   :  { %v4166_v56 = vcombine.low %v319_v42, %v323_v43 }
  0xcd   :  { %2622 = vmatpush1.bf16.msra.mxu0 %v4102_v48  ;;  %v4167_v48 = vcombine.high %v319_v42, %v323_v43  ;;  %v264_v42 = vld [vmem:[#allocation5 + $0x590] sm:$0xff] }
  0xce   :  { %2663 = vmatpush1.bf16.msra.mxu1 %v4230_v49  ;;  %2623 = vmatprep.subr.bf16.mxu0 %v4095_v50  ;;  %v4295_v49 = vcombine.high %v447_v44, %v451_v45  ;;  %v311_v50 = vld [vmem:[#allocation5 + $0x708] sm:$0xff]  ;;  %v268_v43 = vld [vmem:[#allocation5 + $0x5b0] sm:$0xff]  ;;  %v4120_v45 = vcombine.low %v272_v35, %v276_v36 }
  0xcf   :  { %2664 = vmatprep.subr.bf16.mxu1 %v4223_v51  ;;  %v315_v51 = vld [vmem:[#allocation5 + $0x728] sm:$0xff] }
  0xd0   :  { %v4158_v2 = vcombine.low %v311_v50, %v315_v51 }
  0xd1   :  { %2624 = vmatpush1.bf16.msra.mxu0 %v4094_v60  ;;  %v4159_v60 = vcombine.high %v311_v50, %v315_v51  ;;  %v256_v50 = vld [vmem:[#allocation5 + $0x550] sm:$0xff] }
  0xd2   :  { %2665 = vmatpush1.bf16.msra.mxu1 %v4222_v61  ;;  %2625 = vmatprep.subr.bf16.mxu0 %v4087_v62  ;;  %v4287_v61 = vcombine.high %v439_v52, %v443_v55  ;;  %v303_v62 = vld [vmem:[#allocation5 + $0x6c8] sm:$0xff]  ;;  %v260_v51 = vld [vmem:[#allocation5 + $0x570] sm:$0xff]  ;;  %v4112_v55 = vcombine.low %v264_v42, %v268_v43 }
  0xd3   :  { %2666 = vmatprep.subr.bf16.mxu1 %v4215_v63  ;;  %v307_v63 = vld [vmem:[#allocation5 + $0x6e8] sm:$0xff] }
  0xd4   :  { %v4150_v10 = vcombine.low %v303_v62, %v307_v63 }
  0xd5   :  { %2626 = vmatpush1.bf16.msra.mxu0 %v4086_v4  ;;  %v4151_v4 = vcombine.high %v303_v62, %v307_v63  ;;  %v248_v62 = vld [vmem:[#allocation5 + $0x510] sm:$0xff] }
  0xd6   :  { %2667 = vmatpush1.bf16.msra.mxu1 %v4214_v5  ;;  %2627 = vmatprep.subr.bf16.mxu0 %v4079_v6  ;;  %v4279_v5 = vcombine.high %v431_v0, %v435_v1  ;;  %v295_v6 = vld [vmem:[#allocation5 + $0x688] sm:$0xff]  ;;  %v252_v63 = vld [vmem:[#allocation5 + $0x530] sm:$0xff]  ;;  %v4104_v1 = vcombine.low %v256_v50, %v260_v51 }
  0xd7   :  { %2668 = vmatprep.subr.bf16.mxu1 %v4207_v7  ;;  %v299_v7 = vld [vmem:[#allocation5 + $0x6a8] sm:$0xff] }
  0xd8   :  { %v4142_v21 = vcombine.low %v295_v6, %v299_v7 }
  0xd9   :  { %2628 = vmatpush1.bf16.msra.mxu0 %v4078_v12  ;;  %v4143_v12 = vcombine.high %v295_v6, %v299_v7  ;;  %v240_v6 = vld [vmem:[#allocation5 + $0x4d0] sm:$0xff] }
  0xda   :  { %2669 = vmatpush1.bf16.msra.mxu1 %v4206_v13  ;;  %2629 = vmatprep.subr.bf16.mxu0 %v4071_v14  ;;  %v4271_v13 = vcombine.high %v423_v8, %v427_v9  ;;  %v287_v14 = vld [vmem:[#allocation5 + $0x648] sm:$0xff]  ;;  %v244_v7 = vld [vmem:[#allocation5 + $0x4f0] sm:$0xff]  ;;  %v4096_v9 = vcombine.low %v248_v62, %v252_v63 }
  0xdb   :  { %2670 = vmatprep.subr.bf16.mxu1 %v4199_v15  ;;  %v291_v15 = vld [vmem:[#allocation5 + $0x668] sm:$0xff] }
  0xdc   :  { %v4134_v54 = vcombine.low %v287_v14, %v291_v15 }
  0xdd   :  { %2630 = vmatpush1.bf16.msra.mxu0 %v4070_v23  ;;  %v4135_v23 = vcombine.high %v287_v14, %v291_v15  ;;  %v232_v14 = vld [vmem:[#allocation5 + $0x490] sm:$0xff] }
  0xde   :  { %2671 = vmatpush1.bf16.msra.mxu1 %v4198_v24  ;;  %2631 = vmatprep.subr.bf16.mxu0 %v4063_v25  ;;  %v4263_v24 = vcombine.high %v415_v17, %v419_v18  ;;  %v279_v25 = vld [vmem:[#allocation5 + $0x608] sm:$0xff]  ;;  %v236_v15 = vld [vmem:[#allocation5 + $0x4b0] sm:$0xff]  ;;  %v4088_v18 = vcombine.low %v240_v6, %v244_v7 }
  0xdf   :  { %2672 = vmatprep.subr.bf16.mxu1 %v4191_v26  ;;  %v283_v26 = vld [vmem:[#allocation5 + $0x628] sm:$0xff] }
  0xe0   :  { %v4126_v37 = vcombine.low %v279_v25, %v283_v26 }
  0xe1   :  { %2632 = vmatpush1.bf16.msra.mxu0 %v4062_v30  ;;  %v4127_v30 = vcombine.high %v279_v25, %v283_v26  ;;  %v224_v25 = vld [vmem:[#allocation5 + $0x450] sm:$0xff] }
  0xe2   :  { %2673 = vmatpush1.bf16.msra.mxu1 %v4190_v31  ;;  %2633 = vmatprep.subr.bf16.mxu0 %v4183_v33  ;;  %v4255_v31 = vcombine.high %v407_v53, %v411_v27  ;;  %v144_v33 = vld [vmem:[#allocation5 + $0x1d0] sm:$0xff]  ;;  %v4080_v27 = vcombine.low %v232_v14, %v236_v15 }
  0xe3   :  { %2674 = vmatprep.subr.bf16.mxu1 %v4311_v34  ;;  %v148_v34 = vld [vmem:[#allocation5 + $0x1f0] sm:$0xff] }
  0xe4   :  { %v3992_v44 = vcombine.low %v144_v33, %v148_v34  ;;  %v228_v26 = vld [vmem:[#allocation5 + $0x470] sm:$0xff] }
  0xe5   :  { %2634 = vmatpush2.bf16.msra.mxu0 %v4182_v39  ;;  %v3993_v39 = vcombine.high %v144_v33, %v148_v34  ;;  %v216_v33 = vld [vmem:[#allocation5 + $0x410] sm:$0xff] }
  0xe6   :  { %2675 = vmatpush2.bf16.msra.mxu1 %v4310_v40  ;;  %2635 = vmatprep.subr.bf16.mxu0 %v4175_v41  ;;  %v4121_v40 = vcombine.high %v272_v35, %v276_v36  ;;  %v136_v41 = vld [vmem:[#allocation5 + $0x190] sm:$0xff]  ;;  %v4072_v36 = vcombine.low %v224_v25, %v228_v26 }
  0xe7   :  { %2676 = vmatprep.subr.bf16.mxu1 %v4303_v19  ;;  %v140_v19 = vld [vmem:[#allocation5 + $0x1b0] sm:$0xff] }
  0xe8   :  { %v3984_v52 = vcombine.low %v136_v41, %v140_v19  ;;  %v220_v34 = vld [vmem:[#allocation5 + $0x430] sm:$0xff] }
  0xe9   :  { %2636 = vmatpush2.bf16.msra.mxu0 %v4174_v46  ;;  %v3985_v46 = vcombine.high %v136_v41, %v140_v19  ;;  %v336_v41 = vld [vmem:[#allocation5 + $0x7d0] sm:$0xff] }
  0xea   :  { %2677 = vmatpush2.bf16.msra.mxu1 %v4302_v47  ;;  %2637 = vmatprep.subr.bf16.mxu0 %v4167_v48  ;;  %v4113_v47 = vcombine.high %v264_v42, %v268_v43  ;;  %v128_v48 = vld [vmem:[#allocation5 + $0x150] sm:$0xff]  ;;  %v4064_v43 = vcombine.low %v216_v33, %v220_v34 }
  0xeb   :  { %2678 = vmatprep.subr.bf16.mxu1 %v4295_v49  ;;  %v132_v49 = vld [vmem:[#allocation5 + $0x170] sm:$0xff] }
  0xec   :  { %v3976_v0 = vcombine.low %v128_v48, %v132_v49  ;;  %v340_v19 = vld [vmem:[#allocation5 + $0x7f0] sm:$0xff] }
  0xed   :  { %2638 = vmatpush2.bf16.msra.mxu0 %v4166_v56  ;;  %v3977_v56 = vcombine.high %v128_v48, %v132_v49  ;;  %v328_v48 = vld [vmem:[#allocation5 + $0x790] sm:$0xff] }
  0xee   :  { %2679 = vmatpush2.bf16.msra.mxu1 %v4294_v57  ;;  %2639 = vmatprep.subr.bf16.mxu0 %v4159_v60  ;;  %v4105_v57 = vcombine.high %v256_v50, %v260_v51  ;;  %v120_v60 = vld [vmem:[#allocation5 + $0x110] sm:$0xff]  ;;  %v4184_v51 = vcombine.low %v336_v41, %v340_v19 }
  0xef   :  { %2680 = vmatprep.subr.bf16.mxu1 %v4287_v61  ;;  %v124_v61 = vld [vmem:[#allocation5 + $0x130] sm:$0xff] }
  0xf0   :  { %v3968_v8 = vcombine.low %v120_v60, %v124_v61  ;;  %v332_v49 = vld [vmem:[#allocation5 + $0x7b0] sm:$0xff] }
  0xf1   :  { %2640 = vmatpush2.bf16.msra.mxu0 %v4158_v2  ;;  %v3969_v2 = vcombine.high %v120_v60, %v124_v61  ;;  %v320_v60 = vld [vmem:[#allocation5 + $0x750] sm:$0xff] }
  0xf2   :  { %2681 = vmatpush2.bf16.msra.mxu1 %v4286_v3  ;;  %2641 = vmatprep.subr.bf16.mxu0 %v4151_v4  ;;  %v4097_v3 = vcombine.high %v248_v62, %v252_v63  ;;  %v112_v4 = vld [vmem:[#allocation5 + $0xd0] sm:$0xff]  ;;  %v4176_v63 = vcombine.low %v328_v48, %v332_v49 }
  0xf3   :  { %2682 = vmatprep.subr.bf16.mxu1 %v4279_v5  ;;  %v116_v5 = vld [vmem:[#allocation5 + $0xf0] sm:$0xff] }
  0xf4   :  { %v3960_v17 = vcombine.low %v112_v4, %v116_v5  ;;  %v324_v61 = vld [vmem:[#allocation5 + $0x770] sm:$0xff] }
  0xf5   :  { %2642 = vmatpush2.bf16.msra.mxu0 %v4150_v10  ;;  %v3961_v10 = vcombine.high %v112_v4, %v116_v5  ;;  %v312_v4 = vld [vmem:[#allocation5 + $0x710] sm:$0xff] }
  0xf6   :  { %2683 = vmatpush2.bf16.msra.mxu1 %v4278_v11  ;;  %2643 = vmatprep.subr.bf16.mxu0 %v4143_v12  ;;  %v4089_v11 = vcombine.high %v240_v6, %v244_v7  ;;  %v104_v12 = vld [vmem:[#allocation5 + $0x90] sm:$0xff]  ;;  %v4168_v7 = vcombine.low %v320_v60, %v324_v61 }
  0xf7   :  { %2684 = vmatprep.subr.bf16.mxu1 %v4271_v13  ;;  %v108_v13 = vld [vmem:[#allocation5 + $0xb0] sm:$0xff] }
  0xf8   :  { %v3952_v53 = vcombine.low %v104_v12, %v108_v13  ;;  %v316_v5 = vld [vmem:[#allocation5 + $0x730] sm:$0xff] }
  0xf9   :  { %2644 = vmatpush2.bf16.msra.mxu0 %v4142_v21  ;;  %v3953_v21 = vcombine.high %v104_v12, %v108_v13  ;;  %v304_v12 = vld [vmem:[#allocation5 + $0x6d0] sm:$0xff] }
  0xfa   :  { %2685 = vmatpush2.bf16.msra.mxu1 %v4270_v22  ;;  %2645 = vmatprep.subr.bf16.mxu0 %v4135_v23  ;;  %v4081_v22 = vcombine.high %v232_v14, %v236_v15  ;;  %v96_v23 = vld [vmem:[#allocation5 + $0x50] sm:$0xff]  ;;  %v4160_v15 = vcombine.low %v312_v4, %v316_v5 }
  0xfb   :  { %2686 = vmatprep.subr.bf16.mxu1 %v4263_v24  ;;  %v100_v24 = vld [vmem:[#allocation5 + $0x70] sm:$0xff] }
  0xfc   :  { %v3944_v35 = vcombine.low %v96_v23, %v100_v24  ;;  %v308_v13 = vld [vmem:[#allocation5 + $0x6f0] sm:$0xff] }
  0xfd   :  { %2646 = vmatpush2.bf16.msra.mxu0 %v4134_v54  ;;  %v3945_v54 = vcombine.high %v96_v23, %v100_v24  ;;  %v296_v23 = vld [vmem:[#allocation5 + $0x690] sm:$0xff] }
  0xfe   :  { %2687 = vmatpush2.bf16.msra.mxu1 %v4262_v29  ;;  %2647 = vmatprep.subr.bf16.mxu0 %v4127_v30  ;;  %v4073_v29 = vcombine.high %v224_v25, %v228_v26  ;;  %v88_v30 = vld [vmem:[#allocation5 + $0x10] sm:$0xff]  ;;  %v4152_v26 = vcombine.low %v304_v12, %v308_v13 }
  0xff   :  { %2688 = vmatprep.subr.bf16.mxu1 %v4255_v31  ;;  %v92_v31 = vld [vmem:[#allocation5 + $0x30] sm:$0xff] }
 0x100   :  { %v3936_v42 = vcombine.low %v88_v30, %v92_v31  ;;  %v300_v24 = vld [vmem:[#allocation5 + $0x6b0] sm:$0xff] }
 0x101   :  { %2648 = vmatpush2.bf16.msra.mxu0 %v4126_v37  ;;  %v3937_v37 = vcombine.high %v88_v30, %v92_v31  ;;  %v288_v30 = vld [vmem:[#allocation5 + $0x650] sm:$0xff] }
 0x102   :  { %2689 = vmatpush2.bf16.msra.mxu1 %v4254_v38  ;;  %2699 = vmatprep.subr.bf16.mxu0 %v3993_v39  ;;  %v4065_v38 = vcombine.high %v216_v33, %v220_v34  ;;  %v208_v39 = vld [vmem:[#allocation5 + $0x3d0] sm:$0xff]  ;;  %v472_v34 = vlaneseq }
 0x103   :  { %2740 = vmatprep.subr.bf16.mxu1 %v4121_v40  ;;  %v212_v40 = vld [vmem:[#allocation5 + $0x3f0] sm:$0xff] }
 0x104   :  { %2650 = vmatmul.mubr.bf16.vlgmr.msra.gmra.mxu0 %v4858_v20  ;;  %v4056_v50 = vcombine.low %v208_v39, %v212_v40  ;;  %v292_v31 = vld [vmem:[#allocation5 + $0x670] sm:$0xff] }
 0x105   :  { %2691 = vmatmul.mubr.bf16.vlgmr.msra.gmra.mxu1 %v4870_v32  ;;  %2700 = vmatpush1.bf16.msra.mxu0 %v3992_v44  ;;  %v4057_v44 = vcombine.high %v208_v39, %v212_v40  ;;  %v156_v39 = vld [vmem:[#allocation5 + $0x230] sm:$0xff] }
 0x106   :  { %2741 = vmatpush1.bf16.msra.mxu1 %v4120_v45  ;;  %2701 = vmatprep.subr.bf16.mxu0 %v3985_v46  ;;  %v4185_v45 = vcombine.high %v336_v41, %v340_v19  ;;  %v200_v46 = vld [vmem:[#allocation5 + $0x390] sm:$0xff] }
 0x107   :  { %2742 = vmatprep.subr.bf16.mxu1 %v4113_v47  ;;  %2731 = vmatprep.mubr.bf16.mxu0 %v4842_v58  ;;  %v204_v47 = vld [vmem:[#allocation5 + $0x3b0] sm:$0xff] }
 0x108   :  { %2772 = vmatprep.mubr.bf16.mxu1 %v4846_v59  ;;  %v4048_v62 = vcombine.low %v200_v46, %v204_v47  ;;  %v280_v40 = vld [vmem:[#allocation5 + $0x610] sm:$0xff] }
 0x109   :  { %2702 = vmatpush1.bf16.msra.mxu0 %v3984_v52  ;;  %v4049_v52 = vcombine.high %v200_v46, %v204_v47  ;;  %v284_v41 = vld [vmem:[#allocation5 + $0x630] sm:$0xff] }
 0x10a   :  { %2743 = vmatpush1.bf16.msra.mxu1 %v4112_v55  ;;  %2703 = vmatprep.subr.bf16.mxu0 %v3977_v56  ;;  %v4177_v55 = vcombine.high %v328_v48, %v332_v49  ;;  %v192_v56 = vld [vmem:[#allocation5 + $0x350] sm:$0xff]  ;;  %v145_v48 = vld [vmem:[#allocation5 + $0x1d8] sm:$0xff] }
 0x10b   :  { %2744 = vmatprep.subr.bf16.mxu1 %v4105_v57  ;;  %v196_v57 = vld [vmem:[#allocation5 + $0x370] sm:$0xff]  ;;  %v149_v49 = vld [vmem:[#allocation5 + $0x1f8] sm:$0xff] }
 0x10c   :  { %v4040_v6 = vcombine.low %v192_v56, %v196_v57  ;;  %v400_v46 = vld [vmem:[#allocation5 + $0x9d0] sm:$0xff] }
 0x10d   :  { %2704 = vmatpush1.bf16.msra.mxu0 %v3976_v0  ;;  %v4041_v0 = vcombine.high %v192_v56, %v196_v57  ;;  %v404_v47 = vld [vmem:[#allocation5 + $0x9f0] sm:$0xff]  ;;  %v3995_v57 = vcombine.high %v145_v48, %v149_v49 }
 0x10e   :  { %2745 = vmatpush1.bf16.msra.mxu1 %v4104_v1  ;;  %2705 = vmatprep.subr.bf16.mxu0 %v3969_v2  ;;  %v4169_v1 = vcombine.high %v320_v60, %v324_v61  ;;  %v184_v2 = vld [vmem:[#allocation5 + $0x310] sm:$0xff]  ;;  %v4249_v56 = vcombine.high %v400_v46, %v404_v47 }
 0x10f   :  { %2746 = vmatprep.subr.bf16.mxu1 %v4097_v3  ;;  %v188_v3 = vld [vmem:[#allocation5 + $0x330] sm:$0xff] }
 0x110   :  { %v4032_v14 = vcombine.low %v184_v2, %v188_v3  ;;  %v392_v61 = vld [vmem:[#allocation5 + $0x990] sm:$0xff] }
 0x111   :  { %2706 = vmatpush1.bf16.msra.mxu0 %v3968_v8  ;;  %v4033_v8 = vcombine.high %v184_v2, %v188_v3  ;;  %v4248_v2 = vcombine.low %v400_v46, %v404_v47  ;;  %v3994_v3 = vcombine.low %v145_v48, %v149_v49  ;;  %v364_v46 = vld [vmem:[#allocation5 + $0x8b0] sm:$0xff]  ;;  %v105_v47 = vld [vmem:[#allocation5 + $0x98] sm:$0xff] }
 0x112   :  { %2747 = vmatpush1.bf16.msra.mxu1 %v4096_v9  ;;  %2707 = vmatprep.subr.bf16.mxu0 %v3961_v10  ;;  %v4161_v9 = vcombine.high %v312_v4, %v316_v5  ;;  %v176_v10 = vld [vmem:[#allocation5 + $0x2d0] sm:$0xff]  ;;  %v109_v48 = vld [vmem:[#allocation5 + $0xb8] sm:$0xff] }
 0x113   :  { %2748 = vmatprep.subr.bf16.mxu1 %v4089_v11  ;;  %v180_v11 = vld [vmem:[#allocation5 + $0x2f0] sm:$0xff] }
 0x114   :  { %v4024_v25 = vcombine.low %v176_v10, %v180_v11 }
 0x115   :  { %2708 = vmatpush1.bf16.msra.mxu0 %v3960_v17  ;;  %v4025_v17 = vcombine.high %v176_v10, %v180_v11  ;;  %v129_v10 = vld [vmem:[#allocation5 + $0x158] sm:$0xff] }
 0x116   :  { %2749 = vmatpush1.bf16.msra.mxu1 %v4088_v18  ;;  %2709 = vmatprep.subr.bf16.mxu0 %v3953_v21  ;;  %v4153_v18 = vcombine.high %v304_v12, %v308_v13  ;;  %v168_v21 = vld [vmem:[#allocation5 + $0x290] sm:$0xff]  ;;  %v133_v11 = vld [vmem:[#allocation5 + $0x178] sm:$0xff] }
 0x117   :  { %2750 = vmatprep.subr.bf16.mxu1 %v4081_v22  ;;  %v172_v22 = vld [vmem:[#allocation5 + $0x2b0] sm:$0xff] }
 0x118   :  { %v4016_v33 = vcombine.low %v168_v21, %v172_v22 }
 0x119   :  { %2710 = vmatpush1.bf16.msra.mxu0 %v3952_v53  ;;  %v4017_v53 = vcombine.high %v168_v21, %v172_v22 }
 0x11a   :  { %2751 = vmatpush1.bf16.msra.mxu1 %v4080_v27  ;;  %2711 = vmatprep.subr.bf16.mxu0 %v3945_v54  ;;  %v4145_v27 = vcombine.high %v296_v23, %v300_v24  ;;  %v160_v54 = vld [vmem:[#allocation5 + $0x250] sm:$0xff] }
 0x11b   :  { %2752 = vmatprep.subr.bf16.mxu1 %v4073_v29  ;;  %v164_v29 = vld [vmem:[#allocation5 + $0x270] sm:$0xff] }
 0x11c   :  { %v4008_v19 = vcombine.low %v160_v54, %v164_v29 }
 0x11d   :  { %2712 = vmatpush1.bf16.msra.mxu0 %v3944_v35  ;;  %v4144_v35 = vcombine.low %v296_v23, %v300_v24  ;;  %v3979_v24 = vcombine.high %v129_v10, %v133_v11 }
 0x11e   :  { %2753 = vmatpush1.bf16.msra.mxu1 %v4072_v36  ;;  %2713 = vmatprep.subr.bf16.mxu0 %v3937_v37  ;;  %v4009_v36 = vcombine.high %v160_v54, %v164_v29  ;;  %v4137_v37 = vcombine.high %v288_v30, %v292_v31  ;;  %v125_v54 = vld [vmem:[#allocation5 + $0x138] sm:$0xff] }
 0x11f   :  { %2754 = vmatprep.subr.bf16.mxu1 %v4065_v38  ;;  %v152_v38 = vld [vmem:[#allocation5 + $0x210] sm:$0xff] }
 0x121   :  { %2714 = vmatpush1.bf16.msra.mxu0 %v3936_v42  ;;  %v4880_v42 = vshrl.u32 %v472_v34, 7  ;;  %v3978_v34 = vcombine.low %v129_v10, %v133_v11 }
 0x122   :  { %2755 = vmatpush1.bf16.msra.mxu1 %v4064_v43  ;;  %2715 = vmatprep.subr.bf16.mxu0 %v4057_v44  ;;  %v4136_v43 = vcombine.low %v288_v30, %v292_v31  ;;  %v4001_v44 = vcombine.high %v152_v38, %v156_v39 }
 0x123   :  { %2756 = vmatprep.subr.bf16.mxu1 %v4185_v45  ;;  %v4129_v45 = vcombine.high %v280_v40, %v284_v41  ;;  %v478_v60 = vsub.s32 1, %v4880_v42 }
 0x125   :  { %2716 = vmatpush2.bf16.msra.mxu0 %v4056_v50  ;;  %v4000_v50 = vcombine.low %v152_v38, %v156_v39  ;;  %v368_v38 = vld [vmem:[#allocation5 + $0x8d0] sm:$0xff] }
 0x126   :  { %2757 = vmatpush2.bf16.msra.mxu1 %v4184_v51  ;;  %2717 = vmatprep.subr.bf16.mxu0 %v4049_v52  ;;  %v474_v51 = vsub.s32 0, %v4880_v42  ;;  %v4128_v52 = vcombine.low %v280_v40, %v284_v41  ;;  %v372_v39 = vld [vmem:[#allocation5 + $0x8f0] sm:$0xff]  ;;  %v113_v40 = vld [vmem:[#allocation5 + $0xd8] sm:$0xff] }
 0x127   :  { %2758 = vmatprep.subr.bf16.mxu1 %v4177_v55  ;;  %v4883_v55 = vld [vmem:[#allocation7] sm:$0xff]  ;;  %v117_v41 = vld [vmem:[#allocation5 + $0xf8] sm:$0xff]  ;;  %v4216_v49 = vcombine.low %v368_v38, %v372_v39 }
 0x128   :  { %v479_v5 = vrot.slane %v4883_v55, %v478_v60 }
 0x129   :  { %2718 = vmatpush2.bf16.msra.mxu0 %v4048_v62  ;;  %v396_v62 = vld [vmem:[#allocation5 + $0x9b0] sm:$0xff] }
 0x12a   :  { %2759 = vmatpush2.bf16.msra.mxu1 %v4176_v63  ;;  %2719 = vmatprep.subr.bf16.mxu0 %v4041_v0  ;;  %v137_v63 = vld [vmem:[#allocation5 + $0x198] sm:$0xff]  ;;  %v4241_v4 = vcombine.high %v392_v61, %v396_v62 }
 0x12b   :  { %2760 = vmatprep.subr.bf16.mxu1 %v4169_v1  ;;  %v141_v0 = vld [vmem:[#allocation5 + $0x1b8] sm:$0xff]  ;;  %v475_v1 = vrot.slane %v4883_v55, %v474_v51 }
 0x12d   :  { %2720 = vmatpush2.bf16.msra.mxu0 %v4040_v6  ;;  %v3987_v6 = vcombine.high %v137_v63, %v141_v0 }
 0x12e   :  { %2761 = vmatpush2.bf16.msra.mxu1 %v4168_v7  ;;  %2721 = vmatprep.subr.bf16.mxu0 %v4033_v8  ;;  %v384_v7 = vld [vmem:[#allocation5 + $0x950] sm:$0xff] }
 0x12f   :  { %2762 = vmatprep.subr.bf16.mxu1 %v4161_v9  ;;  %v388_v8 = vld [vmem:[#allocation5 + $0x970] sm:$0xff] }
 0x130   :  { %v4232_v31 = vcombine.low %v384_v7, %v388_v8 }
 0x131   :  { %2722 = vmatpush2.bf16.msra.mxu0 %v4032_v14  ;;  %v4240_v14 = vcombine.low %v392_v61, %v396_v62  ;;  %v356_v61 = vld [vmem:[#allocation5 + $0x870] sm:$0xff]  ;;  %v97_v62 = vld [vmem:[#allocation5 + $0x58] sm:$0xff] }
 0x132   :  { %2763 = vmatpush2.bf16.msra.mxu1 %v4160_v15  ;;  %2723 = vmatprep.subr.bf16.mxu0 %v4025_v17  ;;  %v3986_v17 = vcombine.low %v137_v63, %v141_v0  ;;  %v101_v63 = vld [vmem:[#allocation5 + $0x78] sm:$0xff] }
 0x133   :  { %2764 = vmatprep.subr.bf16.mxu1 %v4153_v18  ;;  %v4233_v18 = vcombine.high %v384_v7, %v388_v8  ;;  %v93_v7 = vld [vmem:[#allocation5 + $0x38] sm:$0xff] }
 0x135   :  { %2724 = vmatpush2.bf16.msra.mxu0 %v4024_v25  ;;  %v376_v25 = vld [vmem:[#allocation5 + $0x910] sm:$0xff] }
 0x136   :  { %2765 = vmatpush2.bf16.msra.mxu1 %v4152_v26  ;;  %2725 = vmatprep.subr.bf16.mxu0 %v4017_v53  ;;  %v380_v26 = vld [vmem:[#allocation5 + $0x930] sm:$0xff] }
 0x137   :  { %2766 = vmatprep.subr.bf16.mxu1 %v4145_v27  ;;  %v121_v27 = vld [vmem:[#allocation5 + $0x118] sm:$0xff] }
 0x139   :  { %2726 = vmatpush2.bf16.msra.mxu0 %v4016_v33 }
 0x13a   :  { %2767 = vmatpush2.bf16.msra.mxu1 %v4144_v35  ;;  %2727 = vmatprep.subr.bf16.mxu0 %v4009_v36  ;;  %v4225_v35 = vcombine.high %v376_v25, %v380_v26 }
 0x13b   :  { %2768 = vmatprep.subr.bf16.mxu1 %v4137_v37  ;;  %v3971_v37 = vcombine.high %v121_v27, %v125_v54 }
 0x13d   :  { %2728 = vmatpush2.bf16.msra.mxu0 %v4008_v19  ;;  %v4224_v19 = vcombine.low %v376_v25, %v380_v26  ;;  %v460_v25 = vld [vmem:[#allocation5 + $0xbb0] sm:$0xff]  ;;  %v201_v26 = vld [vmem:[#allocation5 + $0x398] sm:$0xff] }
 0x13e   :  { %2769 = vmatpush2.bf16.msra.mxu1 %v4136_v43  ;;  %2729 = vmatprep.subr.bf16.mxu0 %v4001_v44  ;;  %v4217_v43 = vcombine.high %v368_v38, %v372_v39  ;;  %v3963_v44 = vcombine.high %v113_v40, %v117_v41 }
 0x13f   :  { %2770 = vmatprep.subr.bf16.mxu1 %v4129_v45  ;;  %v360_v45 = vld [vmem:[#allocation5 + $0x890] sm:$0xff] }
 0x140   :  { %v4208_v0 = vcombine.low %v360_v45, %v364_v46 }
 0x141   :  { %2730 = vmatpush2.bf16.msra.mxu0 %v4000_v50  ;;  %v3962_v50 = vcombine.low %v113_v40, %v117_v41  ;;  %v440_v41 = vld [vmem:[#allocation5 + $0xb10] sm:$0xff] }
 0x142   :  { %2771 = vmatpush2.bf16.msra.mxu1 %v4128_v52  ;;  %2781 = vmatprep.subr.bf16.mxu0 %v4249_v56  ;;  %v4209_v52 = vcombine.high %v360_v45, %v364_v46  ;;  %v3955_v56 = vcombine.high %v105_v47, %v109_v48 }
 0x143   :  { %2822 = vmatprep.subr.bf16.mxu1 %v3995_v57  ;;  %v352_v57 = vld [vmem:[#allocation5 + $0x850] sm:$0xff] }
 0x144   :  { %v2487_v9 = vpop.f32.mrf.mxu0  ;;  %2732 = vmatmul.mubr.bf16.vlgmr.msra.gmra.mxu0 %v4852_v16  ;;  %v4200_v8 = vcombine.low %v352_v57, %v356_v61 }
 0x145   :  { %v2488_v12 = vadd.f32 %v2487_v9, %v475_v1  ;;  %v2528_v13 = vpop.f32.mrf.mxu1  ;;  %2773 = vmatmul.mubr.bf16.vlgmr.msra.gmra.mxu1 %v4858_v20  ;;  %2782 = vmatpush1.bf16.msra.mxu0 %v4248_v2  ;;  %v3954_v1 = vcombine.low %v105_v47, %v109_v48  ;;  %v4201_v2 = vcombine.high %v352_v57, %v356_v61  ;;  %v432_v48 = vld [vmem:[#allocation5 + $0xad0] sm:$0xff] }
 0x146   :  { %2823 = vmatpush1.bf16.msra.mxu1 %v3994_v3  ;;  %v2489_v15 = vpop.f32.mrf.mxu0  ;;  %2783 = vmatprep.subr.bf16.mxu0 %v4241_v4  ;;  %v3947_v3 = vcombine.high %v97_v62, %v101_v63  ;;  %v344_v4 = vld [vmem:[#allocation5 + $0x810] sm:$0xff]  ;;  %v3946_v9 = vcombine.low %v97_v62, %v101_v63 }
 0x147   :  { %v4894_v21 = vadd.f32 %v2528_v13, %v2488_v12  ;;  %v2490_v22 = vadd.f32 %v2489_v15, %v479_v5  ;;  %v2530_v23 = vpop.f32.mrf.mxu1  ;;  %2824 = vmatprep.subr.bf16.mxu1 %v3987_v6  ;;  %2813 = vmatprep.mubr.bf16.mxu0 %v4862_v28  ;;  %v348_v5 = vld [vmem:[#allocation5 + $0x830] sm:$0xff]  ;;  %v89_v6 = vld [vmem:[#allocation5 + $0x18] sm:$0xff] }
 0x148   :  { %v2491_v53 = vpop.f32.mrf.mxu0  ;;  %2854 = vmatprep.mubr.bf16.mxu1 %v4842_v58  ;;  %v3970_v58 = vcombine.low %v121_v27, %v125_v54  ;;  %v4193_v10 = vcombine.high %v344_v4, %v348_v5  ;;  %v3939_v11 = vcombine.high %v89_v6, %v93_v7  ;;  %v464_v12 = vld [vmem:[#allocation5 + $0xbd0] sm:$0xff]  ;;  %v213_v15 = vld [vmem:[#allocation5 + $0x3f8] sm:$0xff] }
 0x149   :  { %v4898_v29 = vadd.f32 %v2530_v23, %v2490_v22  ;;  %v2532_v30 = vpop.f32.mrf.mxu1  ;;  %2784 = vmatpush1.bf16.msra.mxu0 %v4240_v14  ;;  %v468_v13 = vld [vmem:[#allocation5 + $0xbf0] sm:$0xff]  ;;  %v209_v14 = vld [vmem:[#allocation5 + $0x3d8] sm:$0xff] }
 0x14a   :  { %2825 = vmatpush1.bf16.msra.mxu1 %v3986_v17  ;;  %v2492_v33 = vpop.f32.mrf.mxu0  ;;  %2785 = vmatprep.subr.bf16.mxu0 %v4233_v18  ;;  %v4192_v17 = vcombine.low %v344_v4, %v348_v5  ;;  %v3938_v18 = vcombine.low %v89_v6, %v93_v7  ;;  %v4313_v22 = vcombine.high %v464_v12, %v468_v13  ;;  %v205_v53 = vld [vmem:[#allocation5 + $0x3b8] sm:$0xff]  ;;  %v424_v63 = vld [vmem:[#allocation5 + $0xa90] sm:$0xff] }
 0x14b   :  { %v2533_v36 = vpop.f32.mrf.mxu1  ;;  %2826 = vmatprep.subr.bf16.mxu1 %v3979_v24  ;;  %v4059_v23 = vcombine.high %v209_v14, %v213_v15  ;;  %v456_v24 = vld [vmem:[#allocation5 + $0xb90] sm:$0xff]  ;;  %v4312_v27 = vcombine.low %v464_v12, %v468_v13  ;;  %v4058_v54 = vcombine.low %v209_v14, %v213_v15  ;;  %v4050_v38 = vcombine.low %v201_v26, %v205_v53 }
 0x14c   :  { %v4305_v30 = vcombine.high %v456_v24, %v460_v25  ;;  %v448_v33 = vld [vmem:[#allocation5 + $0xb50] sm:$0xff]  ;;  %v197_v36 = vld [vmem:[#allocation5 + $0x378] sm:$0xff] }
 0x14d   :  { %2786 = vmatpush1.bf16.msra.mxu0 %v4232_v31  ;;  %v4051_v31 = vcombine.high %v201_v26, %v205_v53  ;;  %v416_v7 = vld [vmem:[#allocation5 + $0xa50] sm:$0xff]  ;;  %v273_v53 = vld [vmem:[#allocation5 + $0x5d8] sm:$0xff] }
 0x14e   :  { %2827 = vmatpush1.bf16.msra.mxu1 %v3978_v34  ;;  %2787 = vmatprep.subr.bf16.mxu0 %v4225_v35  ;;  %v452_v34 = vld [vmem:[#allocation5 + $0xb70] sm:$0xff]  ;;  %v193_v35 = vld [vmem:[#allocation5 + $0x358] sm:$0xff] }
 0x14f   :  { %2828 = vmatprep.subr.bf16.mxu1 %v3971_v37  ;;  %v4304_v37 = vcombine.low %v456_v24, %v460_v25  ;;  %v4297_v39 = vcombine.high %v448_v33, %v452_v34  ;;  %v4043_v40 = vcombine.high %v193_v35, %v197_v36  ;;  %v4042_v45 = vcombine.low %v193_v35, %v197_v36  ;;  %v408_v15 = vld [vmem:[#allocation5 + $0xa10] sm:$0xff]  ;;  %v265_v36 = vld [vmem:[#allocation5 + $0x598] sm:$0xff] }
 0x151   :  { %2788 = vmatpush1.bf16.msra.mxu0 %v4224_v19  ;;  %v444_v19 = vld [vmem:[#allocation5 + $0xb30] sm:$0xff] }
 0x152   :  { %2829 = vmatpush1.bf16.msra.mxu1 %v3970_v58  ;;  %2789 = vmatprep.subr.bf16.mxu0 %v4217_v43  ;;  %v185_v58 = vld [vmem:[#allocation5 + $0x318] sm:$0xff]  ;;  %v4289_v46 = vcombine.high %v440_v41, %v444_v19 }
 0x153   :  { %2830 = vmatprep.subr.bf16.mxu1 %v3963_v44  ;;  %v189_v43 = vld [vmem:[#allocation5 + $0x338] sm:$0xff]  ;;  %v4296_v44 = vcombine.low %v448_v33, %v452_v34 }
 0x154   :  { %v4035_v47 = vcombine.high %v185_v58, %v189_v43  ;;  %v4034_v57 = vcombine.low %v185_v58, %v189_v43  ;;  %v257_v43 = vld [vmem:[#allocation5 + $0x558] sm:$0xff] }
 0x155   :  { %2790 = vmatpush1.bf16.msra.mxu0 %v4216_v49  ;;  %v436_v49 = vld [vmem:[#allocation5 + $0xaf0] sm:$0xff] }
 0x156   :  { %2831 = vmatpush1.bf16.msra.mxu1 %v3962_v50  ;;  %2791 = vmatprep.subr.bf16.mxu0 %v4209_v52  ;;  %v177_v50 = vld [vmem:[#allocation5 + $0x2d8] sm:$0xff]  ;;  %v4281_v61 = vcombine.high %v432_v48, %v436_v49 }
 0x157   :  { %2832 = vmatprep.subr.bf16.mxu1 %v3955_v56  ;;  %v181_v52 = vld [vmem:[#allocation5 + $0x2f8] sm:$0xff]  ;;  %v4288_v56 = vcombine.low %v440_v41, %v444_v19 }
 0x158   :  { %v4027_v62 = vcombine.high %v177_v50, %v181_v52  ;;  %v4026_v4 = vcombine.low %v177_v50, %v181_v52 }
 0x159   :  { %2792 = vmatpush1.bf16.msra.mxu0 %v4208_v0  ;;  %v428_v0 = vld [vmem:[#allocation5 + $0xab0] sm:$0xff] }
 0x15a   :  { %2833 = vmatpush1.bf16.msra.mxu1 %v3954_v1  ;;  %2793 = vmatprep.subr.bf16.mxu0 %v4201_v2  ;;  %v169_v1 = vld [vmem:[#allocation5 + $0x298] sm:$0xff]  ;;  %v4273_v5 = vcombine.high %v424_v63, %v428_v0 }
 0x15b   :  { %2834 = vmatprep.subr.bf16.mxu1 %v3947_v3  ;;  %v173_v2 = vld [vmem:[#allocation5 + $0x2b8] sm:$0xff]  ;;  %v4280_v3 = vcombine.low %v432_v48, %v436_v49 }
 0x15c   :  { %v4019_v6 = vcombine.high %v169_v1, %v173_v2  ;;  %v4018_v12 = vcombine.low %v169_v1, %v173_v2  ;;  %v377_v1 = vld [vmem:[#allocation5 + $0x918] sm:$0xff] }
 0x15d   :  { %2794 = vmatpush1.bf16.msra.mxu0 %v4200_v8  ;;  %v420_v8 = vld [vmem:[#allocation5 + $0xa70] sm:$0xff]  ;;  %v381_v2 = vld [vmem:[#allocation5 + $0x938] sm:$0xff] }
 0x15e   :  { %2835 = vmatpush1.bf16.msra.mxu1 %v3946_v9  ;;  %2795 = vmatprep.subr.bf16.mxu0 %v4193_v10  ;;  %v161_v9 = vld [vmem:[#allocation5 + $0x258] sm:$0xff]  ;;  %v4265_v13 = vcombine.high %v416_v7, %v420_v8 }
 0x15f   :  { %2836 = vmatprep.subr.bf16.mxu1 %v3939_v11  ;;  %v165_v10 = vld [vmem:[#allocation5 + $0x278] sm:$0xff]  ;;  %v4272_v11 = vcombine.low %v424_v63, %v428_v0 }
 0x160   :  { %v4011_v14 = vcombine.high %v161_v9, %v165_v10  ;;  %v4010_v24 = vcombine.low %v161_v9, %v165_v10  ;;  %v249_v63 = vld [vmem:[#allocation5 + $0x518] sm:$0xff] }
 0x161   :  { %2796 = vmatpush1.bf16.msra.mxu0 %v4192_v17  ;;  %v412_v17 = vld [vmem:[#allocation5 + $0xa30] sm:$0xff]  ;;  %v253_v0 = vld [vmem:[#allocation5 + $0x538] sm:$0xff] }
 0x162   :  { %2837 = vmatpush1.bf16.msra.mxu1 %v3938_v18  ;;  %2797 = vmatprep.subr.bf16.mxu0 %v4313_v22  ;;  %v153_v18 = vld [vmem:[#allocation5 + $0x218] sm:$0xff]  ;;  %v4257_v25 = vcombine.high %v408_v15, %v412_v17 }
 0x163   :  { %2838 = vmatprep.subr.bf16.mxu1 %v4059_v23  ;;  %v157_v22 = vld [vmem:[#allocation5 + $0x238] sm:$0xff]  ;;  %v4264_v23 = vcombine.low %v416_v7, %v420_v8  ;;  %v4227_v8 = vcombine.high %v377_v1, %v381_v2 }
 0x164   :  { %v4003_v26 = vcombine.high %v153_v18, %v157_v22  ;;  %v4002_v33 = vcombine.low %v153_v18, %v157_v22  ;;  %v241_v9 = vld [vmem:[#allocation5 + $0x4d8] sm:$0xff] }
 0x165   :  { %2798 = vmatpush2.bf16.msra.mxu0 %v4312_v27  ;;  %v277_v27 = vld [vmem:[#allocation5 + $0x5f8] sm:$0xff] }
 0x166   :  { %2839 = vmatpush2.bf16.msra.mxu1 %v4058_v54  ;;  %2799 = vmatprep.subr.bf16.mxu0 %v4305_v30  ;;  %v401_v54 = vld [vmem:[#allocation5 + $0x9d8] sm:$0xff]  ;;  %v4123_v34 = vcombine.high %v273_v53, %v277_v27 }
 0x167   :  { %2840 = vmatprep.subr.bf16.mxu1 %v4051_v31  ;;  %v405_v30 = vld [vmem:[#allocation5 + $0x9f8] sm:$0xff]  ;;  %v4256_v31 = vcombine.low %v408_v15, %v412_v17 }
 0x168   :  { %v4251_v35 = vcombine.high %v401_v54, %v405_v30  ;;  %v4250_v41 = vcombine.low %v401_v54, %v405_v30  ;;  %v245_v10 = vld [vmem:[#allocation5 + $0x4f8] sm:$0xff] }
 0x169   :  { %2800 = vmatpush2.bf16.msra.mxu0 %v4304_v37  ;;  %v269_v37 = vld [vmem:[#allocation5 + $0x5b8] sm:$0xff] }
 0x16a   :  { %2841 = vmatpush2.bf16.msra.mxu1 %v4050_v38  ;;  %2801 = vmatprep.subr.bf16.mxu0 %v4297_v39  ;;  %v393_v38 = vld [vmem:[#allocation5 + $0x998] sm:$0xff]  ;;  %v4115_v19 = vcombine.high %v265_v36, %v269_v37  ;;  %v4114_v50 = vcombine.low %v265_v36, %v269_v37 }
 0x16b   :  { %2842 = vmatprep.subr.bf16.mxu1 %v4043_v40  ;;  %v397_v39 = vld [vmem:[#allocation5 + $0x9b8] sm:$0xff]  ;;  %v4122_v40 = vcombine.low %v273_v53, %v277_v27 }
 0x16c   :  { %v4243_v58 = vcombine.high %v393_v38, %v397_v39  ;;  %v233_v15 = vld [vmem:[#allocation5 + $0x498] sm:$0xff] }
 0x16d   :  { %2802 = vmatpush2.bf16.msra.mxu0 %v4296_v44  ;;  %v261_v44 = vld [vmem:[#allocation5 + $0x578] sm:$0xff] }
 0x16e   :  { %2843 = vmatpush2.bf16.msra.mxu1 %v4042_v45  ;;  %2803 = vmatprep.subr.bf16.mxu0 %v4289_v46  ;;  %v385_v46 = vld [vmem:[#allocation5 + $0x958] sm:$0xff] }
 0x16f   :  { %2844 = vmatprep.subr.bf16.mxu1 %v4035_v47  ;;  %v389_v47 = vld [vmem:[#allocation5 + $0x978] sm:$0xff] }
 0x170   :  { %v237_v17 = vld [vmem:[#allocation5 + $0x4b8] sm:$0xff] }
 0x171   :  { %2804 = vmatpush2.bf16.msra.mxu0 %v4288_v56  ;;  %v4242_v56 = vcombine.low %v393_v38, %v397_v39  ;;  %v361_v18 = vld [vmem:[#allocation5 + $0x898] sm:$0xff] }
 0x172   :  { %2845 = vmatpush2.bf16.msra.mxu1 %v4034_v57  ;;  %2805 = vmatprep.subr.bf16.mxu0 %v4281_v61  ;;  %v4107_v57 = vcombine.high %v257_v43, %v261_v44  ;;  %v365_v22 = vld [vmem:[#allocation5 + $0x8b8] sm:$0xff] }
 0x173   :  { %2846 = vmatprep.subr.bf16.mxu1 %v4027_v62  ;;  %v4235_v62 = vcombine.high %v385_v46, %v389_v47  ;;  %v225_v53 = vld [vmem:[#allocation5 + $0x458] sm:$0xff] }
 0x174   :  { %v229_v27 = vld [vmem:[#allocation5 + $0x478] sm:$0xff] }
 0x175   :  { %2806 = vmatpush2.bf16.msra.mxu0 %v4280_v3  ;;  %v4106_v3 = vcombine.low %v257_v43, %v261_v44  ;;  %v353_v54 = vld [vmem:[#allocation5 + $0x858] sm:$0xff] }
 0x176   :  { %2847 = vmatpush2.bf16.msra.mxu1 %v4026_v4  ;;  %2807 = vmatprep.subr.bf16.mxu0 %v4273_v5  ;;  %v4234_v5 = vcombine.low %v385_v46, %v389_v47  ;;  %v357_v30 = vld [vmem:[#allocation5 + $0x878] sm:$0xff] }
 0x177   :  { %2848 = vmatprep.subr.bf16.mxu1 %v4019_v6  ;;  %v4099_v6 = vcombine.high %v249_v63, %v253_v0  ;;  %v217_v36 = vld [vmem:[#allocation5 + $0x418] sm:$0xff] }
 0x178   :  { %v221_v37 = vld [vmem:[#allocation5 + $0x438] sm:$0xff] }
 0x179   :  { %2808 = vmatpush2.bf16.msra.mxu0 %v4272_v11  ;;  %v369_v11 = vld [vmem:[#allocation5 + $0x8d8] sm:$0xff]  ;;  %v4066_v47 = vcombine.low %v217_v36, %v221_v37 }
 0x17a   :  { %2849 = vmatpush2.bf16.msra.mxu1 %v4018_v12  ;;  %2809 = vmatprep.subr.bf16.mxu0 %v4265_v13  ;;  %v4098_v12 = vcombine.low %v249_v63, %v253_v0  ;;  %v4091_v13 = vcombine.high %v241_v9, %v245_v10  ;;  %v345_v38 = vld [vmem:[#allocation5 + $0x818] sm:$0xff] }
 0x17b   :  { %2850 = vmatprep.subr.bf16.mxu1 %v4011_v14  ;;  %v349_v39 = vld [vmem:[#allocation5 + $0x838] sm:$0xff] }
 0x17c   :  { %v337_v43 = vld [vmem:[#allocation5 + $0x7d8] sm:$0xff] }
 0x17d   :  { %2810 = vmatpush2.bf16.msra.mxu0 %v4264_v23  ;;  %v4090_v23 = vcombine.low %v241_v9, %v245_v10  ;;  %v341_v44 = vld [vmem:[#allocation5 + $0x7f8] sm:$0xff] }
 0x17e   :  { %2851 = vmatpush2.bf16.msra.mxu1 %v4010_v24  ;;  %2811 = vmatprep.subr.bf16.mxu0 %v4257_v25  ;;  %v4083_v25 = vcombine.high %v233_v15, %v237_v17  ;;  %v469_v46 = vld [vmem:[#allocation5 + $0xbf8] sm:$0xff] }
 0x17f   :  { %2852 = vmatprep.subr.bf16.mxu1 %v4003_v26  ;;  %v4211_v26 = vcombine.high %v361_v18, %v365_v22  ;;  %v333_v63 = vld [vmem:[#allocation5 + $0x7b8] sm:$0xff] }
 0x180   :  { %v457_v0 = vld [vmem:[#allocation5 + $0xb98] sm:$0xff] }
 0x181   :  { %2812 = vmatpush2.bf16.msra.mxu0 %v4256_v31  ;;  %v4082_v31 = vcombine.low %v233_v15, %v237_v17 }
 0x182   :  { %2853 = vmatpush2.bf16.msra.mxu1 %v4002_v33  ;;  %2863 = vmatprep.subr.bf16.mxu0 %v4123_v34  ;;  %v4210_v33 = vcombine.low %v361_v18, %v365_v22  ;;  %v4075_v34 = vcombine.high %v225_v53, %v229_v27  ;;  %v305_v22 = vld [vmem:[#allocation5 + $0x6d8] sm:$0xff] }
 0x183   :  { %2904 = vmatprep.subr.bf16.mxu1 %v4251_v35  ;;  %v4203_v35 = vcombine.high %v353_v54, %v357_v30 }
 0x184   :  { %v2569_v45 = vpop.f32.mrf.mxu0  ;;  %2814 = vmatmul.mubr.bf16.vlgmr.msra.gmra.mxu0 %v4870_v32 }
 0x185   :  { %v4902_v48 = vadd.f32 %v2569_v45, %v4894_v21  ;;  %v4904_v49 = vpop.f32.mrf.mxu1  ;;  %2855 = vmatmul.mubr.bf16.vlgmr.msra.gmra.mxu1 %v4852_v16  ;;  %2864 = vmatpush1.bf16.msra.mxu0 %v4122_v40  ;;  %v4074_v40 = vcombine.low %v225_v53, %v229_v27  ;;  %v465_v45 = vld [vmem:[#allocation5 + $0xbd8] sm:$0xff] }
 0x186   :  { %2905 = vmatpush1.bf16.msra.mxu1 %v4250_v41  ;;  %v4907_v52 = vpop.f32.mrf.mxu0  ;;  %2865 = vmatprep.subr.bf16.mxu0 %v4115_v19  ;;  %v4202_v41 = vcombine.low %v353_v54, %v357_v30  ;;  %v4067_v19 = vcombine.high %v217_v36, %v221_v37  ;;  %v297_v30 = vld [vmem:[#allocation5 + $0x698] sm:$0xff] }
 0x187   :  { %v4909_v61 = vpop.f32.mrf.mxu1  ;;  %2906 = vmatprep.subr.bf16.mxu1 %v4243_v58  ;;  %2895 = vmatprep.mubr.bf16.mxu0 %v4846_v59  ;;  %v373_v59 = vld [vmem:[#allocation5 + $0x8f8] sm:$0xff]  ;;  %v4195_v58 = vcombine.high %v345_v38, %v349_v39 }
 0x188   :  { %v2573_v21 = vpop.f32.mrf.mxu0  ;;  %2936 = vmatprep.mubr.bf16.mxu1 %v4862_v28  ;;  %v4226_v28 = vcombine.low %v377_v1, %v381_v2  ;;  %v4219_v14 = vcombine.high %v369_v11, %v373_v59  ;;  %v4218_v24 = vcombine.low %v369_v11, %v373_v59  ;;  %v4186_v1 = vcombine.low %v337_v43, %v341_v44  ;;  %v313_v59 = vld [vmem:[#allocation5 + $0x718] sm:$0xff] }
 0x189   :  { %v2614_v16 = vpop.f32.mrf.mxu1  ;;  %2866 = vmatpush1.bf16.msra.mxu0 %v4114_v50  ;;  %v4194_v50 = vcombine.low %v345_v38, %v349_v39  ;;  %v461_v21 = vld [vmem:[#allocation5 + $0xbb8] sm:$0xff]  ;;  %v4314_v2 = vcombine.low %v465_v45, %v469_v46 }
 0x18a   :  { %2907 = vmatpush1.bf16.msra.mxu1 %v4242_v56  ;;  %v2574_v4 = vpop.f32.mrf.mxu0  ;;  %2867 = vmatprep.subr.bf16.mxu0 %v4107_v57  ;;  %v4187_v56 = vcombine.high %v337_v43, %v341_v44  ;;  %v4315_v57 = vcombine.high %v465_v45, %v469_v46  ;;  %v4306_v9 = vcombine.low %v457_v0, %v461_v21  ;;  %v289_v39 = vld [vmem:[#allocation5 + $0x658] sm:$0xff] }
 0x18b   :  { %v2615_v7 = vpop.f32.mrf.mxu1  ;;  %2908 = vmatprep.subr.bf16.mxu1 %v4235_v62  ;;  %v329_v62 = vld [vmem:[#allocation5 + $0x798] sm:$0xff] }
 0x18c   :  { %v4179_v16 = vcombine.high %v329_v62, %v333_v63  ;;  %v321_v4 = vld [vmem:[#allocation5 + $0x758] sm:$0xff] }
 0x18d   :  { %2868 = vmatpush1.bf16.msra.mxu0 %v4106_v3  ;;  %v4307_v3 = vcombine.high %v457_v0, %v461_v21  ;;  %v453_v7 = vld [vmem:[#allocation5 + $0xb78] sm:$0xff]  ;;  %v2572_v21 = vadd.f32 %v4907_v52, %v4898_v29  ;;  %v4468_v29 = vld [vmem:[#allocation8 + $0x64] ss:$8 sps:$4 sm:$0xff]  }
 0x18e   :  { %2909 = vmatpush1.bf16.msra.mxu1 %v4234_v5  ;;  %2869 = vmatprep.subr.bf16.mxu0 %v4099_v6  ;;  %v325_v5 = vld [vmem:[#allocation5 + $0x778] sm:$0xff]  ;;  %v4471_v52 = vld [vmem:[#allocation8 + $0x164] ss:$8 sps:$4 sm:$0xff]  }
 0x18f   :  { %2910 = vmatprep.subr.bf16.mxu1 %v4227_v8  ;;  %v449_v6 = vld [vmem:[#allocation5 + $0xb58] sm:$0xff]  ;;  %v4178_v8 = vcombine.low %v329_v62, %v333_v63  ;;  %v4171_v10 = vcombine.high %v321_v4, %v325_v5 }
 0x190   :  { %v4299_v11 = vcombine.high %v449_v6, %v453_v7  ;;  %v4298_v15 = vcombine.low %v449_v6, %v453_v7  ;;  %v281_v46 = vld [vmem:[#allocation5 + $0x618] sm:$0xff] }
 0x191   :  { %2870 = vmatpush1.bf16.msra.mxu0 %v4098_v12  ;;  %v317_v12 = vld [vmem:[#allocation5 + $0x738] sm:$0xff] }
 0x192   :  { %2911 = vmatpush1.bf16.msra.mxu1 %v4226_v28  ;;  %2871 = vmatprep.subr.bf16.mxu0 %v4091_v13  ;;  %v441_v28 = vld [vmem:[#allocation5 + $0xb18] sm:$0xff]  ;;  %v4163_v17 = vcombine.high %v313_v59, %v317_v12 }
 0x193   :  { %2912 = vmatprep.subr.bf16.mxu1 %v4219_v14  ;;  %v445_v13 = vld [vmem:[#allocation5 + $0xb38] sm:$0xff]  ;;  %v4170_v14 = vcombine.low %v321_v4, %v325_v5  ;;  %v2946_v5 = vmax.f32 %v2572_v21, 0.0  ;;  %v4517_v21 = vld [vmem:[#allocation8 + $0x1e0] ss:$8 sps:$4 sm:$0xff]  }
 0x194   :  { %v4291_v18 = vcombine.high %v441_v28, %v445_v13  ;;  %v4290_v53 = vcombine.low %v441_v28, %v445_v13  ;;  %v4465_v4 = vld [vmem:[#allocation8 + $0x174] ss:$8 sps:$4 sm:$0xff]   ;;  %v4460_v7 = vld [vmem:[#allocation8 + $0x70] ss:$8 sps:$4 sm:$0xff]   ;;  %v4469_v28 = vld [vmem:[#allocation8 + $0x160] ss:$8 sps:$4 sm:$0xff]  }
 0x195   :  { %2872 = vmatpush1.bf16.msra.mxu0 %v4090_v23  ;;  %v309_v23 = vld [vmem:[#allocation5 + $0x6f8] sm:$0xff] }
 0x196   :  { %2913 = vmatpush1.bf16.msra.mxu1 %v4218_v24  ;;  %2873 = vmatprep.subr.bf16.mxu0 %v4083_v25  ;;  %v433_v24 = vld [vmem:[#allocation5 + $0xad8] sm:$0xff]  ;;  %v4155_v27 = vcombine.high %v305_v22, %v309_v23 }
 0x197   :  { %2914 = vmatprep.subr.bf16.mxu1 %v4211_v26  ;;  %v437_v25 = vld [vmem:[#allocation5 + $0xaf8] sm:$0xff]  ;;  %v4162_v26 = vcombine.low %v313_v59, %v317_v12 }
 0x198   :  { %v4283_v54 = vcombine.high %v433_v24, %v437_v25  ;;  %v4282_v36 = vcombine.low %v433_v24, %v437_v25  ;;  %v4474_v13 = vld [vmem:[#allocation8 + $0x54] ss:$8 sps:$4 sm:$0xff]   ;;  %v4480_v24 = vld [vmem:[#allocation8 + $0x44] ss:$8 sps:$4 sm:$0xff]  }
 0x199   :  { %2874 = vmatpush1.bf16.msra.mxu0 %v4082_v31  ;;  %v301_v31 = vld [vmem:[#allocation5 + $0x6b8] sm:$0xff] }
 0x19a   :  { %2915 = vmatpush1.bf16.msra.mxu1 %v4210_v33  ;;  %2875 = vmatprep.subr.bf16.mxu0 %v4075_v34  ;;  %v425_v33 = vld [vmem:[#allocation5 + $0xa98] sm:$0xff]  ;;  %v4147_v37 = vcombine.high %v297_v30, %v301_v31 }
 0x19b   :  { %2916 = vmatprep.subr.bf16.mxu1 %v4203_v35  ;;  %v429_v34 = vld [vmem:[#allocation5 + $0xab8] sm:$0xff]  ;;  %v4154_v35 = vcombine.low %v305_v22, %v309_v23 }
 0x19c   :  { %v4275_v38 = vcombine.high %v425_v33, %v429_v34  ;;  %v4274_v43 = vcombine.low %v425_v33, %v429_v34  ;;  %v4489_v33 = vld [vmem:[#allocation8 + $0x134] ss:$8 sps:$4 sm:$0xff]   ;;  %v4484_v34 = vld [vmem:[#allocation8 + $0x30] ss:$8 sps:$4 sm:$0xff]  }
 0x19d   :  { %2876 = vmatpush1.bf16.msra.mxu0 %v4074_v40  ;;  %v293_v40 = vld [vmem:[#allocation5 + $0x678] sm:$0xff] }
 0x19e   :  { %2917 = vmatpush1.bf16.msra.mxu1 %v4202_v41  ;;  %2877 = vmatprep.subr.bf16.mxu0 %v4067_v19  ;;  %v417_v41 = vld [vmem:[#allocation5 + $0xa58] sm:$0xff]  ;;  %v4139_v44 = vcombine.high %v289_v39, %v293_v40 }
 0x19f   :  { %2918 = vmatprep.subr.bf16.mxu1 %v4195_v58  ;;  %v421_v19 = vld [vmem:[#allocation5 + $0xa78] sm:$0xff]  ;;  %v4146_v58 = vcombine.low %v297_v30, %v301_v31  ;;  %v4481_v30 = vld [vmem:[#allocation8 + $0x140] ss:$8 sps:$4 sm:$0xff]  }
 0x1a0   :  { %v4267_v45 = vcombine.high %v417_v41, %v421_v19  ;;  %v4266_v62 = vcombine.low %v417_v41, %v421_v19  ;;  %v4486_v31 = vld [vmem:[#allocation8 + $0x34] ss:$8 sps:$4 sm:$0xff]   ;;  %v4496_v19 = vld [vmem:[#allocation8 + $0x10] ss:$8 sps:$4 sm:$0xff]  }
 0x1a1   :  { %2878 = vmatpush1.bf16.msra.mxu0 %v4066_v47  ;;  %v285_v47 = vld [vmem:[#allocation5 + $0x638] sm:$0xff] }
 0x1a2   :  { %2919 = vmatpush1.bf16.msra.mxu1 %v4194_v50  ;;  %2879 = vmatprep.subr.bf16.mxu0 %v4187_v56  ;;  %v409_v50 = vld [vmem:[#allocation5 + $0xa18] sm:$0xff]  ;;  %v4131_v63 = vcombine.high %v281_v46, %v285_v47 }
 0x1a3   :  { %2920 = vmatprep.subr.bf16.mxu1 %v4315_v57  ;;  %v413_v56 = vld [vmem:[#allocation5 + $0xa38] sm:$0xff]  ;;  %v4138_v57 = vcombine.low %v289_v39, %v293_v40  ;;  %v4493_v39 = vld [vmem:[#allocation8 + $0x120] ss:$8 sps:$4 sm:$0xff]  }
 0x1a4   :  { %v4259_v0 = vcombine.high %v409_v50, %v413_v56  ;;  %v4498_v40 = vld [vmem:[#allocation8 + $0x14] ss:$8 sps:$4 sm:$0xff]  }
 0x1a5   :  { %2880 = vmatpush2.bf16.msra.mxu0 %v4186_v1  ;;  %v486_v1 = vsub.s32 3, %v4880_v42  ;;  %v4501_v41 = vld [vmem:[#allocation8 + $0x114] ss:$8 sps:$4 sm:$0xff]  }
 0x1a6   :  { %2921 = vmatpush2.bf16.msra.mxu1 %v4314_v2  ;;  %2881 = vmatprep.subr.bf16.mxu0 %v4179_v16  ;;  %v4130_v2 = vcombine.low %v281_v46, %v285_v47  ;;  %v4258_v16 = vcombine.low %v409_v50, %v413_v56  ;;  %v4505_v46 = vld [vmem:[#allocation8 + $0x100] ss:$8 sps:$4 sm:$0xff]   ;;  %v4510_v47 = vld [vmem:[#allocation8 + $0xf4] ss:$8 sps:$4 sm:$0xff]   ;;  %v4508_v56 = vld [vmem:[#allocation8 + $0xf0] ss:$8 sps:$4 sm:$0xff]  }
 0x1a7   :  { %2922 = vmatprep.subr.bf16.mxu1 %v4307_v3  ;;  %v4462_v3 = vld [vmem:[#allocation8 + $0x74] ss:$8 sps:$4 sm:$0xff]   ;;  %v487_v6 = vrot.slane %v4883_v55, %v486_v1  ;;  %v4466_v55 = vld [vmem:[#allocation8 + $0x60] ss:$8 sps:$4 sm:$0xff]  }
 0x1a8   :  { %v4513_v50 = vld [vmem:[#allocation8 + $0x1f4] ss:$8 sps:$4 sm:$0xff]  }
 0x1a9   :  { %2882 = vmatpush2.bf16.msra.mxu0 %v4178_v8  ;;  %v4463_v8 = vld [vmem:[#allocation8 + $0x170] ss:$8 sps:$4 sm:$0xff]   ;;  %v4522_v1 = vld [vmem:[#allocation8 + $0xd4] ss:$8 sps:$4 sm:$0xff]  }
 0x1aa   :  { %2923 = vmatpush2.bf16.msra.mxu1 %v4306_v9  ;;  %2883 = vmatprep.subr.bf16.mxu0 %v4171_v10  ;;  %v2954_v9 = vpack.c.bf16 %v2946_v5, %v2946_v5  ;;  %v4531_v5 = vld [vmem:[#allocation8 + $0x1c4] ss:$8 sps:$4 sm:$0xff]  }
 0x1ab   :  { %2924 = vmatprep.subr.bf16.mxu1 %v4299_v11  ;;  %v2613_v11 = vadd.f32 %v4909_v61, %v487_v6  ;;  %v4472_v61 = vld [vmem:[#allocation8 + $0x50] ss:$8 sps:$4 sm:$0xff]   ;;  %v482_v6 = vsub.s32 2, %v4880_v42 }
 0x1ad   :  { %2884 = vmatpush2.bf16.msra.mxu0 %v4170_v14 }
 0x1ae   :  { %2925 = vmatpush2.bf16.msra.mxu1 %v4298_v15  ;;  %2885 = vmatprep.subr.bf16.mxu0 %v4163_v17  ;;  %v4477_v17 = vld [vmem:[#allocation8 + $0x154] ss:$8 sps:$4 sm:$0xff]  }
 0x1af   :  { %2926 = vmatprep.subr.bf16.mxu1 %v4291_v18 }
 0x1b1   :  { %2886 = vmatpush2.bf16.msra.mxu0 %v4162_v26 }
 0x1b2   :  { %2927 = vmatpush2.bf16.msra.mxu1 %v4290_v53  ;;  %2887 = vmatprep.subr.bf16.mxu0 %v4155_v27  ;;  %v4483_v53 = vld [vmem:[#allocation8 + $0x144] ss:$8 sps:$4 sm:$0xff]  }
 0x1b3   :  { %2928 = vmatprep.subr.bf16.mxu1 %v4283_v54  ;;  %v4478_v54 = vld [vmem:[#allocation8 + $0x40] ss:$8 sps:$4 sm:$0xff]  }
 0x1b5   :  { %2888 = vmatpush2.bf16.msra.mxu0 %v4154_v35  ;;  %v4487_v35 = vld [vmem:[#allocation8 + $0x130] ss:$8 sps:$4 sm:$0xff]  }
 0x1b6   :  { %2929 = vmatpush2.bf16.msra.mxu1 %v4282_v36  ;;  %2889 = vmatprep.subr.bf16.mxu0 %v4147_v37  ;;  %v4492_v36 = vld [vmem:[#allocation8 + $0x24] ss:$8 sps:$4 sm:$0xff]  }
 0x1b7   :  { %2930 = vmatprep.subr.bf16.mxu1 %v4275_v38  ;;  %v4495_v37 = vld [vmem:[#allocation8 + $0x124] ss:$8 sps:$4 sm:$0xff]   ;;  %v4490_v38 = vld [vmem:[#allocation8 + $0x20] ss:$8 sps:$4 sm:$0xff]  }
 0x1b9   :  { %2890 = vmatpush2.bf16.msra.mxu0 %v4146_v58  ;;  %v4499_v58 = vld [vmem:[#allocation8 + $0x110] ss:$8 sps:$4 sm:$0xff]  }
 0x1ba   :  { %2931 = vmatpush2.bf16.msra.mxu1 %v4274_v43  ;;  %2891 = vmatprep.subr.bf16.mxu0 %v4139_v44  ;;  %v4504_v43 = vld [vmem:[#allocation8 + $0x4] ss:$8 sps:$4 sm:$0xff]  }
 0x1bb   :  { %2932 = vmatprep.subr.bf16.mxu1 %v4267_v45  ;;  %v4507_v44 = vld [vmem:[#allocation8 + $0x104] ss:$8 sps:$4 sm:$0xff]   ;;  %v4502_v45 = vld [vmem:[#allocation8] ss:$8 sps:$4 sm:$0xff]  }
 0x1bd   :  { %2892 = vmatpush2.bf16.msra.mxu0 %v4138_v57  ;;  %v4511_v57 = vld [vmem:[#allocation8 + $0x1f0] ss:$8 sps:$4 sm:$0xff]  }
 0x1be   :  { %2933 = vmatpush2.bf16.msra.mxu1 %v4266_v62  ;;  %2893 = vmatprep.subr.bf16.mxu0 %v4131_v63  ;;  %v4516_v62 = vld [vmem:[#allocation8 + $0xe4] ss:$8 sps:$4 sm:$0xff]  }
 0x1bf   :  { %2934 = vmatprep.subr.bf16.mxu1 %v4259_v0  ;;  %v4519_v63 = vld [vmem:[#allocation8 + $0x1e4] ss:$8 sps:$4 sm:$0xff]   ;;  %v4514_v0 = vld [vmem:[#allocation8 + $0xe0] ss:$8 sps:$4 sm:$0xff]  }
 0x1c1   :  { %2894 = vmatpush2.bf16.msra.mxu0 %v4130_v2  ;;  %v4525_v2 = vld [vmem:[#allocation8 + $0x1d4] ss:$8 sps:$4 sm:$0xff]  }
 0x1c2   :  { %2935 = vmatpush2.bf16.msra.mxu1 %v4258_v16  ;;  %3741 = vmatprep.subr.bf16.mxu0 %v4462_v3  ;;  %v4520_v16 = vld [vmem:[#allocation8 + $0xd0] ss:$8 sps:$4 sm:$0xff]  }
 0x1c3   :  { %3782 = vmatprep.subr.bf16.mxu1 %v4465_v4  ;;  %v4523_v3 = vld [vmem:[#allocation8 + $0x1d0] ss:$8 sps:$4 sm:$0xff]   ;;  %v4528_v4 = vld [vmem:[#allocation8 + $0xc4] ss:$8 sps:$4 sm:$0xff]  }
 0x1c4   :  { %v4917_v10 = vpop.f32.mrf.mxu0  ;;  %2896 = vmatmul.mubr.bf16.vlgmr.msra.gmra.mxu0 %v4858_v20 }
 0x1c5   :  { %v4921_v59 = vpop.f32.mrf.mxu1  ;;  %2937 = vmatmul.mubr.bf16.vlgmr.msra.gmra.mxu1 %v4870_v32  ;;  %3742 = vmatpush1.bf16.msra.mxu0 %v4460_v7  ;;  %v4475_v32 = vld [vmem:[#allocation8 + $0x150] ss:$8 sps:$4 sm:$0xff]   ;;  %v4526_v7 = vld [vmem:[#allocation8 + $0xc0] ss:$8 sps:$4 sm:$0xff]  }
 0x1c6   :  { %3773 = vmatprep.mubr.bf16.mxu0 %v2954_v9  ;;  %3783 = vmatpush1.bf16.msra.mxu1 %v4463_v8  ;;  %v2653_v12 = vpop.f32.mrf.mxu0  ;;  %v4529_v8 = vld [vmem:[#allocation8 + $0x1c0] ss:$8 sps:$4 sm:$0xff]   ;;  %v4925_v9 = vld [vmem:[#allocation7] sm:$0xff] }
 0x1c7   :  { %v2654_v14 = vadd.f32 %v2653_v12, %v2613_v11  ;;  %v2694_v15 = vpop.f32.mrf.mxu1  ;;  %3743 = vmatprep.subr.bf16.mxu0 %v4468_v29  ;;  %3784 = vmatprep.subr.bf16.mxu1 %v4471_v52  ;;  %v4534_v29 = vld [vmem:[#allocation8 + $0xb4] ss:$8 sps:$4 sm:$0xff]   ;;  %v483_v11 = vrot.slane %v4925_v9, %v482_v6  ;;  %v4535_v12 = vld [vmem:[#allocation8 + $0x1b0] ss:$8 sps:$4 sm:$0xff]  }
 0x1c8   :  { %v2655_v18 = vpop.f32.mrf.mxu0  ;;  %v4537_v52 = vld [vmem:[#allocation8 + $0x1b4] ss:$8 sps:$4 sm:$0xff]  }
 0x1c9   :  { %v2695_v20 = vadd.f32 %v2694_v15, %v2654_v14  ;;  %v2696_v22 = vpop.f32.mrf.mxu1  ;;  %3744 = vmatpush1.bf16.msra.mxu0 %v4466_v55  ;;  %v4532_v55 = vld [vmem:[#allocation8 + $0xb0] ss:$8 sps:$4 sm:$0xff]   ;;  %v2611_v14 = vadd.f32 %v4904_v49, %v483_v11  ;;  %v4538_v15 = vld [vmem:[#allocation8 + $0xa0] ss:$8 sps:$4 sm:$0xff]   ;;  %v4546_v18 = vld [vmem:[#allocation8 + $0x94] ss:$8 sps:$4 sm:$0xff]  }
 0x1ca   :  { %3785 = vmatpush1.bf16.msra.mxu1 %v4469_v28  ;;  %v2656_v23 = vpop.f32.mrf.mxu0  ;;  %3745 = vmatprep.subr.bf16.mxu0 %v4474_v13  ;;  %v4540_v28 = vld [vmem:[#allocation8 + $0xa4] ss:$8 sps:$4 sm:$0xff]   ;;  %v4549_v22 = vld [vmem:[#allocation8 + $0x194] ss:$8 sps:$4 sm:$0xff]   ;;  %v4577_v11 = vld [vmem:[#allocation8 + $0x200] ss:$8 sps:$4 sm:$0xff]  }
 0x1cb   :  { %v2948_v25 = vmax.f32 %v2695_v20, 0.0  ;;  %v2697_v26 = vpop.f32.mrf.mxu1  ;;  %3786 = vmatprep.subr.bf16.mxu1 %v4477_v17  ;;  %v4543_v13 = vld [vmem:[#allocation8 + $0x1a4] ss:$8 sps:$4 sm:$0xff]   ;;  %v4541_v17 = vld [vmem:[#allocation8 + $0x1a0] ss:$8 sps:$4 sm:$0xff]   ;;  %v2652_v20 = vadd.f32 %v4917_v10, %v2611_v14 }
 0x1cc   :  { %v4547_v23 = vld [vmem:[#allocation8 + $0x190] ss:$8 sps:$4 sm:$0xff]   ;;  %v4555_v49 = vld [vmem:[#allocation8 + $0x184] ss:$8 sps:$4 sm:$0xff]   ;;  %v2945_v26 = vmax.f32 %v4902_v48, 0.0 }
 0x1cd   :  { %v2956_v27 = vpack.c.bf16 %v2948_v25, %v2948_v25  ;;  %3746 = vmatpush1.bf16.msra.mxu0 %v4472_v61  ;;  %v4544_v61 = vld [vmem:[#allocation8 + $0x90] ss:$8 sps:$4 sm:$0xff]   ;;  %v4550_v25 = vld [vmem:[#allocation8 + $0x80] ss:$8 sps:$4 sm:$0xff]   ;;  %v4558_v10 = vld [vmem:[#allocation8 + $0x274] ss:$8 sps:$4 sm:$0xff]  }
 0x1ce   :  { %3787 = vmatpush1.bf16.msra.mxu1 %v4475_v32  ;;  %3747 = vmatprep.subr.bf16.mxu0 %v4480_v24  ;;  %v4552_v32 = vld [vmem:[#allocation8 + $0x84] ss:$8 sps:$4 sm:$0xff]   ;;  %v2693_v24 = vadd.f32 %v4921_v59, %v2652_v20  ;;  %v4604_v59 = vld [vmem:[#allocation8 + $0x370] ss:$8 sps:$4 sm:$0xff]   ;;  %v4624_v6 = vld [vmem:[#allocation8 + $0x314] ss:$8 sps:$4 sm:$0xff]  }
 0x1cf   :  { %3814 = vmatprep.mubr.bf16.mxu1 %v2956_v27  ;;  %3788 = vmatprep.subr.bf16.mxu1 %v4483_v53  ;;  %v4553_v53 = vld [vmem:[#allocation8 + $0x180] ss:$8 sps:$4 sm:$0xff]   ;;  %v4585_v14 = vld [vmem:[#allocation8 + $0x2e4] ss:$8 sps:$4 sm:$0xff]   ;;  %v4588_v20 = vld [vmem:[#allocation8 + $0x2d4] ss:$8 sps:$4 sm:$0xff]  }
 0x1d0   :  { %v2947_v27 = vmax.f32 %v2693_v24, 0.0  ;;  %v4634_v24 = vld [vmem:[#allocation8 + $0x3d0] ss:$8 sps:$4 sm:$0xff]  }
 0x1d1   :  { %3748 = vmatpush1.bf16.msra.mxu0 %v4478_v54  ;;  %v4606_v54 = vld [vmem:[#allocation8 + $0x374] ss:$8 sps:$4 sm:$0xff]  }
 0x1d2   :  { %3789 = vmatpush1.bf16.msra.mxu1 %v4481_v30  ;;  %3749 = vmatprep.subr.bf16.mxu0 %v4486_v31  ;;  %v4556_v30 = vld [vmem:[#allocation8 + $0x270] ss:$8 sps:$4 sm:$0xff]   ;;  %v2953_v31 = vpack.c.bf16 %v2945_v26, %v2945_v26  ;;  %v4594_v26 = vld [vmem:[#allocation8 + $0x2b4] ss:$8 sps:$4 sm:$0xff]  }
 0x1d3   :  { %3790 = vmatprep.subr.bf16.mxu1 %v4489_v33  ;;  %v4561_v33 = vld [vmem:[#allocation8 + $0x264] ss:$8 sps:$4 sm:$0xff]  }
 0x1d5   :  { %3750 = vmatpush1.bf16.msra.mxu0 %v4484_v34  ;;  %v2955_v34 = vpack.c.bf16 %v2947_v27, %v2947_v27  ;;  %v4592_v27 = vld [vmem:[#allocation8 + $0x2b0] ss:$8 sps:$4 sm:$0xff]  }
 0x1d6   :  { %3791 = vmatpush1.bf16.msra.mxu1 %v4487_v35  ;;  %3751 = vmatprep.subr.bf16.mxu0 %v4492_v36  ;;  %v4609_v35 = vld [vmem:[#allocation8 + $0x364] ss:$8 sps:$4 sm:$0xff]  }
 0x1d7   :  { %3792 = vmatprep.subr.bf16.mxu1 %v4495_v37  ;;  %v4559_v37 = vld [vmem:[#allocation8 + $0x260] ss:$8 sps:$4 sm:$0xff]  }
 0x1d9   :  { %3752 = vmatpush1.bf16.msra.mxu0 %v4490_v38 }
 0x1da   :  { %3793 = vmatpush1.bf16.msra.mxu1 %v4493_v39  ;;  %3753 = vmatprep.subr.bf16.mxu0 %v4498_v40  ;;  %v4564_v39 = vld [vmem:[#allocation8 + $0x254] ss:$8 sps:$4 sm:$0xff]   ;;  %v4607_v40 = vld [vmem:[#allocation8 + $0x360] ss:$8 sps:$4 sm:$0xff]  }
 0x1db   :  { %3794 = vmatprep.subr.bf16.mxu1 %v4501_v41 }
 0x1dd   :  { %3754 = vmatpush1.bf16.msra.mxu0 %v4496_v19  ;;  %v4612_v19 = vld [vmem:[#allocation8 + $0x354] ss:$8 sps:$4 sm:$0xff]  }
 0x1de   :  { %3795 = vmatpush1.bf16.msra.mxu1 %v4499_v58  ;;  %3755 = vmatprep.subr.bf16.mxu0 %v4504_v43 }
 0x1df   :  { %3796 = vmatprep.subr.bf16.mxu1 %v4507_v44  ;;  %v4562_v44 = vld [vmem:[#allocation8 + $0x250] ss:$8 sps:$4 sm:$0xff]  }
 0x1e1   :  { %3756 = vmatpush1.bf16.msra.mxu0 %v4502_v45 }
 0x1e2   :  { %3797 = vmatpush1.bf16.msra.mxu1 %v4505_v46  ;;  %3757 = vmatprep.subr.bf16.mxu0 %v4510_v47  ;;  %v4567_v46 = vld [vmem:[#allocation8 + $0x244] ss:$8 sps:$4 sm:$0xff]   ;;  %v4610_v47 = vld [vmem:[#allocation8 + $0x350] ss:$8 sps:$4 sm:$0xff]  }
 0x1e3   :  { %3798 = vmatprep.subr.bf16.mxu1 %v4513_v50 }
 0x1e5   :  { %3758 = vmatpush2.bf16.msra.mxu0 %v4508_v56  ;;  %v4615_v56 = vld [vmem:[#allocation8 + $0x344] ss:$8 sps:$4 sm:$0xff]  }
 0x1e6   :  { %3799 = vmatpush2.bf16.msra.mxu1 %v4511_v57  ;;  %3759 = vmatprep.subr.bf16.mxu0 %v4516_v62  ;;  %v4565_v57 = vld [vmem:[#allocation8 + $0x240] ss:$8 sps:$4 sm:$0xff]   ;;  %v4570_v62 = vld [vmem:[#allocation8 + $0x234] ss:$8 sps:$4 sm:$0xff]  }
 0x1e7   :  { %3800 = vmatprep.subr.bf16.mxu1 %v4519_v63  ;;  %v4613_v63 = vld [vmem:[#allocation8 + $0x340] ss:$8 sps:$4 sm:$0xff]  }
 0x1e9   :  { %3760 = vmatpush2.bf16.msra.mxu0 %v4514_v0  ;;  %v4618_v0 = vld [vmem:[#allocation8 + $0x334] ss:$8 sps:$4 sm:$0xff]  }
 0x1ea   :  { %3801 = vmatpush2.bf16.msra.mxu1 %v4517_v21  ;;  %3761 = vmatprep.subr.bf16.mxu0 %v4522_v1  ;;  %v4568_v21 = vld [vmem:[#allocation8 + $0x230] ss:$8 sps:$4 sm:$0xff]   ;;  %v4573_v1 = vld [vmem:[#allocation8 + $0x224] ss:$8 sps:$4 sm:$0xff]  }
 0x1eb   :  { %3802 = vmatprep.subr.bf16.mxu1 %v4525_v2  ;;  %v4616_v2 = vld [vmem:[#allocation8 + $0x330] ss:$8 sps:$4 sm:$0xff]  }
 0x1ed   :  { %3762 = vmatpush2.bf16.msra.mxu0 %v4520_v16  ;;  %v4621_v16 = vld [vmem:[#allocation8 + $0x324] ss:$8 sps:$4 sm:$0xff]  }
 0x1ee   :  { %3803 = vmatpush2.bf16.msra.mxu1 %v4523_v3  ;;  %3763 = vmatprep.subr.bf16.mxu0 %v4528_v4  ;;  %v4571_v3 = vld [vmem:[#allocation8 + $0x220] ss:$8 sps:$4 sm:$0xff]   ;;  %v4576_v4 = vld [vmem:[#allocation8 + $0x214] ss:$8 sps:$4 sm:$0xff]  }
 0x1ef   :  { %3804 = vmatprep.subr.bf16.mxu1 %v4531_v5  ;;  %v4619_v5 = vld [vmem:[#allocation8 + $0x320] ss:$8 sps:$4 sm:$0xff]  }
 0x1f1   :  { %3764 = vmatpush2.bf16.msra.mxu0 %v4526_v7  ;;  %v4574_v7 = vld [vmem:[#allocation8 + $0x210] ss:$8 sps:$4 sm:$0xff]  }
 0x1f2   :  { %3805 = vmatpush2.bf16.msra.mxu1 %v4529_v8  ;;  %3765 = vmatprep.subr.bf16.mxu0 %v4534_v29  ;;  %v4579_v8 = vld [vmem:[#allocation8 + $0x204] ss:$8 sps:$4 sm:$0xff]   ;;  %v4622_v29 = vld [vmem:[#allocation8 + $0x310] ss:$8 sps:$4 sm:$0xff]  }
 0x1f3   :  { %3806 = vmatprep.subr.bf16.mxu1 %v4537_v52  ;;  %v4627_v52 = vld [vmem:[#allocation8 + $0x304] ss:$8 sps:$4 sm:$0xff]  }
 0x1f5   :  { %3766 = vmatpush2.bf16.msra.mxu0 %v4532_v55  ;;  %v4582_v55 = vld [vmem:[#allocation8 + $0x2f4] ss:$8 sps:$4 sm:$0xff]  }
 0x1f6   :  { %3807 = vmatpush2.bf16.msra.mxu1 %v4535_v12  ;;  %3767 = vmatprep.subr.bf16.mxu0 %v4540_v28  ;;  %v4625_v12 = vld [vmem:[#allocation8 + $0x300] ss:$8 sps:$4 sm:$0xff]   ;;  %v4630_v28 = vld [vmem:[#allocation8 + $0x3f4] ss:$8 sps:$4 sm:$0xff]  }
 0x1f7   :  { %3808 = vmatprep.subr.bf16.mxu1 %v4543_v13  ;;  %v4580_v13 = vld [vmem:[#allocation8 + $0x2f0] ss:$8 sps:$4 sm:$0xff]  }
 0x1f9   :  { %3768 = vmatpush2.bf16.msra.mxu0 %v4538_v15  ;;  %v4628_v15 = vld [vmem:[#allocation8 + $0x3f0] ss:$8 sps:$4 sm:$0xff]  }
 0x1fa   :  { %3809 = vmatpush2.bf16.msra.mxu1 %v4541_v17  ;;  %3769 = vmatprep.subr.bf16.mxu0 %v4546_v18  ;;  %v4633_v17 = vld [vmem:[#allocation8 + $0x3e4] ss:$8 sps:$4 sm:$0xff]   ;;  %v4583_v18 = vld [vmem:[#allocation8 + $0x2e0] ss:$8 sps:$4 sm:$0xff]  }
 0x1fb   :  { %3810 = vmatprep.subr.bf16.mxu1 %v4549_v22  ;;  %v4631_v22 = vld [vmem:[#allocation8 + $0x3e0] ss:$8 sps:$4 sm:$0xff]  }
 0x1fd   :  { %3770 = vmatpush2.bf16.msra.mxu0 %v4544_v61  ;;  %v4636_v61 = vld [vmem:[#allocation8 + $0x3d4] ss:$8 sps:$4 sm:$0xff]  }
 0x1fe   :  { %3811 = vmatpush2.bf16.msra.mxu1 %v4547_v23  ;;  %3771 = vmatprep.subr.bf16.mxu0 %v4552_v32  ;;  %v4586_v23 = vld [vmem:[#allocation8 + $0x2d0] ss:$8 sps:$4 sm:$0xff]   ;;  %v4591_v32 = vld [vmem:[#allocation8 + $0x2c4] ss:$8 sps:$4 sm:$0xff]  }
 0x1ff   :  { %3812 = vmatprep.subr.bf16.mxu1 %v4555_v49  ;;  %v4639_v49 = vld [vmem:[#allocation8 + $0x3c4] ss:$8 sps:$4 sm:$0xff]  }
 0x201   :  { %3772 = vmatpush2.bf16.msra.mxu0 %v4550_v25  ;;  %v4589_v25 = vld [vmem:[#allocation8 + $0x2c0] ss:$8 sps:$4 sm:$0xff]  }
 0x202   :  { %3813 = vmatpush2.bf16.msra.mxu1 %v4553_v53  ;;  %3823 = vmatprep.subr.bf16.mxu0 %v4558_v10  ;;  %v4637_v53 = vld [vmem:[#allocation8 + $0x3c0] ss:$8 sps:$4 sm:$0xff]   ;;  %v4642_v10 = vld [vmem:[#allocation8 + $0x3b4] ss:$8 sps:$4 sm:$0xff]  }
 0x203   :  { %3864 = vmatprep.subr.bf16.mxu1 %v4606_v54  ;;  %v4597_v54 = vld [vmem:[#allocation8 + $0x2a4] ss:$8 sps:$4 sm:$0xff]  }
 0x204   :  { %v4932_v36 = vpop.f32.mrf.mxu0  ;;  %3774 = vmatmul.mubr.bf16.vlgmr.msra.gmra.mxu0 %v2953_v31  ;;  %v4645_v31 = vld [vmem:[#allocation8 + $0x3a4] ss:$8 sps:$4 sm:$0xff]  }
 0x205   :  { %v4934_v48 = vpop.f32.mrf.mxu1  ;;  %3815 = vmatmul.mubr.bf16.vlgmr.msra.gmra.mxu1 %v2955_v34  ;;  %3824 = vmatpush1.bf16.msra.mxu0 %v4556_v30  ;;  %v4640_v30 = vld [vmem:[#allocation8 + $0x3b0] ss:$8 sps:$4 sm:$0xff]   ;;  %v4643_v34 = vld [vmem:[#allocation8 + $0x3a0] ss:$8 sps:$4 sm:$0xff]  }
 0x206   :  { %v4936_v38 = vpop.f32.mrf.mxu0  ;;  %3825 = vmatprep.subr.bf16.mxu0 %v4561_v33  ;;  %3865 = vmatpush1.bf16.msra.mxu1 %v4604_v59  ;;  %v4595_v33 = vld [vmem:[#allocation8 + $0x2a0] ss:$8 sps:$4 sm:$0xff]   ;;  %v4600_v59 = vld [vmem:[#allocation8 + $0x294] ss:$8 sps:$4 sm:$0xff]  }
 0x207   :  { %v4938_v41 = vpop.f32.mrf.mxu1  ;;  %3866 = vmatprep.subr.bf16.mxu1 %v4609_v35  ;;  %v490_v35 = vsub.s32 4, %v4880_v42 }
 0x208   :  { %v2737_v58 = vpop.f32.mrf.mxu0 }
 0x209   :  { %v2778_v43 = vpop.f32.mrf.mxu1  ;;  %3826 = vmatpush1.bf16.msra.mxu0 %v4559_v37  ;;  %v4648_v37 = vld [vmem:[#allocation8 + $0x394] ss:$8 sps:$4 sm:$0xff]   ;;  %v4646_v58 = vld [vmem:[#allocation8 + $0x390] ss:$8 sps:$4 sm:$0xff]  }
 0x20a   :  { %v2738_v45 = vpop.f32.mrf.mxu0  ;;  %3827 = vmatprep.subr.bf16.mxu0 %v4564_v39  ;;  %3867 = vmatpush1.bf16.msra.mxu1 %v4607_v40  ;;  %v494_v39 = vsub.s32 5, %v4880_v42  ;;  %v4598_v40 = vld [vmem:[#allocation8 + $0x290] ss:$8 sps:$4 sm:$0xff]   ;;  %v491_v43 = vrot.slane %v4925_v9, %v490_v35 }
 0x20b   :  { %v2779_v50 = vpop.f32.mrf.mxu1  ;;  %3868 = vmatprep.subr.bf16.mxu1 %v4612_v19  ;;  %v4603_v19 = vld [vmem:[#allocation8 + $0x284] ss:$8 sps:$4 sm:$0xff]  }
 0x20c   :  { %v495_v45 = vrot.slane %v4925_v9, %v494_v39  ;;  %v2734_v50 = vadd.f32 %v4932_v36, %v491_v43 }
 0x20d   :  { %3828 = vmatpush1.bf16.msra.mxu0 %v4562_v44  ;;  %v4651_v44 = vld [vmem:[#allocation8 + $0x384] ss:$8 sps:$4 sm:$0xff]  }
 0x20e   :  { %3829 = vmatprep.subr.bf16.mxu0 %v4567_v46  ;;  %3869 = vmatpush1.bf16.msra.mxu1 %v4610_v47  ;;  %v4601_v46 = vld [vmem:[#allocation8 + $0x280] ss:$8 sps:$4 sm:$0xff]  }
 0x20f   :  { %3870 = vmatprep.subr.bf16.mxu1 %v4615_v56  ;;  %v4649_v47 = vld [vmem:[#allocation8 + $0x380] ss:$8 sps:$4 sm:$0xff]   ;;  %v2736_v56 = vadd.f32 %v4936_v38, %v495_v45 }
 0x211   :  { %3830 = vmatpush1.bf16.msra.mxu0 %v4565_v57  ;;  %v2775_v57 = vadd.f32 %v4934_v48, %v2734_v50  ;;  %v498_v48 = vsub.s32 6, %v4880_v42 }
 0x212   :  { %3831 = vmatprep.subr.bf16.mxu0 %v4570_v62  ;;  %3871 = vmatpush1.bf16.msra.mxu1 %v4613_v63  ;;  %v2777_v63 = vadd.f32 %v4938_v41, %v2736_v56 }
 0x213   :  { %3872 = vmatprep.subr.bf16.mxu1 %v4618_v0  ;;  %v499_v41 = vrot.slane %v4925_v9, %v498_v48 }
 0x215   :  { %3832 = vmatpush1.bf16.msra.mxu0 %v4568_v21 }
 0x216   :  { %3833 = vmatprep.subr.bf16.mxu0 %v4573_v1  ;;  %3873 = vmatpush1.bf16.msra.mxu1 %v4616_v2 }
 0x217   :  { %3874 = vmatprep.subr.bf16.mxu1 %v4621_v16 }
 0x219   :  { %3834 = vmatpush1.bf16.msra.mxu0 %v4571_v3 }
 0x21a   :  { %3835 = vmatprep.subr.bf16.mxu0 %v4576_v4  ;;  %3875 = vmatpush1.bf16.msra.mxu1 %v4619_v5 }
 0x21b   :  { %3876 = vmatprep.subr.bf16.mxu1 %v4624_v6 }
 0x21d   :  { %3836 = vmatpush1.bf16.msra.mxu0 %v4574_v7 }
 0x21e   :  { %3837 = vmatprep.subr.bf16.mxu0 %v4579_v8  ;;  %3877 = vmatpush1.bf16.msra.mxu1 %v4622_v29  ;;  %v502_v29 = vsub.s32 7, %v4880_v42 }
 0x21f   :  { %3878 = vmatprep.subr.bf16.mxu1 %v4627_v52 }
 0x220   :  { %v503_v52 = vrot.slane %v4925_v9, %v502_v29  ;;  %v3089_v9 = vld [vmem:[#allocation10] sm:$0x3] }
 0x221   :  { %3838 = vmatpush1.bf16.msra.mxu0 %v4577_v11 }
 0x222   :  { %3839 = vmatprep.subr.bf16.mxu0 %v4582_v55  ;;  %3879 = vmatpush1.bf16.msra.mxu1 %v4625_v12 }
 0x223   :  { %3880 = vmatprep.subr.bf16.mxu1 %v4630_v28 }
 0x225   :  { %3840 = vmatpush2.bf16.msra.mxu0 %v4580_v13 }
 0x226   :  { %3841 = vmatprep.subr.bf16.mxu0 %v4585_v14  ;;  %3881 = vmatpush2.bf16.msra.mxu1 %v4628_v15 }
 0x227   :  { %3882 = vmatprep.subr.bf16.mxu1 %v4633_v17 }
 0x229   :  { %3842 = vmatpush2.bf16.msra.mxu0 %v4583_v18 }
 0x22a   :  { %3843 = vmatprep.subr.bf16.mxu0 %v4588_v20  ;;  %3883 = vmatpush2.bf16.msra.mxu1 %v4631_v22 }
 0x22b   :  { %3884 = vmatprep.subr.bf16.mxu1 %v4636_v61 }
 0x22d   :  { %3844 = vmatpush2.bf16.msra.mxu0 %v4586_v23 }
 0x22e   :  { %3845 = vmatprep.subr.bf16.mxu0 %v4591_v32  ;;  %3885 = vmatpush2.bf16.msra.mxu1 %v4634_v24 }
 0x22f   :  { %3886 = vmatprep.subr.bf16.mxu1 %v4639_v49 }
 0x231   :  { %3846 = vmatpush2.bf16.msra.mxu0 %v4589_v25 }
 0x232   :  { %3847 = vmatprep.subr.bf16.mxu0 %v4594_v26  ;;  %3887 = vmatpush2.bf16.msra.mxu1 %v4637_v53  ;;  %v3094_v53 = vrot.slane %v3089_v9, %v474_v51 }
 0x233   :  { %3888 = vmatprep.subr.bf16.mxu1 %v4642_v10  ;;  %v3098_v10 = vrot.slane %v3089_v9, %v478_v60 }
 0x235   :  { %3848 = vmatpush2.bf16.msra.mxu0 %v4592_v27 }
 0x236   :  { %3849 = vmatprep.subr.bf16.mxu0 %v4597_v54  ;;  %3889 = vmatpush2.bf16.msra.mxu1 %v4640_v30 }
 0x237   :  { %3890 = vmatprep.subr.bf16.mxu1 %v4645_v31 }
 0x239   :  { %3850 = vmatpush2.bf16.msra.mxu0 %v4595_v33 }
 0x23a   :  { %3851 = vmatprep.subr.bf16.mxu0 %v4600_v59  ;;  %3891 = vmatpush2.bf16.msra.mxu1 %v4643_v34 }
 0x23b   :  { %3892 = vmatprep.subr.bf16.mxu1 %v4648_v37 }
 0x23d   :  { %3852 = vmatpush2.bf16.msra.mxu0 %v4598_v40 }
 0x23e   :  { %3853 = vmatprep.subr.bf16.mxu0 %v4603_v19  ;;  %3893 = vmatpush2.bf16.msra.mxu1 %v4646_v58 }
 0x23f   :  { %3894 = vmatprep.subr.bf16.mxu1 %v4651_v44 }
 0x241   :  { %3854 = vmatpush2.bf16.msra.mxu0 %v4601_v46 }
 0x242   :  { %3895 = vmatpush2.bf16.msra.mxu1 %v4649_v47 }
 0x244   :  { %v2815_v62 = vpop.f32.mrf.mxu0 }
 0x245   :  { %v2816_v0 = vadd.f32 %v2815_v62, %v2775_v57  ;;  %v2856_v21 = vpop.f32.mrf.mxu1 }
 0x246   :  { %v2817_v1 = vpop.f32.mrf.mxu0  ;;  %v2857_v11 = vadd.f32 %v2856_v21, %v499_v41 }
 0x247   :  { %v2818_v2 = vadd.f32 %v2817_v1, %v2777_v63  ;;  %v2858_v16 = vpop.f32.mrf.mxu1  ;;  %v2949_v3 = vmax.f32 %v2816_v0, 0.0 }
 0x248   :  { %v2819_v4 = vpop.f32.mrf.mxu0  ;;  %v2859_v12 = vadd.f32 %v2858_v16, %v503_v52 }
 0x249   :  { %v2950_v5 = vmax.f32 %v2818_v2, 0.0  ;;  %v2860_v6 = vpop.f32.mrf.mxu1  ;;  %v2957_v38 = vpack.c.bf16 %v2949_v3, %v2949_v3 }
 0x24a   :  { %v2820_v36 = vpop.f32.mrf.mxu0 }
 0x24b   :  { %v2958_v7 = vpack.c.bf16 %v2950_v5, %v2950_v5  ;;  %v2861_v8 = vpop.f32.mrf.mxu1 }
 0x24d   :  { %3855 = vmatprep.mubr.bf16.mxu0 %v2958_v7 }
 0x24e   :  { %3856 = vmatmul.mubr.bf16.vlgmr.msra.gmra.mxu0 %v2957_v38 }
 0x284   :  { %v2897_v55 = vpop.f32.mrf.mxu0 }
 0x285   :  { %v2898_v28 = vadd.f32 %v2897_v55, %v2857_v11  ;;  %v2938_v13 = vpop.f32.mrf.mxu1 }
 0x286   :  { %v2899_v14 = vpop.f32.mrf.mxu0 }
 0x287   :  { %v2939_v15 = vadd.f32 %v2938_v13, %v2898_v28  ;;  %v2900_v17 = vadd.f32 %v2899_v14, %v2859_v12  ;;  %v2940_v18 = vpop.f32.mrf.mxu1 }
 0x288   :  { %v2901_v20 = vpop.f32.mrf.mxu0 }
 0x289   :  { %v2941_v22 = vadd.f32 %v2940_v18, %v2900_v17  ;;  %v2942_v61 = vpop.f32.mrf.mxu1  ;;  %v2951_v23 = vmax.f32 %v2939_v15, 0.0 }
 0x28a   :  { %v2902_v32 = vpop.f32.mrf.mxu0 }
 0x28b   :  { %v2952_v24 = vmax.f32 %v2941_v22, 0.0  ;;  %v2943_v49 = vpop.f32.mrf.mxu1  ;;  %v2959_v26 = vpack.c.bf16 %v2951_v23, %v2951_v23 }
 0x28d   :  { %v2960_v25 = vpack.c.bf16 %v2952_v24, %v2952_v24 }
 0x28f   :  { %3896 = vmatprep.mubr.bf16.mxu1 %v2960_v25 }
 0x290   :  { %3897 = vmatmul.mubr.bf16.vlgmr.msra.gmra.mxu1 %v2959_v26 }
 0x2c4   :  { %v3775_v27 = vpop.f32.mrf.mxu0 }
 0x2c5   :  { %v3776_v54 = vadd.f32 %v3775_v27, %v3094_v53  ;;  %v3816_v30 = vpop.f32.mrf.mxu1 }
 0x2c6   :  { %v3777_v31 = vpop.f32.mrf.mxu0 }
 0x2c7   :  { %v3817_v33 = vadd.f32 %v3816_v30, %v3776_v54  ;;  %v3778_v59 = vadd.f32 %v3777_v31, %v3098_v10  ;;  %v3818_v34 = vpop.f32.mrf.mxu1 }
 0x2c8   :  { %v3779_v35 = vpop.f32.mrf.mxu0 }
 0x2c9   :  { %v3819_v37 = vadd.f32 %v3818_v34, %v3778_v59  ;;  %v3820_v39 = vpop.f32.mrf.mxu1 }
 0x2ca   :  { %v3780_v40 = vpop.f32.mrf.mxu0 }
 0x2cb   :  { %v3821_v19 = vpop.f32.mrf.mxu1 }
 0x30e   :  { %v3857_v58 = vpop.f32.mrf.mxu0 }
 0x30f   :  { %v3858_v43 = vadd.f32 %v3857_v58, %v3817_v33 }
 0x310   :  { %v3859_v44 = vpop.f32.mrf.mxu0 }
 0x311   :  { %v3860_v45 = vadd.f32 %v3859_v44, %v3819_v37 }
 0x312   :  { %v3861_v51 = vpop.f32.mrf.mxu0 }
 0x314   :  { %v3862_v46 = vpop.f32.mrf.mxu0 }
 0x350   :  { %v3898_v42 = vpop.f32.mrf.mxu1 }
 0x351   :  { %v3899_v60 = vadd.f32 %v3898_v42, %v3858_v43 }
 0x352   :  { %v3900_v47 = vpop.f32.mrf.mxu1 }
 0x353   :  { %v3905_v50 = vmax.f32 %v3899_v60, 0.0  ;;  %v3901_v56 = vadd.f32 %v3900_v47, %v3860_v45 }
 0x354   :  { %v3902_v57 = vpop.f32.mrf.mxu1 }
 0x355   :  { %3907 = vst [vmem:[#allocation11] sm:$0xff] %v3905_v50  ;;  %v3906_v62 = vmax.f32 %v3901_v56, 0.0 }
 0x356   :  { %v3903_v63 = vpop.f32.mrf.mxu1 }
 0x357   :  { %3908 = vst [vmem:[#allocation11 + $0x8] sm:$0xff] %v3906_v62 }
 0x358   :  { %4764 = shalt.err (!%p4761_p1)
}
 0x359   :  { %3918 = dma.vmem_to_hbm [thread:$0]  %s3916_s4, 256, %s4964_s5, [#allocation4]  }
 0x35a   :  { %4779 = dma.done.wait [#allocation4], 256  }
 0x35b   :  { %4780 = vsyncadd [#allocation4], 4294967040 }
 0x35c   :  { %3922 = vsyncpa [#allocation3], 1 }
 0x35d   :  { %3923 = vsyncpa [#allocation6], 1 }
 0x35e   :  { %3924 = vsyncpa [#allocation9], 1 }
 0x35f   :  { %3925 = vsyncpa [#allocation4], 1 }

// kernel: tpu_custom_call.1
= control target key start
LH: loop header
LB: loop body
LE: loop exit
PB: predicated region body
PF: predicated region fallthrough
CT: control target
= control target key end

     0   :  { %10 = vsyncpa [#allocation3], 0  ;;  %s4959_s0 = inlined_call_operand.hbm [shape: bf16[8,768], index: 0, kind: input, shape index: {}]   ;;  %s4960_s1 = inlined_call_operand.hbm [shape: bf16[768,1024], index: 1, kind: input, shape index: {}]   ;;  %s4961_s2 = inlined_call_operand.hbm [shape: f32[1,1024], index: 2, kind: input, shape index: {}]   ;;  %s4962_s3 = inlined_call_operand.hbm [shape: bf16[1024,256], index: 3, kind: input, shape index: {}]   ;;  %s4963_s4 = inlined_call_operand.hbm [shape: f32[1,256], index: 4, kind: input, shape index: {}]   ;;  %s4964_s5 = inlined_call_operand.hbm [shape: f32[8,256], index: 5, kind: output, shape index: {}]  }
   0x1   :  { %11 = vsyncpa [#allocation6], 0 }
   0x2   :  { %12 = vsyncpa [#allocation9], 0 }
   0x3   :  { %13 = vsyncpa [#allocation4], 0  ;;  %s4781_s18 = smov [#allocation5]  }
   0x4   :  { %s29_s19 = sshll.u32 %s4781_s18, 4  ;;  %s30_s19 = int_to_ptr.vmem [resolvable:$true] %s29_s19 }
   0x5   :  { %s4661_s20 = scalar_lea.vmem %s30_s19, 49152  ;;  %p4666_p1 = scmp.lt.s32.totalorder %s30_s19, %s30_s19 }
   0x6   :  { %p4662_p0 = scmp.ne.s32.totalorder %s30_s19, %s4661_s20  ;;  %p4667_p2 = scmp.lt.s32.totalorder %s4661_s20, %s4661_s20 }
   0x8   :  { %p4668_p3 = por %p4667_p2, %p4666_p1 }
   0xa   :  { %p4669_p4 = pnand %p4668_p3, %p4662_p0 }
   0xc   :  { %4672 = shalt.err (!%p4669_p4)
}
   0xd   :  { %s4782_s21 = smov 512   ;;  %s4783_s22 = smov 32  }
   0xe   :  { %35 = dma.hbm_to_vmem [thread:$0]  %s4960_s1, 49152, %s30_s19, [#allocation6], %s4782_s21, %s4782_s21, %s4783_s22  }
   0xf   :  { %s4784_s25 = smov [#allocation8]  }
  0x10   :  { %s51_s26 = sshll.u32 %s4784_s25, 4  ;;  %s52_s26 = int_to_ptr.vmem [resolvable:$true] %s51_s26 }
  0x11   :  { %s4681_s27 = scalar_lea.vmem %s52_s26, 16384  ;;  %p4686_p6 = scmp.lt.s32.totalorder %s52_s26, %s52_s26 }
  0x12   :  { %p4682_p5 = scmp.ne.s32.totalorder %s52_s26, %s4681_s27  ;;  %p4687_p7 = scmp.lt.s32.totalorder %s4681_s27, %s4681_s27 }
  0x14   :  { %p4688_p8 = por %p4687_p7, %p4686_p6 }
  0x16   :  { %p4689_p9 = pnand %p4688_p8, %p4682_p5 }
  0x18   :  { %4692 = shalt.err (!%p4689_p9)
}
  0x19   :  { %s4785_s28 = smov 128   ;;  %s4786_s29 = smov 8  }
  0x1a   :  { %57 = dma.hbm_to_vmem [thread:$0]  %s4962_s3, 16384, %s52_s26, [#allocation9], %s4785_s28, %s4785_s28, %s4786_s29  }
  0x1b   :  { %s4787_s7 = smov [#allocation2]   ;;  %s4788_s9 = smov [#allocation7]  }
  0x1c   :  { %s20_s8 = sshll.u32 %s4787_s7, 4  ;;  %s42_s1 = sshll.u32 %s4788_s9, 4  ;;  %s21_s8 = int_to_ptr.vmem [resolvable:$true] %s20_s8  ;;  %s43_s1 = int_to_ptr.vmem [resolvable:$true] %s42_s1 }
  0x1d   :  { %s4701_s10 = scalar_lea.vmem %s21_s8, 384  ;;  %p4706_p11 = scmp.lt.s32.totalorder %s21_s8, %s21_s8 }
  0x1e   :  { %p4702_p10 = scmp.ne.s32.totalorder %s21_s8, %s4701_s10  ;;  %p4707_p12 = scmp.lt.s32.totalorder %s4701_s10, %s4701_s10 }
  0x20   :  { %p4708_p13 = por %p4707_p12, %p4706_p11 }
  0x22   :  { %p4709_p0 = pnand %p4708_p13, %p4702_p10 }
  0x24   :  { %4712 = shalt.err (!%p4709_p0)
}
  0x25   :  { %23 = dma.hbm_to_vmem [thread:$0]  %s4959_s0, 384, %s21_s8, [#allocation3]  }
  0x26   :  { %s4721_s13 = scalar_lea.vmem %s43_s1, 128  ;;  %p4726_p2 = scmp.lt.s32.totalorder %s43_s1, %s43_s1 }
  0x27   :  { %p4722_p1 = scmp.ne.s32.totalorder %s43_s1, %s4721_s13  ;;  %p4727_p3 = scmp.lt.s32.totalorder %s4721_s13, %s4721_s13 }
  0x29   :  { %p4728_p4 = por %p4727_p3, %p4726_p2 }
  0x2b   :  { %p4729_p5 = pnand %p4728_p4, %p4722_p1 }
  0x2d   :  { %4732 = shalt.err (!%p4729_p5)
}
  0x2e   :  { %45 = dma.hbm_to_vmem [thread:$0]  %s4961_s2, 128, %s43_s1, [#allocation6]  }
  0x2f   :  { %s4789_s15 = smov [#allocation10]  }
  0x30   :  { %s64_s16 = sshll.u32 %s4789_s15, 4  ;;  %s65_s16 = int_to_ptr.vmem [resolvable:$true] %s64_s16 }
  0x31   :  { %s4741_s17 = scalar_lea.vmem %s65_s16, 32  ;;  %p4746_p7 = scmp.lt.s32.totalorder %s65_s16, %s65_s16 }
  0x32   :  { %p4742_p6 = scmp.ne.s32.totalorder %s65_s16, %s4741_s17  ;;  %p4747_p8 = scmp.lt.s32.totalorder %s4741_s17, %s4741_s17 }
  0x34   :  { %p4748_p9 = por %p4747_p8, %p4746_p7 }
  0x36   :  { %p4749_p10 = pnand %p4748_p9, %p4742_p6 }
  0x38   :  { %4752 = shalt.err (!%p4749_p10)
}
  0x39   :  { %67 = dma.hbm_to_vmem [thread:$0]  %s4963_s4, 32, %s65_s16, [#allocation9]  }
  0x3a   :  { %4773 = dma.done.wait [#allocation3], 384  }
  0x3b   :  { %4774 = vsyncadd [#allocation3], 4294966912 }
  0x3c   :  { %4775 = dma.done.wait [#allocation6], 49280  }
  0x3d   :  { %4776 = vsyncadd [#allocation6], 4294918016 }
  0x3e   :  { %4777 = dma.done.wait [#allocation9], 16416  }
  0x3f   :  { %4778 = vsyncadd [#allocation9], 4294950880  ;;  %v142_v0 = vld [vmem:[#allocation5 + $0x1c0] sm:$0xff]  ;;  %v4836_v53 = vld [vmem:[#allocation2] sm:$0xff]  ;;  %s4790_s2 = smov [#allocation11]  }
  0x40   :  { %v146_v1 = vld [vmem:[#allocation5 + $0x1e0] sm:$0xff]  ;;  %v4838_v54 = vld [vmem:[#allocation2 + $0x8] sm:$0xff]  ;;  %v4842_v58 = vcombine.high %v4836_v53, %v4836_v53  ;;  %s3915_s4 = sshll.u32 %s4790_s2, 4  ;;  %s3916_s4 = int_to_ptr.vmem [resolvable:$true] %s3915_s4 }
  0x41   :  { %v270_v2 = vld [vmem:[#allocation5 + $0x5c0] sm:$0xff]  ;;  %v3989_v3 = vcombine.high %v142_v0, %v146_v1  ;;  %v3988_v5 = vcombine.low %v142_v0, %v146_v1  ;;  %v4846_v59 = vcombine.high %v4838_v54, %v4838_v54  ;;  %s4753_s19 = scalar_lea.vmem %s3916_s4, 256  ;;  %p4758_p12 = scmp.lt.s32.totalorder %s3916_s4, %s3916_s4 }
  0x42   :  { %v274_v4 = vld [vmem:[#allocation5 + $0x5e0] sm:$0xff]  ;;  %2485 = vmatprep.mubr.bf16.mxu0 %v4842_v58  ;;  %p4754_p11 = scmp.ne.s32.totalorder %s3916_s4, %s4753_s19  ;;  %p4759_p13 = scmp.lt.s32.totalorder %s4753_s19, %s4753_s19 }
  0x43   :  { %v134_v6 = vld [vmem:[#allocation5 + $0x180] sm:$0xff]  ;;  %v4117_v8 = vcombine.high %v270_v2, %v274_v4  ;;  %v4116_v9 = vcombine.low %v270_v2, %v274_v4  ;;  %2453 = vmatprep.subr.bf16.mxu0 %v3989_v3  ;;  %2526 = vmatprep.mubr.bf16.mxu1 %v4846_v59 }
  0x44   :  { %v138_v7 = vld [vmem:[#allocation5 + $0x1a0] sm:$0xff]  ;;  %2454 = vmatpush1.bf16.msra.mxu0 %v3988_v5  ;;  %p4760_p0 = por %p4759_p13, %p4758_p12 }
  0x45   :  { %v3981_v10 = vcombine.high %v134_v6, %v138_v7  ;;  %v262_v11 = vld [vmem:[#allocation5 + $0x580] sm:$0xff]  ;;  %2494 = vmatprep.subr.bf16.mxu1 %v4117_v8  ;;  %v3980_v18 = vcombine.low %v134_v6, %v138_v7 }
  0x46   :  { %v266_v12 = vld [vmem:[#allocation5 + $0x5a0] sm:$0xff]  ;;  %2495 = vmatpush1.bf16.msra.mxu1 %v4116_v9  ;;  %p4761_p1 = pnand %p4760_p0, %p4754_p11 }
  0x47   :  { %v126_v13 = vld [vmem:[#allocation5 + $0x140] sm:$0xff]  ;;  %v4109_v14 = vcombine.high %v262_v11, %v266_v12  ;;  %2455 = vmatprep.subr.bf16.mxu0 %v3981_v10  ;;  %v4108_v19 = vcombine.low %v262_v11, %v266_v12 }
  0x48   :  { %v130_v15 = vld [vmem:[#allocation5 + $0x160] sm:$0xff]  ;;  %2456 = vmatpush1.bf16.msra.mxu0 %v3980_v18 }
  0x49   :  { %v254_v16 = vld [vmem:[#allocation5 + $0x540] sm:$0xff]  ;;  %v3973_v20 = vcombine.high %v126_v13, %v130_v15  ;;  %2496 = vmatprep.subr.bf16.mxu1 %v4109_v14  ;;  %v3972_v26 = vcombine.low %v126_v13, %v130_v15 }
  0x4a   :  { %v258_v17 = vld [vmem:[#allocation5 + $0x560] sm:$0xff]  ;;  %2497 = vmatpush1.bf16.msra.mxu1 %v4108_v19 }
  0x4b   :  { %v4101_v21 = vcombine.high %v254_v16, %v258_v17  ;;  %v118_v22 = vld [vmem:[#allocation5 + $0x100] sm:$0xff]  ;;  %2457 = vmatprep.subr.bf16.mxu0 %v3973_v20  ;;  %v4100_v27 = vcombine.low %v254_v16, %v258_v17 }
  0x4c   :  { %v122_v23 = vld [vmem:[#allocation5 + $0x120] sm:$0xff]  ;;  %2458 = vmatpush1.bf16.msra.mxu0 %v3972_v26 }
  0x4d   :  { %v246_v24 = vld [vmem:[#allocation5 + $0x500] sm:$0xff]  ;;  %v3965_v28 = vcombine.high %v118_v22, %v122_v23  ;;  %2498 = vmatprep.subr.bf16.mxu1 %v4101_v21  ;;  %v3964_v34 = vcombine.low %v118_v22, %v122_v23 }
  0x4e   :  { %v250_v25 = vld [vmem:[#allocation5 + $0x520] sm:$0xff]  ;;  %2499 = vmatpush1.bf16.msra.mxu1 %v4100_v27 }
  0x4f   :  { %v4093_v29 = vcombine.high %v246_v24, %v250_v25  ;;  %v110_v30 = vld [vmem:[#allocation5 + $0xc0] sm:$0xff]  ;;  %2459 = vmatprep.subr.bf16.mxu0 %v3965_v28  ;;  %v4092_v35 = vcombine.low %v246_v24, %v250_v25 }
  0x50   :  { %v114_v31 = vld [vmem:[#allocation5 + $0xe0] sm:$0xff]  ;;  %2460 = vmatpush1.bf16.msra.mxu0 %v3964_v34 }
  0x51   :  { %v238_v32 = vld [vmem:[#allocation5 + $0x4c0] sm:$0xff]  ;;  %v3957_v36 = vcombine.high %v110_v30, %v114_v31  ;;  %2500 = vmatprep.subr.bf16.mxu1 %v4093_v29  ;;  %v3956_v42 = vcombine.low %v110_v30, %v114_v31 }
  0x52   :  { %v242_v33 = vld [vmem:[#allocation5 + $0x4e0] sm:$0xff]  ;;  %2501 = vmatpush1.bf16.msra.mxu1 %v4092_v35 }
  0x53   :  { %v4085_v37 = vcombine.high %v238_v32, %v242_v33  ;;  %v102_v38 = vld [vmem:[#allocation5 + $0x80] sm:$0xff]  ;;  %2461 = vmatprep.subr.bf16.mxu0 %v3957_v36  ;;  %v4084_v43 = vcombine.low %v238_v32, %v242_v33 }
  0x54   :  { %v106_v39 = vld [vmem:[#allocation5 + $0xa0] sm:$0xff]  ;;  %2462 = vmatpush1.bf16.msra.mxu0 %v3956_v42 }
  0x55   :  { %v230_v40 = vld [vmem:[#allocation5 + $0x480] sm:$0xff]  ;;  %v3949_v44 = vcombine.high %v102_v38, %v106_v39  ;;  %2502 = vmatprep.subr.bf16.mxu1 %v4085_v37  ;;  %v3948_v50 = vcombine.low %v102_v38, %v106_v39 }
  0x56   :  { %v234_v41 = vld [vmem:[#allocation5 + $0x4a0] sm:$0xff]  ;;  %2503 = vmatpush1.bf16.msra.mxu1 %v4084_v43 }
  0x57   :  { %v4077_v45 = vcombine.high %v230_v40, %v234_v41  ;;  %v94_v46 = vld [vmem:[#allocation5 + $0x40] sm:$0xff]  ;;  %2463 = vmatprep.subr.bf16.mxu0 %v3949_v44  ;;  %v4076_v51 = vcombine.low %v230_v40, %v234_v41 }
  0x58   :  { %v98_v47 = vld [vmem:[#allocation5 + $0x60] sm:$0xff]  ;;  %2464 = vmatpush1.bf16.msra.mxu0 %v3948_v50 }
  0x59   :  { %v222_v48 = vld [vmem:[#allocation5 + $0x440] sm:$0xff]  ;;  %v3941_v52 = vcombine.high %v94_v46, %v98_v47  ;;  %2504 = vmatprep.subr.bf16.mxu1 %v4077_v45  ;;  %v3940_v62 = vcombine.low %v94_v46, %v98_v47 }
  0x5a   :  { %v226_v49 = vld [vmem:[#allocation5 + $0x460] sm:$0xff]  ;;  %2505 = vmatpush1.bf16.msra.mxu1 %v4076_v51 }
  0x5b   :  { %v4069_v55 = vcombine.high %v222_v48, %v226_v49  ;;  %v86_v56 = vld [vmem:[#allocation5] sm:$0xff]  ;;  %2465 = vmatprep.subr.bf16.mxu0 %v3941_v52  ;;  %v4068_v63 = vcombine.low %v222_v48, %v226_v49 }
  0x5c   :  { %v90_v57 = vld [vmem:[#allocation5 + $0x20] sm:$0xff]  ;;  %2466 = vmatpush1.bf16.msra.mxu0 %v3940_v62 }
  0x5d   :  { %v214_v60 = vld [vmem:[#allocation5 + $0x400] sm:$0xff]  ;;  %v3933_v0 = vcombine.high %v86_v56, %v90_v57  ;;  %2506 = vmatprep.subr.bf16.mxu1 %v4069_v55  ;;  %v3932_v6 = vcombine.low %v86_v56, %v90_v57 }
  0x5e   :  { %v218_v61 = vld [vmem:[#allocation5 + $0x420] sm:$0xff]  ;;  %2507 = vmatpush1.bf16.msra.mxu1 %v4068_v63 }
  0x5f   :  { %v4061_v1 = vcombine.high %v214_v60, %v218_v61  ;;  %v206_v2 = vld [vmem:[#allocation5 + $0x3c0] sm:$0xff]  ;;  %2467 = vmatprep.subr.bf16.mxu0 %v3933_v0  ;;  %v4060_v7 = vcombine.low %v214_v60, %v218_v61 }
  0x60   :  { %v210_v3 = vld [vmem:[#allocation5 + $0x3e0] sm:$0xff]  ;;  %2468 = vmatpush1.bf16.msra.mxu0 %v3932_v6 }
  0x61   :  { %v334_v4 = vld [vmem:[#allocation5 + $0x7c0] sm:$0xff]  ;;  %v4053_v8 = vcombine.high %v206_v2, %v210_v3  ;;  %2508 = vmatprep.subr.bf16.mxu1 %v4061_v1  ;;  %v4052_v14 = vcombine.low %v206_v2, %v210_v3 }
  0x62   :  { %v338_v5 = vld [vmem:[#allocation5 + $0x7e0] sm:$0xff]  ;;  %2509 = vmatpush1.bf16.msra.mxu1 %v4060_v7 }
  0x63   :  { %v4181_v9 = vcombine.high %v334_v4, %v338_v5  ;;  %v198_v10 = vld [vmem:[#allocation5 + $0x380] sm:$0xff]  ;;  %2469 = vmatprep.subr.bf16.mxu0 %v4053_v8  ;;  %v4180_v15 = vcombine.low %v334_v4, %v338_v5  ;;  %v143_v8 = vld [vmem:[#allocation5 + $0x1c8] sm:$0xff] }
  0x64   :  { %v202_v11 = vld [vmem:[#allocation5 + $0x3a0] sm:$0xff]  ;;  %2470 = vmatpush2.bf16.msra.mxu0 %v4052_v14 }
  0x65   :  { %v326_v12 = vld [vmem:[#allocation5 + $0x780] sm:$0xff]  ;;  %v4045_v16 = vcombine.high %v198_v10, %v202_v11  ;;  %2510 = vmatprep.subr.bf16.mxu1 %v4181_v9  ;;  %v4044_v22 = vcombine.low %v198_v10, %v202_v11  ;;  %v147_v9 = vld [vmem:[#allocation5 + $0x1e8] sm:$0xff] }
  0x66   :  { %v330_v13 = vld [vmem:[#allocation5 + $0x7a0] sm:$0xff]  ;;  %2511 = vmatpush2.bf16.msra.mxu1 %v4180_v15 }
  0x67   :  { %v4173_v17 = vcombine.high %v326_v12, %v330_v13  ;;  %v190_v18 = vld [vmem:[#allocation5 + $0x340] sm:$0xff]  ;;  %2471 = vmatprep.subr.bf16.mxu0 %v4045_v16  ;;  %v4172_v23 = vcombine.low %v326_v12, %v330_v13  ;;  %v3991_v13 = vcombine.high %v143_v8, %v147_v9  ;;  %v4852_v16 = vcombine.low %v4836_v53, %v4836_v53 }
  0x68   :  { %v194_v19 = vld [vmem:[#allocation5 + $0x360] sm:$0xff]  ;;  %2472 = vmatpush2.bf16.msra.mxu0 %v4044_v22  ;;  %v3990_v22 = vcombine.low %v143_v8, %v147_v9 }
  0x69   :  { %v318_v20 = vld [vmem:[#allocation5 + $0x740] sm:$0xff]  ;;  %v4037_v24 = vcombine.high %v190_v18, %v194_v19  ;;  %2512 = vmatprep.subr.bf16.mxu1 %v4173_v17  ;;  %v4036_v30 = vcombine.low %v190_v18, %v194_v19  ;;  %v135_v17 = vld [vmem:[#allocation5 + $0x188] sm:$0xff]  ;;  %v4854_v19 = vld [vmem:[#allocation2 + $0x10] sm:$0xff] }
  0x6a   :  { %v322_v21 = vld [vmem:[#allocation5 + $0x760] sm:$0xff]  ;;  %2513 = vmatpush2.bf16.msra.mxu1 %v4172_v23  ;;  %v139_v18 = vld [vmem:[#allocation5 + $0x1a8] sm:$0xff] }
  0x6b   :  { %v4165_v25 = vcombine.high %v318_v20, %v322_v21  ;;  %v182_v26 = vld [vmem:[#allocation5 + $0x300] sm:$0xff]  ;;  %2473 = vmatprep.subr.bf16.mxu0 %v4037_v24  ;;  %v4164_v31 = vcombine.low %v318_v20, %v322_v21  ;;  %v4858_v20 = vcombine.low %v4838_v54, %v4838_v54  ;;  %v3983_v53 = vcombine.high %v135_v17, %v139_v18 }
  0x6c   :  { %v186_v27 = vld [vmem:[#allocation5 + $0x320] sm:$0xff]  ;;  %2474 = vmatpush2.bf16.msra.mxu0 %v4036_v30 }
  0x6d   :  { %v310_v28 = vld [vmem:[#allocation5 + $0x700] sm:$0xff]  ;;  %v4029_v32 = vcombine.high %v182_v26, %v186_v27  ;;  %2514 = vmatprep.subr.bf16.mxu1 %v4165_v25  ;;  %v4028_v38 = vcombine.low %v182_v26, %v186_v27  ;;  %v127_v26 = vld [vmem:[#allocation5 + $0x148] sm:$0xff] }
  0x6e   :  { %v314_v29 = vld [vmem:[#allocation5 + $0x720] sm:$0xff]  ;;  %2515 = vmatpush2.bf16.msra.mxu1 %v4164_v31  ;;  %v131_v27 = vld [vmem:[#allocation5 + $0x168] sm:$0xff] }
  0x6f   :  { %v4157_v33 = vcombine.high %v310_v28, %v314_v29  ;;  %v174_v34 = vld [vmem:[#allocation5 + $0x2c0] sm:$0xff]  ;;  %2475 = vmatprep.subr.bf16.mxu0 %v4029_v32  ;;  %v4156_v39 = vcombine.low %v310_v28, %v314_v29  ;;  %v4862_v28 = vcombine.high %v4854_v19, %v4854_v19  ;;  %v3982_v29 = vcombine.low %v135_v17, %v139_v18 }
  0x70   :  { %v178_v35 = vld [vmem:[#allocation5 + $0x2e0] sm:$0xff]  ;;  %2476 = vmatpush2.bf16.msra.mxu0 %v4028_v38 }
  0x71   :  { %v302_v36 = vld [vmem:[#allocation5 + $0x6c0] sm:$0xff]  ;;  %v4021_v40 = vcombine.high %v174_v34, %v178_v35  ;;  %2516 = vmatprep.subr.bf16.mxu1 %v4157_v33  ;;  %v4020_v46 = vcombine.low %v174_v34, %v178_v35  ;;  %v119_v33 = vld [vmem:[#allocation5 + $0x108] sm:$0xff]  ;;  %v3975_v34 = vcombine.high %v127_v26, %v131_v27 }
  0x72   :  { %v306_v37 = vld [vmem:[#allocation5 + $0x6e0] sm:$0xff]  ;;  %2517 = vmatpush2.bf16.msra.mxu1 %v4156_v39  ;;  %v123_v35 = vld [vmem:[#allocation5 + $0x128] sm:$0xff] }
  0x73   :  { %v4149_v41 = vcombine.high %v302_v36, %v306_v37  ;;  %v166_v42 = vld [vmem:[#allocation5 + $0x280] sm:$0xff]  ;;  %2477 = vmatprep.subr.bf16.mxu0 %v4021_v40  ;;  %v4148_v47 = vcombine.low %v302_v36, %v306_v37  ;;  %v3974_v37 = vcombine.low %v127_v26, %v131_v27  ;;  %v203_v26 = vld [vmem:[#allocation5 + $0x3a8] sm:$0xff] }
  0x74   :  { %v170_v43 = vld [vmem:[#allocation5 + $0x2a0] sm:$0xff]  ;;  %2478 = vmatpush2.bf16.msra.mxu0 %v4020_v46 }
  0x75   :  { %v294_v44 = vld [vmem:[#allocation5 + $0x680] sm:$0xff]  ;;  %v4013_v48 = vcombine.high %v166_v42, %v170_v43  ;;  %2518 = vmatprep.subr.bf16.mxu1 %v4149_v41  ;;  %v4012_v56 = vcombine.low %v166_v42, %v170_v43  ;;  %v111_v41 = vld [vmem:[#allocation5 + $0xc8] sm:$0xff]  ;;  %v3967_v42 = vcombine.high %v119_v33, %v123_v35 }
  0x76   :  { %v298_v45 = vld [vmem:[#allocation5 + $0x6a0] sm:$0xff]  ;;  %2519 = vmatpush2.bf16.msra.mxu1 %v4148_v47  ;;  %v115_v43 = vld [vmem:[#allocation5 + $0xe8] sm:$0xff] }
  0x77   :  { %v4141_v49 = vcombine.high %v294_v44, %v298_v45  ;;  %v158_v50 = vld [vmem:[#allocation5 + $0x240] sm:$0xff]  ;;  %2479 = vmatprep.subr.bf16.mxu0 %v4013_v48  ;;  %v4140_v57 = vcombine.low %v294_v44, %v298_v45  ;;  %v3966_v45 = vcombine.low %v119_v33, %v123_v35  ;;  %v195_v33 = vld [vmem:[#allocation5 + $0x368] sm:$0xff] }
  0x78   :  { %v162_v51 = vld [vmem:[#allocation5 + $0x260] sm:$0xff]  ;;  %2480 = vmatpush2.bf16.msra.mxu0 %v4012_v56 }
  0x79   :  { %v286_v52 = vld [vmem:[#allocation5 + $0x640] sm:$0xff]  ;;  %v4005_v60 = vcombine.high %v158_v50, %v162_v51  ;;  %2520 = vmatprep.subr.bf16.mxu1 %v4141_v49  ;;  %v4004_v2 = vcombine.low %v158_v50, %v162_v51  ;;  %v103_v49 = vld [vmem:[#allocation5 + $0x88] sm:$0xff]  ;;  %v3959_v50 = vcombine.high %v111_v41, %v115_v43 }
  0x7a   :  { %v290_v55 = vld [vmem:[#allocation5 + $0x660] sm:$0xff]  ;;  %2521 = vmatpush2.bf16.msra.mxu1 %v4140_v57  ;;  %v107_v51 = vld [vmem:[#allocation5 + $0xa8] sm:$0xff] }
  0x7b   :  { %v4133_v61 = vcombine.high %v286_v52, %v290_v55  ;;  %v150_v62 = vld [vmem:[#allocation5 + $0x200] sm:$0xff]  ;;  %2481 = vmatprep.subr.bf16.mxu0 %v4005_v60  ;;  %v4132_v3 = vcombine.low %v286_v52, %v290_v55  ;;  %v3958_v55 = vcombine.low %v111_v41, %v115_v43  ;;  %v187_v41 = vld [vmem:[#allocation5 + $0x328] sm:$0xff] }
  0x7c   :  { %v154_v63 = vld [vmem:[#allocation5 + $0x220] sm:$0xff]  ;;  %2482 = vmatpush2.bf16.msra.mxu0 %v4004_v2 }
  0x7d   :  { %v278_v0 = vld [vmem:[#allocation5 + $0x600] sm:$0xff]  ;;  %v3997_v4 = vcombine.high %v150_v62, %v154_v63  ;;  %2522 = vmatprep.subr.bf16.mxu1 %v4133_v61  ;;  %v3996_v10 = vcombine.low %v150_v62, %v154_v63  ;;  %v95_v61 = vld [vmem:[#allocation5 + $0x48] sm:$0xff]  ;;  %v3951_v62 = vcombine.high %v103_v49, %v107_v51 }
  0x7e   :  { %v282_v1 = vld [vmem:[#allocation5 + $0x620] sm:$0xff]  ;;  %2523 = vmatpush2.bf16.msra.mxu1 %v4132_v3  ;;  %v99_v63 = vld [vmem:[#allocation5 + $0x68] sm:$0xff] }
  0x7f   :  { %v4125_v5 = vcombine.high %v278_v0, %v282_v1  ;;  %v398_v6 = vld [vmem:[#allocation5 + $0x9c0] sm:$0xff]  ;;  %2483 = vmatprep.subr.bf16.mxu0 %v3997_v4  ;;  %v4124_v11 = vcombine.low %v278_v0, %v282_v1  ;;  %v3950_v1 = vcombine.low %v103_v49, %v107_v51  ;;  %v3942_v9 = vcombine.low %v95_v61, %v99_v63  ;;  %v179_v49 = vld [vmem:[#allocation5 + $0x2e8] sm:$0xff] }
  0x80   :  { %v402_v7 = vld [vmem:[#allocation5 + $0x9e0] sm:$0xff]  ;;  %2484 = vmatpush2.bf16.msra.mxu0 %v3996_v10 }
  0x81   :  { %v4245_v12 = vcombine.high %v398_v6, %v402_v7  ;;  %2524 = vmatprep.subr.bf16.mxu1 %v4125_v5  ;;  %v390_v14 = vld [vmem:[#allocation5 + $0x980] sm:$0xff]  ;;  %v4244_v21 = vcombine.low %v398_v6, %v402_v7  ;;  %v87_v5 = vld [vmem:[#allocation5 + $0x8] sm:$0xff]  ;;  %v3943_v6 = vcombine.high %v95_v61, %v99_v63 }
  0x82   :  { %v394_v15 = vld [vmem:[#allocation5 + $0x9a0] sm:$0xff]  ;;  %2525 = vmatpush2.bf16.msra.mxu1 %v4124_v11  ;;  %v91_v7 = vld [vmem:[#allocation5 + $0x28] sm:$0xff] }
  0x83   :  { %2535 = vmatprep.subr.bf16.mxu0 %v4245_v12  ;;  %v4237_v23 = vcombine.high %v390_v14, %v394_v15  ;;  %v382_v24 = vld [vmem:[#allocation5 + $0x940] sm:$0xff]  ;;  %2576 = vmatprep.subr.bf16.mxu1 %v3991_v13  ;;  %v4236_v54 = vcombine.low %v390_v14, %v394_v15  ;;  %v207_v13 = vld [vmem:[#allocation5 + $0x3c8] sm:$0xff]  ;;  %v3935_v14 = vcombine.high %v87_v5, %v91_v7 }
  0x84   :  { %v386_v25 = vld [vmem:[#allocation5 + $0x960] sm:$0xff]  ;;  %2486 = vmatmul.mubr.bf16.vlgmr.msra.gmra.mxu0 %v4852_v16  ;;  %v211_v15 = vld [vmem:[#allocation5 + $0x3e8] sm:$0xff]  ;;  %v3934_v18 = vcombine.low %v87_v5, %v91_v7 }
  0x85   :  { %2527 = vmatmul.mubr.bf16.vlgmr.msra.gmra.mxu1 %v4858_v20  ;;  %2536 = vmatpush1.bf16.msra.mxu0 %v4244_v21  ;;  %v4229_v30 = vcombine.high %v382_v24, %v386_v25  ;;  %v374_v31 = vld [vmem:[#allocation5 + $0x900] sm:$0xff]  ;;  %v4228_v36 = vcombine.low %v382_v24, %v386_v25  ;;  %v199_v24 = vld [vmem:[#allocation5 + $0x388] sm:$0xff]  ;;  %v4055_v25 = vcombine.high %v207_v13, %v211_v15 }
  0x86   :  { %2577 = vmatpush1.bf16.msra.mxu1 %v3990_v22  ;;  %2537 = vmatprep.subr.bf16.mxu0 %v4237_v23  ;;  %v378_v32 = vld [vmem:[#allocation5 + $0x920] sm:$0xff]  ;;  %v4054_v27 = vcombine.low %v207_v13, %v211_v15  ;;  %v4046_v35 = vcombine.low %v199_v24, %v203_v26  ;;  %v171_v61 = vld [vmem:[#allocation5 + $0x2a8] sm:$0xff] }
  0x87   :  { %2578 = vmatprep.subr.bf16.mxu1 %v3983_v53  ;;  %2567 = vmatprep.mubr.bf16.mxu0 %v4862_v28  ;;  %v4221_v38 = vcombine.high %v374_v31, %v378_v32  ;;  %v366_v39 = vld [vmem:[#allocation5 + $0x8c0] sm:$0xff]  ;;  %v4220_v44 = vcombine.low %v374_v31, %v378_v32  ;;  %v191_v31 = vld [vmem:[#allocation5 + $0x348] sm:$0xff]  ;;  %v4047_v32 = vcombine.high %v199_v24, %v203_v26 }
  0x88   :  { %2608 = vmatprep.mubr.bf16.mxu1 %v4842_v58  ;;  %v370_v40 = vld [vmem:[#allocation5 + $0x8e0] sm:$0xff]  ;;  %v4038_v43 = vcombine.low %v191_v31, %v195_v33  ;;  %v163_v5 = vld [vmem:[#allocation5 + $0x268] sm:$0xff] }
  0x89   :  { %2538 = vmatpush1.bf16.msra.mxu0 %v4236_v54  ;;  %v4213_v46 = vcombine.high %v366_v39, %v370_v40  ;;  %v358_v47 = vld [vmem:[#allocation5 + $0x880] sm:$0xff]  ;;  %v4212_v52 = vcombine.low %v366_v39, %v370_v40  ;;  %v183_v39 = vld [vmem:[#allocation5 + $0x308] sm:$0xff]  ;;  %v4039_v40 = vcombine.high %v191_v31, %v195_v33 }
  0x8a   :  { %2579 = vmatpush1.bf16.msra.mxu1 %v3982_v29  ;;  %2539 = vmatprep.subr.bf16.mxu0 %v4229_v30  ;;  %v362_v48 = vld [vmem:[#allocation5 + $0x8a0] sm:$0xff]  ;;  %v4030_v51 = vcombine.low %v183_v39, %v187_v41  ;;  %v155_v13 = vld [vmem:[#allocation5 + $0x228] sm:$0xff] }
  0x8b   :  { %2580 = vmatprep.subr.bf16.mxu1 %v3975_v34  ;;  %v4205_v56 = vcombine.high %v358_v47, %v362_v48  ;;  %v350_v57 = vld [vmem:[#allocation5 + $0x840] sm:$0xff]  ;;  %v4204_v0 = vcombine.low %v358_v47, %v362_v48  ;;  %v175_v47 = vld [vmem:[#allocation5 + $0x2c8] sm:$0xff]  ;;  %v4031_v48 = vcombine.high %v183_v39, %v187_v41 }
  0x8c   :  { %v354_v60 = vld [vmem:[#allocation5 + $0x860] sm:$0xff]  ;;  %v4022_v63 = vcombine.low %v175_v47, %v179_v49  ;;  %v403_v24 = vld [vmem:[#allocation5 + $0x9e8] sm:$0xff] }
  0x8d   :  { %2540 = vmatpush1.bf16.msra.mxu0 %v4228_v36  ;;  %v4197_v2 = vcombine.high %v350_v57, %v354_v60  ;;  %v342_v3 = vld [vmem:[#allocation5 + $0x800] sm:$0xff]  ;;  %v4196_v8 = vcombine.low %v350_v57, %v354_v60  ;;  %v167_v57 = vld [vmem:[#allocation5 + $0x288] sm:$0xff]  ;;  %v4023_v60 = vcombine.high %v175_v47, %v179_v49 }
  0x8e   :  { %2581 = vmatpush1.bf16.msra.mxu1 %v3974_v37  ;;  %2541 = vmatprep.subr.bf16.mxu0 %v4221_v38  ;;  %v346_v4 = vld [vmem:[#allocation5 + $0x820] sm:$0xff]  ;;  %v4014_v7 = vcombine.low %v167_v57, %v171_v61  ;;  %v395_v31 = vld [vmem:[#allocation5 + $0x9a8] sm:$0xff] }
  0x8f   :  { %2582 = vmatprep.subr.bf16.mxu1 %v3967_v42  ;;  %v4189_v10 = vcombine.high %v342_v3, %v346_v4  ;;  %v462_v11 = vld [vmem:[#allocation5 + $0xbc0] sm:$0xff]  ;;  %v4188_v17 = vcombine.low %v342_v3, %v346_v4  ;;  %v159_v3 = vld [vmem:[#allocation5 + $0x248] sm:$0xff]  ;;  %v4015_v4 = vcombine.high %v167_v57, %v171_v61 }
  0x90   :  { %v466_v12 = vld [vmem:[#allocation5 + $0xbe0] sm:$0xff]  ;;  %v4006_v15 = vcombine.low %v159_v3, %v163_v5  ;;  %v383_v39 = vld [vmem:[#allocation5 + $0x948] sm:$0xff] }
  0x91   :  { %2542 = vmatpush1.bf16.msra.mxu0 %v4220_v44  ;;  %v4309_v21 = vcombine.high %v462_v11, %v466_v12  ;;  %v454_v22 = vld [vmem:[#allocation5 + $0xb80] sm:$0xff]  ;;  %v4308_v53 = vcombine.low %v462_v11, %v466_v12  ;;  %v151_v11 = vld [vmem:[#allocation5 + $0x208] sm:$0xff]  ;;  %v4007_v12 = vcombine.high %v159_v3, %v163_v5 }
  0x92   :  { %2583 = vmatpush1.bf16.msra.mxu1 %v3966_v45  ;;  %2543 = vmatprep.subr.bf16.mxu0 %v4213_v46  ;;  %v458_v23 = vld [vmem:[#allocation5 + $0xba0] sm:$0xff]  ;;  %v3998_v26 = vcombine.low %v151_v11, %v155_v13  ;;  %v379_v47 = vld [vmem:[#allocation5 + $0x928] sm:$0xff] }
  0x93   :  { %2584 = vmatprep.subr.bf16.mxu1 %v3959_v50  ;;  %v4301_v54 = vcombine.high %v454_v22, %v458_v23  ;;  %v446_v29 = vld [vmem:[#allocation5 + $0xb40] sm:$0xff]  ;;  %v4300_v34 = vcombine.low %v454_v22, %v458_v23  ;;  %v399_v22 = vld [vmem:[#allocation5 + $0x9c8] sm:$0xff]  ;;  %v3999_v23 = vcombine.high %v151_v11, %v155_v13 }
  0x94   :  { %v450_v30 = vld [vmem:[#allocation5 + $0xb60] sm:$0xff]  ;;  %v371_v57 = vld [vmem:[#allocation5 + $0x8e8] sm:$0xff] }
  0x95   :  { %2544 = vmatpush1.bf16.msra.mxu0 %v4212_v52  ;;  %v4293_v36 = vcombine.high %v446_v29, %v450_v30  ;;  %v438_v37 = vld [vmem:[#allocation5 + $0xb00] sm:$0xff]  ;;  %v4292_v42 = vcombine.low %v446_v29, %v450_v30  ;;  %v391_v29 = vld [vmem:[#allocation5 + $0x988] sm:$0xff]  ;;  %v4247_v30 = vcombine.high %v399_v22, %v403_v24 }
  0x96   :  { %2585 = vmatpush1.bf16.msra.mxu1 %v3958_v55  ;;  %2545 = vmatprep.subr.bf16.mxu0 %v4205_v56  ;;  %v442_v38 = vld [vmem:[#allocation5 + $0xb20] sm:$0xff]  ;;  %v363_v3 = vld [vmem:[#allocation5 + $0x8a8] sm:$0xff] }
  0x97   :  { %2586 = vmatprep.subr.bf16.mxu1 %v3951_v62  ;;  %v4285_v44 = vcombine.high %v438_v37, %v442_v38  ;;  %v430_v45 = vld [vmem:[#allocation5 + $0xac0] sm:$0xff]  ;;  %v4284_v50 = vcombine.low %v438_v37, %v442_v38  ;;  %v255_v37 = vld [vmem:[#allocation5 + $0x548] sm:$0xff] }
  0x98   :  { %v434_v46 = vld [vmem:[#allocation5 + $0xae0] sm:$0xff]  ;;  %v259_v38 = vld [vmem:[#allocation5 + $0x568] sm:$0xff] }
  0x99   :  { %2546 = vmatpush1.bf16.msra.mxu0 %v4204_v0  ;;  %v4277_v52 = vcombine.high %v430_v45, %v434_v46  ;;  %v422_v55 = vld [vmem:[#allocation5 + $0xa80] sm:$0xff]  ;;  %v4276_v62 = vcombine.low %v430_v45, %v434_v46  ;;  %v251_v45 = vld [vmem:[#allocation5 + $0x528] sm:$0xff] }
  0x9a   :  { %2587 = vmatpush1.bf16.msra.mxu1 %v3950_v1  ;;  %2547 = vmatprep.subr.bf16.mxu0 %v4197_v2  ;;  %v426_v56 = vld [vmem:[#allocation5 + $0xaa0] sm:$0xff]  ;;  %v375_v46 = vld [vmem:[#allocation5 + $0x908] sm:$0xff] }
  0x9b   :  { %2588 = vmatprep.subr.bf16.mxu1 %v3943_v6  ;;  %v4269_v0 = vcombine.high %v422_v55, %v426_v56  ;;  %v414_v1 = vld [vmem:[#allocation5 + $0xa40] sm:$0xff]  ;;  %v4268_v6 = vcombine.low %v422_v55, %v426_v56  ;;  %v243_v55 = vld [vmem:[#allocation5 + $0x4e8] sm:$0xff]  ;;  %v4222_v61 = vcombine.low %v375_v46, %v379_v47 }
  0x9c   :  { %v418_v2 = vld [vmem:[#allocation5 + $0xa60] sm:$0xff]  ;;  %v367_v56 = vld [vmem:[#allocation5 + $0x8c8] sm:$0xff] }
  0x9d   :  { %2548 = vmatpush1.bf16.msra.mxu0 %v4196_v8  ;;  %v4261_v8 = vcombine.high %v414_v1, %v418_v2  ;;  %v4214_v5 = vcombine.low %v367_v56, %v371_v57  ;;  %v355_v11 = vld [vmem:[#allocation5 + $0x868] sm:$0xff] }
  0x9e   :  { %2589 = vmatpush1.bf16.msra.mxu1 %v3942_v9  ;;  %2549 = vmatprep.subr.bf16.mxu0 %v4189_v10  ;;  %v406_v9 = vld [vmem:[#allocation5 + $0xa00] sm:$0xff] }
  0x9f   :  { %2590 = vmatprep.subr.bf16.mxu1 %v3935_v14  ;;  %v410_v10 = vld [vmem:[#allocation5 + $0xa20] sm:$0xff]  ;;  %v4260_v14 = vcombine.low %v414_v1, %v418_v2  ;;  %v235_v1 = vld [vmem:[#allocation5 + $0x4a8] sm:$0xff] }
  0xa0   :  { %v359_v2 = vld [vmem:[#allocation5 + $0x888] sm:$0xff] }
  0xa1   :  { %2550 = vmatpush1.bf16.msra.mxu0 %v4188_v17  ;;  %v4253_v17 = vcombine.high %v406_v9, %v410_v10  ;;  %v4206_v13 = vcombine.low %v359_v2, %v363_v3 }
  0xa2   :  { %2591 = vmatpush1.bf16.msra.mxu1 %v3934_v18  ;;  %2551 = vmatprep.subr.bf16.mxu0 %v4309_v21  ;;  %v271_v18 = vld [vmem:[#allocation5 + $0x5c8] sm:$0xff] }
  0xa3   :  { %2592 = vmatprep.subr.bf16.mxu1 %v4055_v25  ;;  %v275_v21 = vld [vmem:[#allocation5 + $0x5e8] sm:$0xff]  ;;  %v4252_v25 = vcombine.low %v406_v9, %v410_v10 }
  0xa4   :  { %v4118_v33 = vcombine.low %v271_v18, %v275_v21  ;;  %v227_v9 = vld [vmem:[#allocation5 + $0x468] sm:$0xff] }
  0xa5   :  { %2552 = vmatpush2.bf16.msra.mxu0 %v4308_v53  ;;  %v4119_v53 = vcombine.high %v271_v18, %v275_v21  ;;  %v351_v10 = vld [vmem:[#allocation5 + $0x848] sm:$0xff] }
  0xa6   :  { %2593 = vmatpush2.bf16.msra.mxu1 %v4054_v27  ;;  %2553 = vmatprep.subr.bf16.mxu0 %v4301_v54  ;;  %v263_v27 = vld [vmem:[#allocation5 + $0x588] sm:$0xff] }
  0xa7   :  { %2594 = vmatprep.subr.bf16.mxu1 %v4047_v32  ;;  %v267_v54 = vld [vmem:[#allocation5 + $0x5a8] sm:$0xff]  ;;  %v4870_v32 = vcombine.low %v4854_v19, %v4854_v19  ;;  %v4238_v19 = vcombine.low %v391_v29, %v395_v31 }
  0xa8   :  { %v4110_v41 = vcombine.low %v263_v27, %v267_v54  ;;  %v219_v18 = vld [vmem:[#allocation5 + $0x428] sm:$0xff] }
  0xa9   :  { %2554 = vmatpush2.bf16.msra.mxu0 %v4300_v34  ;;  %v4246_v34 = vcombine.low %v399_v22, %v403_v24  ;;  %v343_v21 = vld [vmem:[#allocation5 + $0x808] sm:$0xff]  ;;  %v4198_v24 = vcombine.low %v351_v10, %v355_v11 }
  0xaa   :  { %2595 = vmatpush2.bf16.msra.mxu1 %v4046_v35  ;;  %2555 = vmatprep.subr.bf16.mxu0 %v4293_v36  ;;  %v4111_v35 = vcombine.high %v263_v27, %v267_v54  ;;  %v4239_v36 = vcombine.high %v391_v29, %v395_v31  ;;  %v347_v22 = vld [vmem:[#allocation5 + $0x828] sm:$0xff] }
  0xab   :  { %2596 = vmatprep.subr.bf16.mxu1 %v4039_v40  ;;  %v387_v40 = vld [vmem:[#allocation5 + $0x968] sm:$0xff]  ;;  %v4190_v31 = vcombine.low %v343_v21, %v347_v22 }
  0xac   :  { %v4230_v49 = vcombine.low %v383_v39, %v387_v40  ;;  %v339_v27 = vld [vmem:[#allocation5 + $0x7e8] sm:$0xff] }
  0xad   :  { %2556 = vmatpush2.bf16.msra.mxu0 %v4292_v42  ;;  %v4103_v42 = vcombine.high %v255_v37, %v259_v38  ;;  %v463_v54 = vld [vmem:[#allocation5 + $0xbc8] sm:$0xff] }
  0xae   :  { %2597 = vmatpush2.bf16.msra.mxu1 %v4038_v43  ;;  %2557 = vmatprep.subr.bf16.mxu0 %v4285_v44  ;;  %v4231_v43 = vcombine.high %v383_v39, %v387_v40  ;;  %v247_v44 = vld [vmem:[#allocation5 + $0x508] sm:$0xff] }
  0xaf   :  { %2598 = vmatprep.subr.bf16.mxu1 %v4031_v48  ;;  %v4102_v48 = vcombine.low %v255_v37, %v259_v38  ;;  %v467_v29 = vld [vmem:[#allocation5 + $0xbe8] sm:$0xff] }
  0xb0   :  { %v455_v37 = vld [vmem:[#allocation5 + $0xb88] sm:$0xff]  ;;  %v4310_v40 = vcombine.low %v463_v54, %v467_v29 }
  0xb1   :  { %2558 = vmatpush2.bf16.msra.mxu0 %v4284_v50  ;;  %v4095_v50 = vcombine.high %v247_v44, %v251_v45  ;;  %v459_v38 = vld [vmem:[#allocation5 + $0xba8] sm:$0xff] }
  0xb2   :  { %2599 = vmatpush2.bf16.msra.mxu1 %v4030_v51  ;;  %2559 = vmatprep.subr.bf16.mxu0 %v4277_v52  ;;  %v4223_v51 = vcombine.high %v375_v46, %v379_v47  ;;  %v239_v52 = vld [vmem:[#allocation5 + $0x4c8] sm:$0xff]  ;;  %v4302_v47 = vcombine.low %v455_v37, %v459_v38 }
  0xb3   :  { %2600 = vmatprep.subr.bf16.mxu1 %v4023_v60  ;;  %v4094_v60 = vcombine.low %v247_v44, %v251_v45  ;;  %v447_v44 = vld [vmem:[#allocation5 + $0xb48] sm:$0xff] }
  0xb4   :  { %v451_v45 = vld [vmem:[#allocation5 + $0xb68] sm:$0xff] }
  0xb5   :  { %2560 = vmatpush2.bf16.msra.mxu0 %v4276_v62  ;;  %v4087_v62 = vcombine.high %v239_v52, %v243_v55 }
  0xb6   :  { %2601 = vmatpush2.bf16.msra.mxu1 %v4022_v63  ;;  %2561 = vmatprep.subr.bf16.mxu0 %v4269_v0  ;;  %v4215_v63 = vcombine.high %v367_v56, %v371_v57  ;;  %v231_v0 = vld [vmem:[#allocation5 + $0x488] sm:$0xff]  ;;  %v4294_v57 = vcombine.low %v447_v44, %v451_v45 }
  0xb7   :  { %2602 = vmatprep.subr.bf16.mxu1 %v4015_v4  ;;  %v4086_v4 = vcombine.low %v239_v52, %v243_v55  ;;  %v439_v52 = vld [vmem:[#allocation5 + $0xb08] sm:$0xff] }
  0xb8   :  { %v443_v55 = vld [vmem:[#allocation5 + $0xb28] sm:$0xff] }
  0xb9   :  { %2562 = vmatpush2.bf16.msra.mxu0 %v4268_v6  ;;  %v4079_v6 = vcombine.high %v231_v0, %v235_v1 }
  0xba   :  { %2603 = vmatpush2.bf16.msra.mxu1 %v4014_v7  ;;  %2563 = vmatprep.subr.bf16.mxu0 %v4261_v8  ;;  %v4207_v7 = vcombine.high %v359_v2, %v363_v3  ;;  %v223_v8 = vld [vmem:[#allocation5 + $0x448] sm:$0xff]  ;;  %v4286_v3 = vcombine.low %v439_v52, %v443_v55 }
  0xbb   :  { %2604 = vmatprep.subr.bf16.mxu1 %v4007_v12  ;;  %v4078_v12 = vcombine.low %v231_v0, %v235_v1  ;;  %v431_v0 = vld [vmem:[#allocation5 + $0xac8] sm:$0xff] }
  0xbc   :  { %v435_v1 = vld [vmem:[#allocation5 + $0xae8] sm:$0xff] }
  0xbd   :  { %2564 = vmatpush2.bf16.msra.mxu0 %v4260_v14  ;;  %v4071_v14 = vcombine.high %v223_v8, %v227_v9 }
  0xbe   :  { %2605 = vmatpush2.bf16.msra.mxu1 %v4006_v15  ;;  %2565 = vmatprep.subr.bf16.mxu0 %v4253_v17  ;;  %v4199_v15 = vcombine.high %v351_v10, %v355_v11  ;;  %v215_v17 = vld [vmem:[#allocation5 + $0x408] sm:$0xff]  ;;  %v4278_v11 = vcombine.low %v431_v0, %v435_v1 }
  0xbf   :  { %2606 = vmatprep.subr.bf16.mxu1 %v3999_v23  ;;  %v4070_v23 = vcombine.low %v223_v8, %v227_v9  ;;  %v423_v8 = vld [vmem:[#allocation5 + $0xa88] sm:$0xff] }
  0xc0   :  { %v427_v9 = vld [vmem:[#allocation5 + $0xaa8] sm:$0xff] }
  0xc1   :  { %2566 = vmatpush2.bf16.msra.mxu0 %v4252_v25  ;;  %v4063_v25 = vcombine.high %v215_v17, %v219_v18 }
  0xc2   :  { %2607 = vmatpush2.bf16.msra.mxu1 %v3998_v26  ;;  %2617 = vmatprep.subr.bf16.mxu0 %v4119_v53  ;;  %v4191_v26 = vcombine.high %v343_v21, %v347_v22  ;;  %v335_v53 = vld [vmem:[#allocation5 + $0x7c8] sm:$0xff]  ;;  %v4270_v22 = vcombine.low %v423_v8, %v427_v9 }
  0xc3   :  { %2658 = vmatprep.subr.bf16.mxu1 %v4247_v30  ;;  %v4062_v30 = vcombine.low %v215_v17, %v219_v18  ;;  %v4182_v39 = vcombine.low %v335_v53, %v339_v27  ;;  %v415_v17 = vld [vmem:[#allocation5 + $0xa48] sm:$0xff] }
  0xc4   :  { %2568 = vmatmul.mubr.bf16.vlgmr.msra.gmra.mxu0 %v4870_v32  ;;  %v419_v18 = vld [vmem:[#allocation5 + $0xa68] sm:$0xff] }
  0xc5   :  { %2609 = vmatmul.mubr.bf16.vlgmr.msra.gmra.mxu1 %v4852_v16  ;;  %2618 = vmatpush1.bf16.msra.mxu0 %v4118_v33  ;;  %v4183_v33 = vcombine.high %v335_v53, %v339_v27  ;;  %v407_v53 = vld [vmem:[#allocation5 + $0xa08] sm:$0xff] }
  0xc6   :  { %2659 = vmatpush1.bf16.msra.mxu1 %v4246_v34  ;;  %2619 = vmatprep.subr.bf16.mxu0 %v4111_v35  ;;  %v4311_v34 = vcombine.high %v463_v54, %v467_v29  ;;  %v327_v35 = vld [vmem:[#allocation5 + $0x788] sm:$0xff]  ;;  %v4262_v29 = vcombine.low %v415_v17, %v419_v18 }
  0xc7   :  { %2660 = vmatprep.subr.bf16.mxu1 %v4239_v36  ;;  %2649 = vmatprep.mubr.bf16.mxu0 %v4846_v59  ;;  %v331_v36 = vld [vmem:[#allocation5 + $0x7a8] sm:$0xff] }
  0xc8   :  { %2690 = vmatprep.mubr.bf16.mxu1 %v4862_v28  ;;  %v4174_v46 = vcombine.low %v327_v35, %v331_v36  ;;  %v411_v27 = vld [vmem:[#allocation5 + $0xa28] sm:$0xff] }
  0xc9   :  { %2620 = vmatpush1.bf16.msra.mxu0 %v4110_v41  ;;  %v4175_v41 = vcombine.high %v327_v35, %v331_v36  ;;  %v272_v35 = vld [vmem:[#allocation5 + $0x5d0] sm:$0xff] }
  0xca   :  { %2661 = vmatpush1.bf16.msra.mxu1 %v4238_v19  ;;  %2621 = vmatprep.subr.bf16.mxu0 %v4103_v42  ;;  %v4303_v19 = vcombine.high %v455_v37, %v459_v38  ;;  %v319_v42 = vld [vmem:[#allocation5 + $0x748] sm:$0xff]  ;;  %v276_v36 = vld [vmem:[#allocation5 + $0x5f0] sm:$0xff]  ;;  %v4254_v38 = vcombine.low %v407_v53, %v411_v27 }
  0xcb   :  { %2662 = vmatprep.subr.bf16.mxu1 %v4231_v43  ;;  %v323_v43 = vld [vmem:[#allocation5 + $0x768] sm:$0xff] }
  0xcc   :  { %v4166_v56 = vcombine.low %v319_v42, %v323_v43 }
  0xcd   :  { %2622 = vmatpush1.bf16.msra.mxu0 %v4102_v48  ;;  %v4167_v48 = vcombine.high %v319_v42, %v323_v43  ;;  %v264_v42 = vld [vmem:[#allocation5 + $0x590] sm:$0xff] }
  0xce   :  { %2663 = vmatpush1.bf16.msra.mxu1 %v4230_v49  ;;  %2623 = vmatprep.subr.bf16.mxu0 %v4095_v50  ;;  %v4295_v49 = vcombine.high %v447_v44, %v451_v45  ;;  %v311_v50 = vld [vmem:[#allocation5 + $0x708] sm:$0xff]  ;;  %v268_v43 = vld [vmem:[#allocation5 + $0x5b0] sm:$0xff]  ;;  %v4120_v45 = vcombine.low %v272_v35, %v276_v36 }
  0xcf   :  { %2664 = vmatprep.subr.bf16.mxu1 %v4223_v51  ;;  %v315_v51 = vld [vmem:[#allocation5 + $0x728] sm:$0xff] }
  0xd0   :  { %v4158_v2 = vcombine.low %v311_v50, %v315_v51 }
  0xd1   :  { %2624 = vmatpush1.bf16.msra.mxu0 %v4094_v60  ;;  %v4159_v60 = vcombine.high %v311_v50, %v315_v51  ;;  %v256_v50 = vld [vmem:[#allocation5 + $0x550] sm:$0xff] }
  0xd2   :  { %2665 = vmatpush1.bf16.msra.mxu1 %v4222_v61  ;;  %2625 = vmatprep.subr.bf16.mxu0 %v4087_v62  ;;  %v4287_v61 = vcombine.high %v439_v52, %v443_v55  ;;  %v303_v62 = vld [vmem:[#allocation5 + $0x6c8] sm:$0xff]  ;;  %v260_v51 = vld [vmem:[#allocation5 + $0x570] sm:$0xff]  ;;  %v4112_v55 = vcombine.low %v264_v42, %v268_v43 }
  0xd3   :  { %2666 = vmatprep.subr.bf16.mxu1 %v4215_v63  ;;  %v307_v63 = vld [vmem:[#allocation5 + $0x6e8] sm:$0xff] }
  0xd4   :  { %v4150_v10 = vcombine.low %v303_v62, %v307_v63 }
  0xd5   :  { %2626 = vmatpush1.bf16.msra.mxu0 %v4086_v4  ;;  %v4151_v4 = vcombine.high %v303_v62, %v307_v63  ;;  %v248_v62 = vld [vmem:[#allocation5 + $0x510] sm:$0xff] }
  0xd6   :  { %2667 = vmatpush1.bf16.msra.mxu1 %v4214_v5  ;;  %2627 = vmatprep.subr.bf16.mxu0 %v4079_v6  ;;  %v4279_v5 = vcombine.high %v431_v0, %v435_v1  ;;  %v295_v6 = vld [vmem:[#allocation5 + $0x688] sm:$0xff]  ;;  %v252_v63 = vld [vmem:[#allocation5 + $0x530] sm:$0xff]  ;;  %v4104_v1 = vcombine.low %v256_v50, %v260_v51 }
  0xd7   :  { %2668 = vmatprep.subr.bf16.mxu1 %v4207_v7  ;;  %v299_v7 = vld [vmem:[#allocation5 + $0x6a8] sm:$0xff] }
  0xd8   :  { %v4142_v21 = vcombine.low %v295_v6, %v299_v7 }
  0xd9   :  { %2628 = vmatpush1.bf16.msra.mxu0 %v4078_v12  ;;  %v4143_v12 = vcombine.high %v295_v6, %v299_v7  ;;  %v240_v6 = vld [vmem:[#allocation5 + $0x4d0] sm:$0xff] }
  0xda   :  { %2669 = vmatpush1.bf16.msra.mxu1 %v4206_v13  ;;  %2629 = vmatprep.subr.bf16.mxu0 %v4071_v14  ;;  %v4271_v13 = vcombine.high %v423_v8, %v427_v9  ;;  %v287_v14 = vld [vmem:[#allocation5 + $0x648] sm:$0xff]  ;;  %v244_v7 = vld [vmem:[#allocation5 + $0x4f0] sm:$0xff]  ;;  %v4096_v9 = vcombine.low %v248_v62, %v252_v63 }
  0xdb   :  { %2670 = vmatprep.subr.bf16.mxu1 %v4199_v15  ;;  %v291_v15 = vld [vmem:[#allocation5 + $0x668] sm:$0xff] }
  0xdc   :  { %v4134_v54 = vcombine.low %v287_v14, %v291_v15 }
  0xdd   :  { %2630 = vmatpush1.bf16.msra.mxu0 %v4070_v23  ;;  %v4135_v23 = vcombine.high %v287_v14, %v291_v15  ;;  %v232_v14 = vld [vmem:[#allocation5 + $0x490] sm:$0xff] }
  0xde   :  { %2671 = vmatpush1.bf16.msra.mxu1 %v4198_v24  ;;  %2631 = vmatprep.subr.bf16.mxu0 %v4063_v25  ;;  %v4263_v24 = vcombine.high %v415_v17, %v419_v18  ;;  %v279_v25 = vld [vmem:[#allocation5 + $0x608] sm:$0xff]  ;;  %v236_v15 = vld [vmem:[#allocation5 + $0x4b0] sm:$0xff]  ;;  %v4088_v18 = vcombine.low %v240_v6, %v244_v7 }
  0xdf   :  { %2672 = vmatprep.subr.bf16.mxu1 %v4191_v26  ;;  %v283_v26 = vld [vmem:[#allocation5 + $0x628] sm:$0xff] }
  0xe0   :  { %v4126_v37 = vcombine.low %v279_v25, %v283_v26 }
  0xe1   :  { %2632 = vmatpush1.bf16.msra.mxu0 %v4062_v30  ;;  %v4127_v30 = vcombine.high %v279_v25, %v283_v26  ;;  %v224_v25 = vld [vmem:[#allocation5 + $0x450] sm:$0xff] }
  0xe2   :  { %2673 = vmatpush1.bf16.msra.mxu1 %v4190_v31  ;;  %2633 = vmatprep.subr.bf16.mxu0 %v4183_v33  ;;  %v4255_v31 = vcombine.high %v407_v53, %v411_v27  ;;  %v144_v33 = vld [vmem:[#allocation5 + $0x1d0] sm:$0xff]  ;;  %v4080_v27 = vcombine.low %v232_v14, %v236_v15 }
  0xe3   :  { %2674 = vmatprep.subr.bf16.mxu1 %v4311_v34  ;;  %v148_v34 = vld [vmem:[#allocation5 + $0x1f0] sm:$0xff] }
  0xe4   :  { %v3992_v44 = vcombine.low %v144_v33, %v148_v34  ;;  %v228_v26 = vld [vmem:[#allocation5 + $0x470] sm:$0xff] }
  0xe5   :  { %2634 = vmatpush2.bf16.msra.mxu0 %v4182_v39  ;;  %v3993_v39 = vcombine.high %v144_v33, %v148_v34  ;;  %v216_v33 = vld [vmem:[#allocation5 + $0x410] sm:$0xff] }
  0xe6   :  { %2675 = vmatpush2.bf16.msra.mxu1 %v4310_v40  ;;  %2635 = vmatprep.subr.bf16.mxu0 %v4175_v41  ;;  %v4121_v40 = vcombine.high %v272_v35, %v276_v36  ;;  %v136_v41 = vld [vmem:[#allocation5 + $0x190] sm:$0xff]  ;;  %v4072_v36 = vcombine.low %v224_v25, %v228_v26 }
  0xe7   :  { %2676 = vmatprep.subr.bf16.mxu1 %v4303_v19  ;;  %v140_v19 = vld [vmem:[#allocation5 + $0x1b0] sm:$0xff] }
  0xe8   :  { %v3984_v52 = vcombine.low %v136_v41, %v140_v19  ;;  %v220_v34 = vld [vmem:[#allocation5 + $0x430] sm:$0xff] }
  0xe9   :  { %2636 = vmatpush2.bf16.msra.mxu0 %v4174_v46  ;;  %v3985_v46 = vcombine.high %v136_v41, %v140_v19  ;;  %v336_v41 = vld [vmem:[#allocation5 + $0x7d0] sm:$0xff] }
  0xea   :  { %2677 = vmatpush2.bf16.msra.mxu1 %v4302_v47  ;;  %2637 = vmatprep.subr.bf16.mxu0 %v4167_v48  ;;  %v4113_v47 = vcombine.high %v264_v42, %v268_v43  ;;  %v128_v48 = vld [vmem:[#allocation5 + $0x150] sm:$0xff]  ;;  %v4064_v43 = vcombine.low %v216_v33, %v220_v34 }
  0xeb   :  { %2678 = vmatprep.subr.bf16.mxu1 %v4295_v49  ;;  %v132_v49 = vld [vmem:[#allocation5 + $0x170] sm:$0xff] }
  0xec   :  { %v3976_v0 = vcombine.low %v128_v48, %v132_v49  ;;  %v340_v19 = vld [vmem:[#allocation5 + $0x7f0] sm:$0xff] }
  0xed   :  { %2638 = vmatpush2.bf16.msra.mxu0 %v4166_v56  ;;  %v3977_v56 = vcombine.high %v128_v48, %v132_v49  ;;  %v328_v48 = vld [vmem:[#allocation5 + $0x790] sm:$0xff] }
  0xee   :  { %2679 = vmatpush2.bf16.msra.mxu1 %v4294_v57  ;;  %2639 = vmatprep.subr.bf16.mxu0 %v4159_v60  ;;  %v4105_v57 = vcombine.high %v256_v50, %v260_v51  ;;  %v120_v60 = vld [vmem:[#allocation5 + $0x110] sm:$0xff]  ;;  %v4184_v51 = vcombine.low %v336_v41, %v340_v19 }
  0xef   :  { %2680 = vmatprep.subr.bf16.mxu1 %v4287_v61  ;;  %v124_v61 = vld [vmem:[#allocation5 + $0x130] sm:$0xff] }
  0xf0   :  { %v3968_v8 = vcombine.low %v120_v60, %v124_v61  ;;  %v332_v49 = vld [vmem:[#allocation5 + $0x7b0] sm:$0xff] }
  0xf1   :  { %2640 = vmatpush2.bf16.msra.mxu0 %v4158_v2  ;;  %v3969_v2 = vcombine.high %v120_v60, %v124_v61  ;;  %v320_v60 = vld [vmem:[#allocation5 + $0x750] sm:$0xff] }
  0xf2   :  { %2681 = vmatpush2.bf16.msra.mxu1 %v4286_v3  ;;  %2641 = vmatprep.subr.bf16.mxu0 %v4151_v4  ;;  %v4097_v3 = vcombine.high %v248_v62, %v252_v63  ;;  %v112_v4 = vld [vmem:[#allocation5 + $0xd0] sm:$0xff]  ;;  %v4176_v63 = vcombine.low %v328_v48, %v332_v49 }
  0xf3   :  { %2682 = vmatprep.subr.bf16.mxu1 %v4279_v5  ;;  %v116_v5 = vld [vmem:[#allocation5 + $0xf0] sm:$0xff] }
  0xf4   :  { %v3960_v17 = vcombine.low %v112_v4, %v116_v5  ;;  %v324_v61 = vld [vmem:[#allocation5 + $0x770] sm:$0xff] }
  0xf5   :  { %2642 = vmatpush2.bf16.msra.mxu0 %v4150_v10  ;;  %v3961_v10 = vcombine.high %v112_v4, %v116_v5  ;;  %v312_v4 = vld [vmem:[#allocation5 + $0x710] sm:$0xff] }
  0xf6   :  { %2683 = vmatpush2.bf16.msra.mxu1 %v4278_v11  ;;  %2643 = vmatprep.subr.bf16.mxu0 %v4143_v12  ;;  %v4089_v11 = vcombine.high %v240_v6, %v244_v7  ;;  %v104_v12 = vld [vmem:[#allocation5 + $0x90] sm:$0xff]  ;;  %v4168_v7 = vcombine.low %v320_v60, %v324_v61 }
  0xf7   :  { %2684 = vmatprep.subr.bf16.mxu1 %v4271_v13  ;;  %v108_v13 = vld [vmem:[#allocation5 + $0xb0] sm:$0xff] }
  0xf8   :  { %v3952_v53 = vcombine.low %v104_v12, %v108_v13  ;;  %v316_v5 = vld [vmem:[#allocation5 + $0x730] sm:$0xff] }
  0xf9   :  { %2644 = vmatpush2.bf16.msra.mxu0 %v4142_v21  ;;  %v3953_v21 = vcombine.high %v104_v12, %v108_v13  ;;  %v304_v12 = vld [vmem:[#allocation5 + $0x6d0] sm:$0xff] }
  0xfa   :  { %2685 = vmatpush2.bf16.msra.mxu1 %v4270_v22  ;;  %2645 = vmatprep.subr.bf16.mxu0 %v4135_v23  ;;  %v4081_v22 = vcombine.high %v232_v14, %v236_v15  ;;  %v96_v23 = vld [vmem:[#allocation5 + $0x50] sm:$0xff]  ;;  %v4160_v15 = vcombine.low %v312_v4, %v316_v5 }
  0xfb   :  { %2686 = vmatprep.subr.bf16.mxu1 %v4263_v24  ;;  %v100_v24 = vld [vmem:[#allocation5 + $0x70] sm:$0xff] }
  0xfc   :  { %v3944_v35 = vcombine.low %v96_v23, %v100_v24  ;;  %v308_v13 = vld [vmem:[#allocation5 + $0x6f0] sm:$0xff] }
  0xfd   :  { %2646 = vmatpush2.bf16.msra.mxu0 %v4134_v54  ;;  %v3945_v54 = vcombine.high %v96_v23, %v100_v24  ;;  %v296_v23 = vld [vmem:[#allocation5 + $0x690] sm:$0xff] }
  0xfe   :  { %2687 = vmatpush2.bf16.msra.mxu1 %v4262_v29  ;;  %2647 = vmatprep.subr.bf16.mxu0 %v4127_v30  ;;  %v4073_v29 = vcombine.high %v224_v25, %v228_v26  ;;  %v88_v30 = vld [vmem:[#allocation5 + $0x10] sm:$0xff]  ;;  %v4152_v26 = vcombine.low %v304_v12, %v308_v13 }
  0xff   :  { %2688 = vmatprep.subr.bf16.mxu1 %v4255_v31  ;;  %v92_v31 = vld [vmem:[#allocation5 + $0x30] sm:$0xff] }
 0x100   :  { %v3936_v42 = vcombine.low %v88_v30, %v92_v31  ;;  %v300_v24 = vld [vmem:[#allocation5 + $0x6b0] sm:$0xff] }
 0x101   :  { %2648 = vmatpush2.bf16.msra.mxu0 %v4126_v37  ;;  %v3937_v37 = vcombine.high %v88_v30, %v92_v31  ;;  %v288_v30 = vld [vmem:[#allocation5 + $0x650] sm:$0xff] }
 0x102   :  { %2689 = vmatpush2.bf16.msra.mxu1 %v4254_v38  ;;  %2699 = vmatprep.subr.bf16.mxu0 %v3993_v39  ;;  %v4065_v38 = vcombine.high %v216_v33, %v220_v34  ;;  %v208_v39 = vld [vmem:[#allocation5 + $0x3d0] sm:$0xff]  ;;  %v472_v34 = vlaneseq }
 0x103   :  { %2740 = vmatprep.subr.bf16.mxu1 %v4121_v40  ;;  %v212_v40 = vld [vmem:[#allocation5 + $0x3f0] sm:$0xff] }
 0x104   :  { %2650 = vmatmul.mubr.bf16.vlgmr.msra.gmra.mxu0 %v4858_v20  ;;  %v4056_v50 = vcombine.low %v208_v39, %v212_v40  ;;  %v292_v31 = vld [vmem:[#allocation5 + $0x670] sm:$0xff] }
 0x105   :  { %2691 = vmatmul.mubr.bf16.vlgmr.msra.gmra.mxu1 %v4870_v32  ;;  %2700 = vmatpush1.bf16.msra.mxu0 %v3992_v44  ;;  %v4057_v44 = vcombine.high %v208_v39, %v212_v40  ;;  %v156_v39 = vld [vmem:[#allocation5 + $0x230] sm:$0xff] }
 0x106   :  { %2741 = vmatpush1.bf16.msra.mxu1 %v4120_v45  ;;  %2701 = vmatprep.subr.bf16.mxu0 %v3985_v46  ;;  %v4185_v45 = vcombine.high %v336_v41, %v340_v19  ;;  %v200_v46 = vld [vmem:[#allocation5 + $0x390] sm:$0xff] }
 0x107   :  { %2742 = vmatprep.subr.bf16.mxu1 %v4113_v47  ;;  %2731 = vmatprep.mubr.bf16.mxu0 %v4842_v58  ;;  %v204_v47 = vld [vmem:[#allocation5 + $0x3b0] sm:$0xff] }
 0x108   :  { %2772 = vmatprep.mubr.bf16.mxu1 %v4846_v59  ;;  %v4048_v62 = vcombine.low %v200_v46, %v204_v47  ;;  %v280_v40 = vld [vmem:[#allocation5 + $0x610] sm:$0xff] }
 0x109   :  { %2702 = vmatpush1.bf16.msra.mxu0 %v3984_v52  ;;  %v4049_v52 = vcombine.high %v200_v46, %v204_v47  ;;  %v284_v41 = vld [vmem:[#allocation5 + $0x630] sm:$0xff] }
 0x10a   :  { %2743 = vmatpush1.bf16.msra.mxu1 %v4112_v55  ;;  %2703 = vmatprep.subr.bf16.mxu0 %v3977_v56  ;;  %v4177_v55 = vcombine.high %v328_v48, %v332_v49  ;;  %v192_v56 = vld [vmem:[#allocation5 + $0x350] sm:$0xff]  ;;  %v145_v48 = vld [vmem:[#allocation5 + $0x1d8] sm:$0xff] }
 0x10b   :  { %2744 = vmatprep.subr.bf16.mxu1 %v4105_v57  ;;  %v196_v57 = vld [vmem:[#allocation5 + $0x370] sm:$0xff]  ;;  %v149_v49 = vld [vmem:[#allocation5 + $0x1f8] sm:$0xff] }
 0x10c   :  { %v4040_v6 = vcombine.low %v192_v56, %v196_v57  ;;  %v400_v46 = vld [vmem:[#allocation5 + $0x9d0] sm:$0xff] }
 0x10d   :  { %2704 = vmatpush1.bf16.msra.mxu0 %v3976_v0  ;;  %v4041_v0 = vcombine.high %v192_v56, %v196_v57  ;;  %v404_v47 = vld [vmem:[#allocation5 + $0x9f0] sm:$0xff]  ;;  %v3995_v57 = vcombine.high %v145_v48, %v149_v49 }
 0x10e   :  { %2745 = vmatpush1.bf16.msra.mxu1 %v4104_v1  ;;  %2705 = vmatprep.subr.bf16.mxu0 %v3969_v2  ;;  %v4169_v1 = vcombine.high %v320_v60, %v324_v61  ;;  %v184_v2 = vld [vmem:[#allocation5 + $0x310] sm:$0xff]  ;;  %v4249_v56 = vcombine.high %v400_v46, %v404_v47 }
 0x10f   :  { %2746 = vmatprep.subr.bf16.mxu1 %v4097_v3  ;;  %v188_v3 = vld [vmem:[#allocation5 + $0x330] sm:$0xff] }
 0x110   :  { %v4032_v14 = vcombine.low %v184_v2, %v188_v3  ;;  %v392_v61 = vld [vmem:[#allocation5 + $0x990] sm:$0xff] }
 0x111   :  { %2706 = vmatpush1.bf16.msra.mxu0 %v3968_v8  ;;  %v4033_v8 = vcombine.high %v184_v2, %v188_v3  ;;  %v4248_v2 = vcombine.low %v400_v46, %v404_v47  ;;  %v3994_v3 = vcombine.low %v145_v48, %v149_v49  ;;  %v364_v46 = vld [vmem:[#allocation5 + $0x8b0] sm:$0xff]  ;;  %v105_v47 = vld [vmem:[#allocation5 + $0x98] sm:$0xff] }
 0x112   :  { %2747 = vmatpush1.bf16.msra.mxu1 %v4096_v9  ;;  %2707 = vmatprep.subr.bf16.mxu0 %v3961_v10  ;;  %v4161_v9 = vcombine.high %v312_v4, %v316_v5  ;;  %v176_v10 = vld [vmem:[#allocation5 + $0x2d0] sm:$0xff]  ;;  %v109_v48 = vld [vmem:[#allocation5 + $0xb8] sm:$0xff] }
 0x113   :  { %2748 = vmatprep.subr.bf16.mxu1 %v4089_v11  ;;  %v180_v11 = vld [vmem:[#allocation5 + $0x2f0] sm:$0xff] }
 0x114   :  { %v4024_v25 = vcombine.low %v176_v10, %v180_v11 }
 0x115   :  { %2708 = vmatpush1.bf16.msra.mxu0 %v3960_v17  ;;  %v4025_v17 = vcombine.high %v176_v10, %v180_v11  ;;  %v129_v10 = vld [vmem:[#allocation5 + $0x158] sm:$0xff] }
 0x116   :  { %2749 = vmatpush1.bf16.msra.mxu1 %v4088_v18  ;;  %2709 = vmatprep.subr.bf16.mxu0 %v3953_v21  ;;  %v4153_v18 = vcombine.high %v304_v12, %v308_v13  ;;  %v168_v21 = vld [vmem:[#allocation5 + $0x290] sm:$0xff]  ;;  %v133_v11 = vld [vmem:[#allocation5 + $0x178] sm:$0xff] }
 0x117   :  { %2750 = vmatprep.subr.bf16.mxu1 %v4081_v22  ;;  %v172_v22 = vld [vmem:[#allocation5 + $0x2b0] sm:$0xff] }
 0x118   :  { %v4016_v33 = vcombine.low %v168_v21, %v172_v22 }
 0x119   :  { %2710 = vmatpush1.bf16.msra.mxu0 %v3952_v53  ;;  %v4017_v53 = vcombine.high %v168_v21, %v172_v22 }
 0x11a   :  { %2751 = vmatpush1.bf16.msra.mxu1 %v4080_v27  ;;  %2711 = vmatprep.subr.bf16.mxu0 %v3945_v54  ;;  %v4145_v27 = vcombine.high %v296_v23, %v300_v24  ;;  %v160_v54 = vld [vmem:[#allocation5 + $0x250] sm:$0xff] }
 0x11b   :  { %2752 = vmatprep.subr.bf16.mxu1 %v4073_v29  ;;  %v164_v29 = vld [vmem:[#allocation5 + $0x270] sm:$0xff] }
 0x11c   :  { %v4008_v19 = vcombine.low %v160_v54, %v164_v29 }
 0x11d   :  { %2712 = vmatpush1.bf16.msra.mxu0 %v3944_v35  ;;  %v4144_v35 = vcombine.low %v296_v23, %v300_v24  ;;  %v3979_v24 = vcombine.high %v129_v10, %v133_v11 }
 0x11e   :  { %2753 = vmatpush1.bf16.msra.mxu1 %v4072_v36  ;;  %2713 = vmatprep.subr.bf16.mxu0 %v3937_v37  ;;  %v4009_v36 = vcombine.high %v160_v54, %v164_v29  ;;  %v4137_v37 = vcombine.high %v288_v30, %v292_v31  ;;  %v125_v54 = vld [vmem:[#allocation5 + $0x138] sm:$0xff] }
 0x11f   :  { %2754 = vmatprep.subr.bf16.mxu1 %v4065_v38  ;;  %v152_v38 = vld [vmem:[#allocation5 + $0x210] sm:$0xff] }
 0x121   :  { %2714 = vmatpush1.bf16.msra.mxu0 %v3936_v42  ;;  %v4880_v42 = vshrl.u32 %v472_v34, 7  ;;  %v3978_v34 = vcombine.low %v129_v10, %v133_v11 }
 0x122   :  { %2755 = vmatpush1.bf16.msra.mxu1 %v4064_v43  ;;  %2715 = vmatprep.subr.bf16.mxu0 %v4057_v44  ;;  %v4136_v43 = vcombine.low %v288_v30, %v292_v31  ;;  %v4001_v44 = vcombine.high %v152_v38, %v156_v39 }
 0x123   :  { %2756 = vmatprep.subr.bf16.mxu1 %v4185_v45  ;;  %v4129_v45 = vcombine.high %v280_v40, %v284_v41  ;;  %v478_v60 = vsub.s32 1, %v4880_v42 }
 0x125   :  { %2716 = vmatpush2.bf16.msra.mxu0 %v4056_v50  ;;  %v4000_v50 = vcombine.low %v152_v38, %v156_v39  ;;  %v368_v38 = vld [vmem:[#allocation5 + $0x8d0] sm:$0xff] }
 0x126   :  { %2757 = vmatpush2.bf16.msra.mxu1 %v4184_v51  ;;  %2717 = vmatprep.subr.bf16.mxu0 %v4049_v52  ;;  %v474_v51 = vsub.s32 0, %v4880_v42  ;;  %v4128_v52 = vcombine.low %v280_v40, %v284_v41  ;;  %v372_v39 = vld [vmem:[#allocation5 + $0x8f0] sm:$0xff]  ;;  %v113_v40 = vld [vmem:[#allocation5 + $0xd8] sm:$0xff] }
 0x127   :  { %2758 = vmatprep.subr.bf16.mxu1 %v4177_v55  ;;  %v4883_v55 = vld [vmem:[#allocation7] sm:$0xff]  ;;  %v117_v41 = vld [vmem:[#allocation5 + $0xf8] sm:$0xff]  ;;  %v4216_v49 = vcombine.low %v368_v38, %v372_v39 }
 0x128   :  { %v479_v5 = vrot.slane %v4883_v55, %v478_v60 }
 0x129   :  { %2718 = vmatpush2.bf16.msra.mxu0 %v4048_v62  ;;  %v396_v62 = vld [vmem:[#allocation5 + $0x9b0] sm:$0xff] }
 0x12a   :  { %2759 = vmatpush2.bf16.msra.mxu1 %v4176_v63  ;;  %2719 = vmatprep.subr.bf16.mxu0 %v4041_v0  ;;  %v137_v63 = vld [vmem:[#allocation5 + $0x198] sm:$0xff]  ;;  %v4241_v4 = vcombine.high %v392_v61, %v396_v62 }
 0x12b   :  { %2760 = vmatprep.subr.bf16.mxu1 %v4169_v1  ;;  %v141_v0 = vld [vmem:[#allocation5 + $0x1b8] sm:$0xff]  ;;  %v475_v1 = vrot.slane %v4883_v55, %v474_v51 }
 0x12d   :  { %2720 = vmatpush2.bf16.msra.mxu0 %v4040_v6  ;;  %v3987_v6 = vcombine.high %v137_v63, %v141_v0 }
 0x12e   :  { %2761 = vmatpush2.bf16.msra.mxu1 %v4168_v7  ;;  %2721 = vmatprep.subr.bf16.mxu0 %v4033_v8  ;;  %v384_v7 = vld [vmem:[#allocation5 + $0x950] sm:$0xff] }
 0x12f   :  { %2762 = vmatprep.subr.bf16.mxu1 %v4161_v9  ;;  %v388_v8 = vld [vmem:[#allocation5 + $0x970] sm:$0xff] }
 0x130   :  { %v4232_v31 = vcombine.low %v384_v7, %v388_v8 }
 0x131   :  { %2722 = vmatpush2.bf16.msra.mxu0 %v4032_v14  ;;  %v4240_v14 = vcombine.low %v392_v61, %v396_v62  ;;  %v356_v61 = vld [vmem:[#allocation5 + $0x870] sm:$0xff]  ;;  %v97_v62 = vld [vmem:[#allocation5 + $0x58] sm:$0xff] }
 0x132   :  { %2763 = vmatpush2.bf16.msra.mxu1 %v4160_v15  ;;  %2723 = vmatprep.subr.bf16.mxu0 %v4025_v17  ;;  %v3986_v17 = vcombine.low %v137_v63, %v141_v0  ;;  %v101_v63 = vld [vmem:[#allocation5 + $0x78] sm:$0xff] }
 0x133   :  { %2764 = vmatprep.subr.bf16.mxu1 %v4153_v18  ;;  %v4233_v18 = vcombine.high %v384_v7, %v388_v8  ;;  %v93_v7 = vld [vmem:[#allocation5 + $0x38] sm:$0xff] }
 0x135   :  { %2724 = vmatpush2.bf16.msra.mxu0 %v4024_v25  ;;  %v376_v25 = vld [vmem:[#allocation5 + $0x910] sm:$0xff] }
 0x136   :  { %2765 = vmatpush2.bf16.msra.mxu1 %v4152_v26  ;;  %2725 = vmatprep.subr.bf16.mxu0 %v4017_v53  ;;  %v380_v26 = vld [vmem:[#allocation5 + $0x930] sm:$0xff] }
 0x137   :  { %2766 = vmatprep.subr.bf16.mxu1 %v4145_v27  ;;  %v121_v27 = vld [vmem:[#allocation5 + $0x118] sm:$0xff] }
 0x139   :  { %2726 = vmatpush2.bf16.msra.mxu0 %v4016_v33 }
 0x13a   :  { %2767 = vmatpush2.bf16.msra.mxu1 %v4144_v35  ;;  %2727 = vmatprep.subr.bf16.mxu0 %v4009_v36  ;;  %v4225_v35 = vcombine.high %v376_v25, %v380_v26 }
 0x13b   :  { %2768 = vmatprep.subr.bf16.mxu1 %v4137_v37  ;;  %v3971_v37 = vcombine.high %v121_v27, %v125_v54 }
 0x13d   :  { %2728 = vmatpush2.bf16.msra.mxu0 %v4008_v19  ;;  %v4224_v19 = vcombine.low %v376_v25, %v380_v26  ;;  %v460_v25 = vld [vmem:[#allocation5 + $0xbb0] sm:$0xff]  ;;  %v201_v26 = vld [vmem:[#allocation5 + $0x398] sm:$0xff] }
 0x13e   :  { %2769 = vmatpush2.bf16.msra.mxu1 %v4136_v43  ;;  %2729 = vmatprep.subr.bf16.mxu0 %v4001_v44  ;;  %v4217_v43 = vcombine.high %v368_v38, %v372_v39  ;;  %v3963_v44 = vcombine.high %v113_v40, %v117_v41 }
 0x13f   :  { %2770 = vmatprep.subr.bf16.mxu1 %v4129_v45  ;;  %v360_v45 = vld [vmem:[#allocation5 + $0x890] sm:$0xff] }
 0x140   :  { %v4208_v0 = vcombine.low %v360_v45, %v364_v46 }
 0x141   :  { %2730 = vmatpush2.bf16.msra.mxu0 %v4000_v50  ;;  %v3962_v50 = vcombine.low %v113_v40, %v117_v41  ;;  %v440_v41 = vld [vmem:[#allocation5 + $0xb10] sm:$0xff] }
 0x142   :  { %2771 = vmatpush2.bf16.msra.mxu1 %v4128_v52  ;;  %2781 = vmatprep.subr.bf16.mxu0 %v4249_v56  ;;  %v4209_v52 = vcombine.high %v360_v45, %v364_v46  ;;  %v3955_v56 = vcombine.high %v105_v47, %v109_v48 }
 0x143   :  { %2822 = vmatprep.subr.bf16.mxu1 %v3995_v57  ;;  %v352_v57 = vld [vmem:[#allocation5 + $0x850] sm:$0xff] }
 0x144   :  { %v2487_v9 = vpop.f32.mrf.mxu0  ;;  %2732 = vmatmul.mubr.bf16.vlgmr.msra.gmra.mxu0 %v4852_v16  ;;  %v4200_v8 = vcombine.low %v352_v57, %v356_v61 }
 0x145   :  { %v2488_v12 = vadd.f32 %v2487_v9, %v475_v1  ;;  %v2528_v13 = vpop.f32.mrf.mxu1  ;;  %2773 = vmatmul.mubr.bf16.vlgmr.msra.gmra.mxu1 %v4858_v20  ;;  %2782 = vmatpush1.bf16.msra.mxu0 %v4248_v2  ;;  %v3954_v1 = vcombine.low %v105_v47, %v109_v48  ;;  %v4201_v2 = vcombine.high %v352_v57, %v356_v61  ;;  %v432_v48 = vld [vmem:[#allocation5 + $0xad0] sm:$0xff] }
 0x146   :  { %2823 = vmatpush1.bf16.msra.mxu1 %v3994_v3  ;;  %v2489_v15 = vpop.f32.mrf.mxu0  ;;  %2783 = vmatprep.subr.bf16.mxu0 %v4241_v4  ;;  %v3947_v3 = vcombine.high %v97_v62, %v101_v63  ;;  %v344_v4 = vld [vmem:[#allocation5 + $0x810] sm:$0xff]  ;;  %v3946_v9 = vcombine.low %v97_v62, %v101_v63 }
 0x147   :  { %v4894_v21 = vadd.f32 %v2528_v13, %v2488_v12  ;;  %v2490_v22 = vadd.f32 %v2489_v15, %v479_v5  ;;  %v2530_v23 = vpop.f32.mrf.mxu1  ;;  %2824 = vmatprep.subr.bf16.mxu1 %v3987_v6  ;;  %2813 = vmatprep.mubr.bf16.mxu0 %v4862_v28  ;;  %v348_v5 = vld [vmem:[#allocation5 + $0x830] sm:$0xff]  ;;  %v89_v6 = vld [vmem:[#allocation5 + $0x18] sm:$0xff] }
 0x148   :  { %v2491_v53 = vpop.f32.mrf.mxu0  ;;  %2854 = vmatprep.mubr.bf16.mxu1 %v4842_v58  ;;  %v3970_v58 = vcombine.low %v121_v27, %v125_v54  ;;  %v4193_v10 = vcombine.high %v344_v4, %v348_v5  ;;  %v3939_v11 = vcombine.high %v89_v6, %v93_v7  ;;  %v464_v12 = vld [vmem:[#allocation5 + $0xbd0] sm:$0xff]  ;;  %v213_v15 = vld [vmem:[#allocation5 + $0x3f8] sm:$0xff] }
 0x149   :  { %v4898_v29 = vadd.f32 %v2530_v23, %v2490_v22  ;;  %v2532_v30 = vpop.f32.mrf.mxu1  ;;  %2784 = vmatpush1.bf16.msra.mxu0 %v4240_v14  ;;  %v468_v13 = vld [vmem:[#allocation5 + $0xbf0] sm:$0xff]  ;;  %v209_v14 = vld [vmem:[#allocation5 + $0x3d8] sm:$0xff] }
 0x14a   :  { %2825 = vmatpush1.bf16.msra.mxu1 %v3986_v17  ;;  %v2492_v33 = vpop.f32.mrf.mxu0  ;;  %2785 = vmatprep.subr.bf16.mxu0 %v4233_v18  ;;  %v4192_v17 = vcombine.low %v344_v4, %v348_v5  ;;  %v3938_v18 = vcombine.low %v89_v6, %v93_v7  ;;  %v4313_v22 = vcombine.high %v464_v12, %v468_v13  ;;  %v205_v53 = vld [vmem:[#allocation5 + $0x3b8] sm:$0xff]  ;;  %v424_v63 = vld [vmem:[#allocation5 + $0xa90] sm:$0xff] }
 0x14b   :  { %v2533_v36 = vpop.f32.mrf.mxu1  ;;  %2826 = vmatprep.subr.bf16.mxu1 %v3979_v24  ;;  %v4059_v23 = vcombine.high %v209_v14, %v213_v15  ;;  %v456_v24 = vld [vmem:[#allocation5 + $0xb90] sm:$0xff]  ;;  %v4312_v27 = vcombine.low %v464_v12, %v468_v13  ;;  %v4058_v54 = vcombine.low %v209_v14, %v213_v15  ;;  %v4050_v38 = vcombine.low %v201_v26, %v205_v53 }
 0x14c   :  { %v4305_v30 = vcombine.high %v456_v24, %v460_v25  ;;  %v448_v33 = vld [vmem:[#allocation5 + $0xb50] sm:$0xff]  ;;  %v197_v36 = vld [vmem:[#allocation5 + $0x378] sm:$0xff] }
 0x14d   :  { %2786 = vmatpush1.bf16.msra.mxu0 %v4232_v31  ;;  %v4051_v31 = vcombine.high %v201_v26, %v205_v53  ;;  %v416_v7 = vld [vmem:[#allocation5 + $0xa50] sm:$0xff]  ;;  %v273_v53 = vld [vmem:[#allocation5 + $0x5d8] sm:$0xff] }
 0x14e   :  { %2827 = vmatpush1.bf16.msra.mxu1 %v3978_v34  ;;  %2787 = vmatprep.subr.bf16.mxu0 %v4225_v35  ;;  %v452_v34 = vld [vmem:[#allocation5 + $0xb70] sm:$0xff]  ;;  %v193_v35 = vld [vmem:[#allocation5 + $0x358] sm:$0xff] }
 0x14f   :  { %2828 = vmatprep.subr.bf16.mxu1 %v3971_v37  ;;  %v4304_v37 = vcombine.low %v456_v24, %v460_v25  ;;  %v4297_v39 = vcombine.high %v448_v33, %v452_v34  ;;  %v4043_v40 = vcombine.high %v193_v35, %v197_v36  ;;  %v4042_v45 = vcombine.low %v193_v35, %v197_v36  ;;  %v408_v15 = vld [vmem:[#allocation5 + $0xa10] sm:$0xff]  ;;  %v265_v36 = vld [vmem:[#allocation5 + $0x598] sm:$0xff] }
 0x151   :  { %2788 = vmatpush1.bf16.msra.mxu0 %v4224_v19  ;;  %v444_v19 = vld [vmem:[#allocation5 + $0xb30] sm:$0xff] }
 0x152   :  { %2829 = vmatpush1.bf16.msra.mxu1 %v3970_v58  ;;  %2789 = vmatprep.subr.bf16.mxu0 %v4217_v43  ;;  %v185_v58 = vld [vmem:[#allocation5 + $0x318] sm:$0xff]  ;;  %v4289_v46 = vcombine.high %v440_v41, %v444_v19 }
 0x153   :  { %2830 = vmatprep.subr.bf16.mxu1 %v3963_v44  ;;  %v189_v43 = vld [vmem:[#allocation5 + $0x338] sm:$0xff]  ;;  %v4296_v44 = vcombine.low %v448_v33, %v452_v34 }
 0x154   :  { %v4035_v47 = vcombine.high %v185_v58, %v189_v43  ;;  %v4034_v57 = vcombine.low %v185_v58, %v189_v43  ;;  %v257_v43 = vld [vmem:[#allocation5 + $0x558] sm:$0xff] }
 0x155   :  { %2790 = vmatpush1.bf16.msra.mxu0 %v4216_v49  ;;  %v436_v49 = vld [vmem:[#allocation5 + $0xaf0] sm:$0xff] }
 0x156   :  { %2831 = vmatpush1.bf16.msra.mxu1 %v3962_v50  ;;  %2791 = vmatprep.subr.bf16.mxu0 %v4209_v52  ;;  %v177_v50 = vld [vmem:[#allocation5 + $0x2d8] sm:$0xff]  ;;  %v4281_v61 = vcombine.high %v432_v48, %v436_v49 }
 0x157   :  { %2832 = vmatprep.subr.bf16.mxu1 %v3955_v56  ;;  %v181_v52 = vld [vmem:[#allocation5 + $0x2f8] sm:$0xff]  ;;  %v4288_v56 = vcombine.low %v440_v41, %v444_v19 }
 0x158   :  { %v4027_v62 = vcombine.high %v177_v50, %v181_v52  ;;  %v4026_v4 = vcombine.low %v177_v50, %v181_v52 }
 0x159   :  { %2792 = vmatpush1.bf16.msra.mxu0 %v4208_v0  ;;  %v428_v0 = vld [vmem:[#allocation5 + $0xab0] sm:$0xff] }
 0x15a   :  { %2833 = vmatpush1.bf16.msra.mxu1 %v3954_v1  ;;  %2793 = vmatprep.subr.bf16.mxu0 %v4201_v2  ;;  %v169_v1 = vld [vmem:[#allocation5 + $0x298] sm:$0xff]  ;;  %v4273_v5 = vcombine.high %v424_v63, %v428_v0 }
 0x15b   :  { %2834 = vmatprep.subr.bf16.mxu1 %v3947_v3  ;;  %v173_v2 = vld [vmem:[#allocation5 + $0x2b8] sm:$0xff]  ;;  %v4280_v3 = vcombine.low %v432_v48, %v436_v49 }
 0x15c   :  { %v4019_v6 = vcombine.high %v169_v1, %v173_v2  ;;  %v4018_v12 = vcombine.low %v169_v1, %v173_v2  ;;  %v377_v1 = vld [vmem:[#allocation5 + $0x918] sm:$0xff] }
 0x15d   :  { %2794 = vmatpush1.bf16.msra.mxu0 %v4200_v8  ;;  %v420_v8 = vld [vmem:[#allocation5 + $0xa70] sm:$0xff]  ;;  %v381_v2 = vld [vmem:[#allocation5 + $0x938] sm:$0xff] }
 0x15e   :  { %2835 = vmatpush1.bf16.msra.mxu1 %v3946_v9  ;;  %2795 = vmatprep.subr.bf16.mxu0 %v4193_v10  ;;  %v161_v9 = vld [vmem:[#allocation5 + $0x258] sm:$0xff]  ;;  %v4265_v13 = vcombine.high %v416_v7, %v420_v8 }
 0x15f   :  { %2836 = vmatprep.subr.bf16.mxu1 %v3939_v11  ;;  %v165_v10 = vld [vmem:[#allocation5 + $0x278] sm:$0xff]  ;;  %v4272_v11 = vcombine.low %v424_v63, %v428_v0 }
 0x160   :  { %v4011_v14 = vcombine.high %v161_v9, %v165_v10  ;;  %v4010_v24 = vcombine.low %v161_v9, %v165_v10  ;;  %v249_v63 = vld [vmem:[#allocation5 + $0x518] sm:$0xff] }
 0x161   :  { %2796 = vmatpush1.bf16.msra.mxu0 %v4192_v17  ;;  %v412_v17 = vld [vmem:[#allocation5 + $0xa30] sm:$0xff]  ;;  %v253_v0 = vld [vmem:[#allocation5 + $0x538] sm:$0xff] }
 0x162   :  { %2837 = vmatpush1.bf16.msra.mxu1 %v3938_v18  ;;  %2797 = vmatprep.subr.bf16.mxu0 %v4313_v22  ;;  %v153_v18 = vld [vmem:[#allocation5 + $0x218] sm:$0xff]  ;;  %v4257_v25 = vcombine.high %v408_v15, %v412_v17 }
 0x163   :  { %2838 = vmatprep.subr.bf16.mxu1 %v4059_v23  ;;  %v157_v22 = vld [vmem:[#allocation5 + $0x238] sm:$0xff]  ;;  %v4264_v23 = vcombine.low %v416_v7, %v420_v8  ;;  %v4227_v8 = vcombine.high %v377_v1, %v381_v2 }
 0x164   :  { %v4003_v26 = vcombine.high %v153_v18, %v157_v22  ;;  %v4002_v33 = vcombine.low %v153_v18, %v157_v22  ;;  %v241_v9 = vld [vmem:[#allocation5 + $0x4d8] sm:$0xff] }
 0x165   :  { %2798 = vmatpush2.bf16.msra.mxu0 %v4312_v27  ;;  %v277_v27 = vld [vmem:[#allocation5 + $0x5f8] sm:$0xff] }
 0x166   :  { %2839 = vmatpush2.bf16.msra.mxu1 %v4058_v54  ;;  %2799 = vmatprep.subr.bf16.mxu0 %v4305_v30  ;;  %v401_v54 = vld [vmem:[#allocation5 + $0x9d8] sm:$0xff]  ;;  %v4123_v34 = vcombine.high %v273_v53, %v277_v27 }
 0x167   :  { %2840 = vmatprep.subr.bf16.mxu1 %v4051_v31  ;;  %v405_v30 = vld [vmem:[#allocation5 + $0x9f8] sm:$0xff]  ;;  %v4256_v31 = vcombine.low %v408_v15, %v412_v17 }
 0x168   :  { %v4251_v35 = vcombine.high %v401_v54, %v405_v30  ;;  %v4250_v41 = vcombine.low %v401_v54, %v405_v30  ;;  %v245_v10 = vld [vmem:[#allocation5 + $0x4f8] sm:$0xff] }
 0x169   :  { %2800 = vmatpush2.bf16.msra.mxu0 %v4304_v37  ;;  %v269_v37 = vld [vmem:[#allocation5 + $0x5b8] sm:$0xff] }
 0x16a   :  { %2841 = vmatpush2.bf16.msra.mxu1 %v4050_v38  ;;  %2801 = vmatprep.subr.bf16.mxu0 %v4297_v39  ;;  %v393_v38 = vld [vmem:[#allocation5 + $0x998] sm:$0xff]  ;;  %v4115_v19 = vcombine.high %v265_v36, %v269_v37  ;;  %v4114_v50 = vcombine.low %v265_v36, %v269_v37 }
 0x16b   :  { %2842 = vmatprep.subr.bf16.mxu1 %v4043_v40  ;;  %v397_v39 = vld [vmem:[#allocation5 + $0x9b8] sm:$0xff]  ;;  %v4122_v40 = vcombine.low %v273_v53, %v277_v27 }
 0x16c   :  { %v4243_v58 = vcombine.high %v393_v38, %v397_v39  ;;  %v233_v15 = vld [vmem:[#allocation5 + $0x498] sm:$0xff] }
 0x16d   :  { %2802 = vmatpush2.bf16.msra.mxu0 %v4296_v44  ;;  %v261_v44 = vld [vmem:[#allocation5 + $0x578] sm:$0xff] }
 0x16e   :  { %2843 = vmatpush2.bf16.msra.mxu1 %v4042_v45  ;;  %2803 = vmatprep.subr.bf16.mxu0 %v4289_v46  ;;  %v385_v46 = vld [vmem:[#allocation5 + $0x958] sm:$0xff] }
 0x16f   :  { %2844 = vmatprep.subr.bf16.mxu1 %v4035_v47  ;;  %v389_v47 = vld [vmem:[#allocation5 + $0x978] sm:$0xff] }
 0x170   :  { %v237_v17 = vld [vmem:[#allocation5 + $0x4b8] sm:$0xff] }
 0x171   :  { %2804 = vmatpush2.bf16.msra.mxu0 %v4288_v56  ;;  %v4242_v56 = vcombine.low %v393_v38, %v397_v39  ;;  %v361_v18 = vld [vmem:[#allocation5 + $0x898] sm:$0xff] }
 0x172   :  { %2845 = vmatpush2.bf16.msra.mxu1 %v4034_v57  ;;  %2805 = vmatprep.subr.bf16.mxu0 %v4281_v61  ;;  %v4107_v57 = vcombine.high %v257_v43, %v261_v44  ;;  %v365_v22 = vld [vmem:[#allocation5 + $0x8b8] sm:$0xff] }
 0x173   :  { %2846 = vmatprep.subr.bf16.mxu1 %v4027_v62  ;;  %v4235_v62 = vcombine.high %v385_v46, %v389_v47  ;;  %v225_v53 = vld [vmem:[#allocation5 + $0x458] sm:$0xff] }
 0x174   :  { %v229_v27 = vld [vmem:[#allocation5 + $0x478] sm:$0xff] }
 0x175   :  { %2806 = vmatpush2.bf16.msra.mxu0 %v4280_v3  ;;  %v4106_v3 = vcombine.low %v257_v43, %v261_v44  ;;  %v353_v54 = vld [vmem:[#allocation5 + $0x858] sm:$0xff] }
 0x176   :  { %2847 = vmatpush2.bf16.msra.mxu1 %v4026_v4  ;;  %2807 = vmatprep.subr.bf16.mxu0 %v4273_v5  ;;  %v4234_v5 = vcombine.low %v385_v46, %v389_v47  ;;  %v357_v30 = vld [vmem:[#allocation5 + $0x878] sm:$0xff] }
 0x177   :  { %2848 = vmatprep.subr.bf16.mxu1 %v4019_v6  ;;  %v4099_v6 = vcombine.high %v249_v63, %v253_v0  ;;  %v217_v36 = vld [vmem:[#allocation5 + $0x418] sm:$0xff] }
 0x178   :  { %v221_v37 = vld [vmem:[#allocation5 + $0x438] sm:$0xff] }
 0x179   :  { %2808 = vmatpush2.bf16.msra.mxu0 %v4272_v11  ;;  %v369_v11 = vld [vmem:[#allocation5 + $0x8d8] sm:$0xff]  ;;  %v4066_v47 = vcombine.low %v217_v36, %v221_v37 }
 0x17a   :  { %2849 = vmatpush2.bf16.msra.mxu1 %v4018_v12  ;;  %2809 = vmatprep.subr.bf16.mxu0 %v4265_v13  ;;  %v4098_v12 = vcombine.low %v249_v63, %v253_v0  ;;  %v4091_v13 = vcombine.high %v241_v9, %v245_v10  ;;  %v345_v38 = vld [vmem:[#allocation5 + $0x818] sm:$0xff] }
 0x17b   :  { %2850 = vmatprep.subr.bf16.mxu1 %v4011_v14  ;;  %v349_v39 = vld [vmem:[#allocation5 + $0x838] sm:$0xff] }
 0x17c   :  { %v337_v43 = vld [vmem:[#allocation5 + $0x7d8] sm:$0xff] }
 0x17d   :  { %2810 = vmatpush2.bf16.msra.mxu0 %v4264_v23  ;;  %v4090_v23 = vcombine.low %v241_v9, %v245_v10  ;;  %v341_v44 = vld [vmem:[#allocation5 + $0x7f8] sm:$0xff] }
 0x17e   :  { %2851 = vmatpush2.bf16.msra.mxu1 %v4010_v24  ;;  %2811 = vmatprep.subr.bf16.mxu0 %v4257_v25  ;;  %v4083_v25 = vcombine.high %v233_v15, %v237_v17  ;;  %v469_v46 = vld [vmem:[#allocation5 + $0xbf8] sm:$0xff] }
 0x17f   :  { %2852 = vmatprep.subr.bf16.mxu1 %v4003_v26  ;;  %v4211_v26 = vcombine.high %v361_v18, %v365_v22  ;;  %v333_v63 = vld [vmem:[#allocation5 + $0x7b8] sm:$0xff] }
 0x180   :  { %v457_v0 = vld [vmem:[#allocation5 + $0xb98] sm:$0xff] }
 0x181   :  { %2812 = vmatpush2.bf16.msra.mxu0 %v4256_v31  ;;  %v4082_v31 = vcombine.low %v233_v15, %v237_v17 }
 0x182   :  { %2853 = vmatpush2.bf16.msra.mxu1 %v4002_v33  ;;  %2863 = vmatprep.subr.bf16.mxu0 %v4123_v34  ;;  %v4210_v33 = vcombine.low %v361_v18, %v365_v22  ;;  %v4075_v34 = vcombine.high %v225_v53, %v229_v27  ;;  %v305_v22 = vld [vmem:[#allocation5 + $0x6d8] sm:$0xff] }
 0x183   :  { %2904 = vmatprep.subr.bf16.mxu1 %v4251_v35  ;;  %v4203_v35 = vcombine.high %v353_v54, %v357_v30 }
 0x184   :  { %v2569_v45 = vpop.f32.mrf.mxu0  ;;  %2814 = vmatmul.mubr.bf16.vlgmr.msra.gmra.mxu0 %v4870_v32 }
 0x185   :  { %v4902_v48 = vadd.f32 %v2569_v45, %v4894_v21  ;;  %v4904_v49 = vpop.f32.mrf.mxu1  ;;  %2855 = vmatmul.mubr.bf16.vlgmr.msra.gmra.mxu1 %v4852_v16  ;;  %2864 = vmatpush1.bf16.msra.mxu0 %v4122_v40  ;;  %v4074_v40 = vcombine.low %v225_v53, %v229_v27  ;;  %v465_v45 = vld [vmem:[#allocation5 + $0xbd8] sm:$0xff] }
 0x186   :  { %2905 = vmatpush1.bf16.msra.mxu1 %v4250_v41  ;;  %v4907_v52 = vpop.f32.mrf.mxu0  ;;  %2865 = vmatprep.subr.bf16.mxu0 %v4115_v19  ;;  %v4202_v41 = vcombine.low %v353_v54, %v357_v30  ;;  %v4067_v19 = vcombine.high %v217_v36, %v221_v37  ;;  %v297_v30 = vld [vmem:[#allocation5 + $0x698] sm:$0xff] }
 0x187   :  { %v4909_v61 = vpop.f32.mrf.mxu1  ;;  %2906 = vmatprep.subr.bf16.mxu1 %v4243_v58  ;;  %2895 = vmatprep.mubr.bf16.mxu0 %v4846_v59  ;;  %v373_v59 = vld [vmem:[#allocation5 + $0x8f8] sm:$0xff]  ;;  %v4195_v58 = vcombine.high %v345_v38, %v349_v39 }
 0x188   :  { %v2573_v21 = vpop.f32.mrf.mxu0  ;;  %2936 = vmatprep.mubr.bf16.mxu1 %v4862_v28  ;;  %v4226_v28 = vcombine.low %v377_v1, %v381_v2  ;;  %v4219_v14 = vcombine.high %v369_v11, %v373_v59  ;;  %v4218_v24 = vcombine.low %v369_v11, %v373_v59  ;;  %v4186_v1 = vcombine.low %v337_v43, %v341_v44  ;;  %v313_v59 = vld [vmem:[#allocation5 + $0x718] sm:$0xff] }
 0x189   :  { %v2614_v16 = vpop.f32.mrf.mxu1  ;;  %2866 = vmatpush1.bf16.msra.mxu0 %v4114_v50  ;;  %v4194_v50 = vcombine.low %v345_v38, %v349_v39  ;;  %v461_v21 = vld [vmem:[#allocation5 + $0xbb8] sm:$0xff]  ;;  %v4314_v2 = vcombine.low %v465_v45, %v469_v46 }
 0x18a   :  { %2907 = vmatpush1.bf16.msra.mxu1 %v4242_v56  ;;  %v2574_v4 = vpop.f32.mrf.mxu0  ;;  %2867 = vmatprep.subr.bf16.mxu0 %v4107_v57  ;;  %v4187_v56 = vcombine.high %v337_v43, %v341_v44  ;;  %v4315_v57 = vcombine.high %v465_v45, %v469_v46  ;;  %v4306_v9 = vcombine.low %v457_v0, %v461_v21  ;;  %v289_v39 = vld [vmem:[#allocation5 + $0x658] sm:$0xff] }
 0x18b   :  { %v2615_v7 = vpop.f32.mrf.mxu1  ;;  %2908 = vmatprep.subr.bf16.mxu1 %v4235_v62  ;;  %v329_v62 = vld [vmem:[#allocation5 + $0x798] sm:$0xff] }
 0x18c   :  { %v4179_v16 = vcombine.high %v329_v62, %v333_v63  ;;  %v321_v4 = vld [vmem:[#allocation5 + $0x758] sm:$0xff] }
 0x18d   :  { %2868 = vmatpush1.bf16.msra.mxu0 %v4106_v3  ;;  %v4307_v3 = vcombine.high %v457_v0, %v461_v21  ;;  %v453_v7 = vld [vmem:[#allocation5 + $0xb78] sm:$0xff]  ;;  %v2572_v21 = vadd.f32 %v4907_v52, %v4898_v29  ;;  %v4468_v29 = vld [vmem:[#allocation8 + $0x64] ss:$8 sps:$4 sm:$0xff]  }
 0x18e   :  { %2909 = vmatpush1.bf16.msra.mxu1 %v4234_v5  ;;  %2869 = vmatprep.subr.bf16.mxu0 %v4099_v6  ;;  %v325_v5 = vld [vmem:[#allocation5 + $0x778] sm:$0xff]  ;;  %v4471_v52 = vld [vmem:[#allocation8 + $0x164] ss:$8 sps:$4 sm:$0xff]  }
 0x18f   :  { %2910 = vmatprep.subr.bf16.mxu1 %v4227_v8  ;;  %v449_v6 = vld [vmem:[#allocation5 + $0xb58] sm:$0xff]  ;;  %v4178_v8 = vcombine.low %v329_v62, %v333_v63  ;;  %v4171_v10 = vcombine.high %v321_v4, %v325_v5 }
 0x190   :  { %v4299_v11 = vcombine.high %v449_v6, %v453_v7  ;;  %v4298_v15 = vcombine.low %v449_v6, %v453_v7  ;;  %v281_v46 = vld [vmem:[#allocation5 + $0x618] sm:$0xff] }
 0x191   :  { %2870 = vmatpush1.bf16.msra.mxu0 %v4098_v12  ;;  %v317_v12 = vld [vmem:[#allocation5 + $0x738] sm:$0xff] }
 0x192   :  { %2911 = vmatpush1.bf16.msra.mxu1 %v4226_v28  ;;  %2871 = vmatprep.subr.bf16.mxu0 %v4091_v13  ;;  %v441_v28 = vld [vmem:[#allocation5 + $0xb18] sm:$0xff]  ;;  %v4163_v17 = vcombine.high %v313_v59, %v317_v12 }
 0x193   :  { %2912 = vmatprep.subr.bf16.mxu1 %v4219_v14  ;;  %v445_v13 = vld [vmem:[#allocation5 + $0xb38] sm:$0xff]  ;;  %v4170_v14 = vcombine.low %v321_v4, %v325_v5  ;;  %v2946_v5 = vmax.f32 %v2572_v21, 0.0  ;;  %v4517_v21 = vld [vmem:[#allocation8 + $0x1e0] ss:$8 sps:$4 sm:$0xff]  }
 0x194   :  { %v4291_v18 = vcombine.high %v441_v28, %v445_v13  ;;  %v4290_v53 = vcombine.low %v441_v28, %v445_v13  ;;  %v4465_v4 = vld [vmem:[#allocation8 + $0x174] ss:$8 sps:$4 sm:$0xff]   ;;  %v4460_v7 = vld [vmem:[#allocation8 + $0x70] ss:$8 sps:$4 sm:$0xff]   ;;  %v4469_v28 = vld [vmem:[#allocation8 + $0x160] ss:$8 sps:$4 sm:$0xff]  }
 0x195   :  { %2872 = vmatpush1.bf16.msra.mxu0 %v4090_v23  ;;  %v309_v23 = vld [vmem:[#allocation5 + $0x6f8] sm:$0xff] }
 0x196   :  { %2913 = vmatpush1.bf16.msra.mxu1 %v4218_v24  ;;  %2873 = vmatprep.subr.bf16.mxu0 %v4083_v25  ;;  %v433_v24 = vld [vmem:[#allocation5 + $0xad8] sm:$0xff]  ;;  %v4155_v27 = vcombine.high %v305_v22, %v309_v23 }
 0x197   :  { %2914 = vmatprep.subr.bf16.mxu1 %v4211_v26  ;;  %v437_v25 = vld [vmem:[#allocation5 + $0xaf8] sm:$0xff]  ;;  %v4162_v26 = vcombine.low %v313_v59, %v317_v12 }
 0x198   :  { %v4283_v54 = vcombine.high %v433_v24, %v437_v25  ;;  %v4282_v36 = vcombine.low %v433_v24, %v437_v25  ;;  %v4474_v13 = vld [vmem:[#allocation8 + $0x54] ss:$8 sps:$4 sm:$0xff]   ;;  %v4480_v24 = vld [vmem:[#allocation8 + $0x44] ss:$8 sps:$4 sm:$0xff]  }
 0x199   :  { %2874 = vmatpush1.bf16.msra.mxu0 %v4082_v31  ;;  %v301_v31 = vld [vmem:[#allocation5 + $0x6b8] sm:$0xff] }
 0x19a   :  { %2915 = vmatpush1.bf16.msra.mxu1 %v4210_v33  ;;  %2875 = vmatprep.subr.bf16.mxu0 %v4075_v34  ;;  %v425_v33 = vld [vmem:[#allocation5 + $0xa98] sm:$0xff]  ;;  %v4147_v37 = vcombine.high %v297_v30, %v301_v31 }
 0x19b   :  { %2916 = vmatprep.subr.bf16.mxu1 %v4203_v35  ;;  %v429_v34 = vld [vmem:[#allocation5 + $0xab8] sm:$0xff]  ;;  %v4154_v35 = vcombine.low %v305_v22, %v309_v23 }
 0x19c   :  { %v4275_v38 = vcombine.high %v425_v33, %v429_v34  ;;  %v4274_v43 = vcombine.low %v425_v33, %v429_v34  ;;  %v4489_v33 = vld [vmem:[#allocation8 + $0x134] ss:$8 sps:$4 sm:$0xff]   ;;  %v4484_v34 = vld [vmem:[#allocation8 + $0x30] ss:$8 sps:$4 sm:$0xff]  }
 0x19d   :  { %2876 = vmatpush1.bf16.msra.mxu0 %v4074_v40  ;;  %v293_v40 = vld [vmem:[#allocation5 + $0x678] sm:$0xff] }
 0x19e   :  { %2917 = vmatpush1.bf16.msra.mxu1 %v4202_v41  ;;  %2877 = vmatprep.subr.bf16.mxu0 %v4067_v19  ;;  %v417_v41 = vld [vmem:[#allocation5 + $0xa58] sm:$0xff]  ;;  %v4139_v44 = vcombine.high %v289_v39, %v293_v40 }
 0x19f   :  { %2918 = vmatprep.subr.bf16.mxu1 %v4195_v58  ;;  %v421_v19 = vld [vmem:[#allocation5 + $0xa78] sm:$0xff]  ;;  %v4146_v58 = vcombine.low %v297_v30, %v301_v31  ;;  %v4481_v30 = vld [vmem:[#allocation8 + $0x140] ss:$8 sps:$4 sm:$0xff]  }
 0x1a0   :  { %v4267_v45 = vcombine.high %v417_v41, %v421_v19  ;;  %v4266_v62 = vcombine.low %v417_v41, %v421_v19  ;;  %v4486_v31 = vld [vmem:[#allocation8 + $0x34] ss:$8 sps:$4 sm:$0xff]   ;;  %v4496_v19 = vld [vmem:[#allocation8 + $0x10] ss:$8 sps:$4 sm:$0xff]  }
 0x1a1   :  { %2878 = vmatpush1.bf16.msra.mxu0 %v4066_v47  ;;  %v285_v47 = vld [vmem:[#allocation5 + $0x638] sm:$0xff] }
 0x1a2   :  { %2919 = vmatpush1.bf16.msra.mxu1 %v4194_v50  ;;  %2879 = vmatprep.subr.bf16.mxu0 %v4187_v56  ;;  %v409_v50 = vld [vmem:[#allocation5 + $0xa18] sm:$0xff]  ;;  %v4131_v63 = vcombine.high %v281_v46, %v285_v47 }
 0x1a3   :  { %2920 = vmatprep.subr.bf16.mxu1 %v4315_v57  ;;  %v413_v56 = vld [vmem:[#allocation5 + $0xa38] sm:$0xff]  ;;  %v4138_v57 = vcombine.low %v289_v39, %v293_v40  ;;  %v4493_v39 = vld [vmem:[#allocation8 + $0x120] ss:$8 sps:$4 sm:$0xff]  }
 0x1a4   :  { %v4259_v0 = vcombine.high %v409_v50, %v413_v56  ;;  %v4498_v40 = vld [vmem:[#allocation8 + $0x14] ss:$8 sps:$4 sm:$0xff]  }
 0x1a5   :  { %2880 = vmatpush2.bf16.msra.mxu0 %v4186_v1  ;;  %v486_v1 = vsub.s32 3, %v4880_v42  ;;  %v4501_v41 = vld [vmem:[#allocation8 + $0x114] ss:$8 sps:$4 sm:$0xff]  }
 0x1a6   :  { %2921 = vmatpush2.bf16.msra.mxu1 %v4314_v2  ;;  %2881 = vmatprep.subr.bf16.mxu0 %v4179_v16  ;;  %v4130_v2 = vcombine.low %v281_v46, %v285_v47  ;;  %v4258_v16 = vcombine.low %v409_v50, %v413_v56  ;;  %v4505_v46 = vld [vmem:[#allocation8 + $0x100] ss:$8 sps:$4 sm:$0xff]   ;;  %v4510_v47 = vld [vmem:[#allocation8 + $0xf4] ss:$8 sps:$4 sm:$0xff]   ;;  %v4508_v56 = vld [vmem:[#allocation8 + $0xf0] ss:$8 sps:$4 sm:$0xff]  }
 0x1a7   :  { %2922 = vmatprep.subr.bf16.mxu1 %v4307_v3  ;;  %v4462_v3 = vld [vmem:[#allocation8 + $0x74] ss:$8 sps:$4 sm:$0xff]   ;;  %v487_v6 = vrot.slane %v4883_v55, %v486_v1  ;;  %v4466_v55 = vld [vmem:[#allocation8 + $0x60] ss:$8 sps:$4 sm:$0xff]  }
 0x1a8   :  { %v4513_v50 = vld [vmem:[#allocation8 + $0x1f4] ss:$8 sps:$4 sm:$0xff]  }
 0x1a9   :  { %2882 = vmatpush2.bf16.msra.mxu0 %v4178_v8  ;;  %v4463_v8 = vld [vmem:[#allocation8 + $0x170] ss:$8 sps:$4 sm:$0xff]   ;;  %v4522_v1 = vld [vmem:[#allocation8 + $0xd4] ss:$8 sps:$4 sm:$0xff]  }
 0x1aa   :  { %2923 = vmatpush2.bf16.msra.mxu1 %v4306_v9  ;;  %2883 = vmatprep.subr.bf16.mxu0 %v4171_v10  ;;  %v2954_v9 = vpack.c.bf16 %v2946_v5, %v2946_v5  ;;  %v4531_v5 = vld [vmem:[#allocation8 + $0x1c4] ss:$8 sps:$4 sm:$0xff]  }
 0x1ab   :  { %2924 = vmatprep.subr.bf16.mxu1 %v4299_v11  ;;  %v2613_v11 = vadd.f32 %v4909_v61, %v487_v6  ;;  %v4472_v61 = vld [vmem:[#allocation8 + $0x50] ss:$8 sps:$4 sm:$0xff]   ;;  %v482_v6 = vsub.s32 2, %v4880_v42 }
 0x1ad   :  { %2884 = vmatpush2.bf16.msra.mxu0 %v4170_v14 }
 0x1ae   :  { %2925 = vmatpush2.bf16.msra.mxu1 %v4298_v15  ;;  %2885 = vmatprep.subr.bf16.mxu0 %v4163_v17  ;;  %v4477_v17 = vld [vmem:[#allocation8 + $0x154] ss:$8 sps:$4 sm:$0xff]  }
 0x1af   :  { %2926 = vmatprep.subr.bf16.mxu1 %v4291_v18 }
 0x1b1   :  { %2886 = vmatpush2.bf16.msra.mxu0 %v4162_v26 }
 0x1b2   :  { %2927 = vmatpush2.bf16.msra.mxu1 %v4290_v53  ;;  %2887 = vmatprep.subr.bf16.mxu0 %v4155_v27  ;;  %v4483_v53 = vld [vmem:[#allocation8 + $0x144] ss:$8 sps:$4 sm:$0xff]  }
 0x1b3   :  { %2928 = vmatprep.subr.bf16.mxu1 %v4283_v54  ;;  %v4478_v54 = vld [vmem:[#allocation8 + $0x40] ss:$8 sps:$4 sm:$0xff]  }
 0x1b5   :  { %2888 = vmatpush2.bf16.msra.mxu0 %v4154_v35  ;;  %v4487_v35 = vld [vmem:[#allocation8 + $0x130] ss:$8 sps:$4 sm:$0xff]  }
 0x1b6   :  { %2929 = vmatpush2.bf16.msra.mxu1 %v4282_v36  ;;  %2889 = vmatprep.subr.bf16.mxu0 %v4147_v37  ;;  %v4492_v36 = vld [vmem:[#allocation8 + $0x24] ss:$8 sps:$4 sm:$0xff]  }
 0x1b7   :  { %2930 = vmatprep.subr.bf16.mxu1 %v4275_v38  ;;  %v4495_v37 = vld [vmem:[#allocation8 + $0x124] ss:$8 sps:$4 sm:$0xff]   ;;  %v4490_v38 = vld [vmem:[#allocation8 + $0x20] ss:$8 sps:$4 sm:$0xff]  }
 0x1b9   :  { %2890 = vmatpush2.bf16.msra.mxu0 %v4146_v58  ;;  %v4499_v58 = vld [vmem:[#allocation8 + $0x110] ss:$8 sps:$4 sm:$0xff]  }
 0x1ba   :  { %2931 = vmatpush2.bf16.msra.mxu1 %v4274_v43  ;;  %2891 = vmatprep.subr.bf16.mxu0 %v4139_v44  ;;  %v4504_v43 = vld [vmem:[#allocation8 + $0x4] ss:$8 sps:$4 sm:$0xff]  }
 0x1bb   :  { %2932 = vmatprep.subr.bf16.mxu1 %v4267_v45  ;;  %v4507_v44 = vld [vmem:[#allocation8 + $0x104] ss:$8 sps:$4 sm:$0xff]   ;;  %v4502_v45 = vld [vmem:[#allocation8] ss:$8 sps:$4 sm:$0xff]  }
 0x1bd   :  { %2892 = vmatpush2.bf16.msra.mxu0 %v4138_v57  ;;  %v4511_v57 = vld [vmem:[#allocation8 + $0x1f0] ss:$8 sps:$4 sm:$0xff]  }
 0x1be   :  { %2933 = vmatpush2.bf16.msra.mxu1 %v4266_v62  ;;  %2893 = vmatprep.subr.bf16.mxu0 %v4131_v63  ;;  %v4516_v62 = vld [vmem:[#allocation8 + $0xe4] ss:$8 sps:$4 sm:$0xff]  }
 0x1bf   :  { %2934 = vmatprep.subr.bf16.mxu1 %v4259_v0  ;;  %v4519_v63 = vld [vmem:[#allocation8 + $0x1e4] ss:$8 sps:$4 sm:$0xff]   ;;  %v4514_v0 = vld [vmem:[#allocation8 + $0xe0] ss:$8 sps:$4 sm:$0xff]  }
 0x1c1   :  { %2894 = vmatpush2.bf16.msra.mxu0 %v4130_v2  ;;  %v4525_v2 = vld [vmem:[#allocation8 + $0x1d4] ss:$8 sps:$4 sm:$0xff]  }
 0x1c2   :  { %2935 = vmatpush2.bf16.msra.mxu1 %v4258_v16  ;;  %3741 = vmatprep.subr.bf16.mxu0 %v4462_v3  ;;  %v4520_v16 = vld [vmem:[#allocation8 + $0xd0] ss:$8 sps:$4 sm:$0xff]  }
 0x1c3   :  { %3782 = vmatprep.subr.bf16.mxu1 %v4465_v4  ;;  %v4523_v3 = vld [vmem:[#allocation8 + $0x1d0] ss:$8 sps:$4 sm:$0xff]   ;;  %v4528_v4 = vld [vmem:[#allocation8 + $0xc4] ss:$8 sps:$4 sm:$0xff]  }
 0x1c4   :  { %v4917_v10 = vpop.f32.mrf.mxu0  ;;  %2896 = vmatmul.mubr.bf16.vlgmr.msra.gmra.mxu0 %v4858_v20 }
 0x1c5   :  { %v4921_v59 = vpop.f32.mrf.mxu1  ;;  %2937 = vmatmul.mubr.bf16.vlgmr.msra.gmra.mxu1 %v4870_v32  ;;  %3742 = vmatpush1.bf16.msra.mxu0 %v4460_v7  ;;  %v4475_v32 = vld [vmem:[#allocation8 + $0x150] ss:$8 sps:$4 sm:$0xff]   ;;  %v4526_v7 = vld [vmem:[#allocation8 + $0xc0] ss:$8 sps:$4 sm:$0xff]  }
 0x1c6   :  { %3773 = vmatprep.mubr.bf16.mxu0 %v2954_v9  ;;  %3783 = vmatpush1.bf16.msra.mxu1 %v4463_v8  ;;  %v2653_v12 = vpop.f32.mrf.mxu0  ;;  %v4529_v8 = vld [vmem:[#allocation8 + $0x1c0] ss:$8 sps:$4 sm:$0xff]   ;;  %v4925_v9 = vld [vmem:[#allocation7] sm:$0xff] }
 0x1c7   :  { %v2654_v14 = vadd.f32 %v2653_v12, %v2613_v11  ;;  %v2694_v15 = vpop.f32.mrf.mxu1  ;;  %3743 = vmatprep.subr.bf16.mxu0 %v4468_v29  ;;  %3784 = vmatprep.subr.bf16.mxu1 %v4471_v52  ;;  %v4534_v29 = vld [vmem:[#allocation8 + $0xb4] ss:$8 sps:$4 sm:$0xff]   ;;  %v483_v11 = vrot.slane %v4925_v9, %v482_v6  ;;  %v4535_v12 = vld [vmem:[#allocation8 + $0x1b0] ss:$8 sps:$4 sm:$0xff]  }
 0x1c8   :  { %v2655_v18 = vpop.f32.mrf.mxu0  ;;  %v4537_v52 = vld [vmem:[#allocation8 + $0x1b4] ss:$8 sps:$4 sm:$0xff]  }
 0x1c9   :  { %v2695_v20 = vadd.f32 %v2694_v15, %v2654_v14  ;;  %v2696_v22 = vpop.f32.mrf.mxu1  ;;  %3744 = vmatpush1.bf16.msra.mxu0 %v4466_v55  ;;  %v4532_v55 = vld [vmem:[#allocation8 + $0xb0] ss:$8 sps:$4 sm:$0xff]   ;;  %v2611_v14 = vadd.f32 %v4904_v49, %v483_v11  ;;  %v4538_v15 = vld [vmem:[#allocation8 + $0xa0] ss:$8 sps:$4 sm:$0xff]   ;;  %v4546_v18 = vld [vmem:[#allocation8 + $0x94] ss:$8 sps:$4 sm:$0xff]  }
 0x1ca   :  { %3785 = vmatpush1.bf16.msra.mxu1 %v4469_v28  ;;  %v2656_v23 = vpop.f32.mrf.mxu0  ;;  %3745 = vmatprep.subr.bf16.mxu0 %v4474_v13  ;;  %v4540_v28 = vld [vmem:[#allocation8 + $0xa4] ss:$8 sps:$4 sm:$0xff]   ;;  %v4549_v22 = vld [vmem:[#allocation8 + $0x194] ss:$8 sps:$4 sm:$0xff]   ;;  %v4577_v11 = vld [vmem:[#allocation8 + $0x200] ss:$8 sps:$4 sm:$0xff]  }
 0x1cb   :  { %v2948_v25 = vmax.f32 %v2695_v20, 0.0  ;;  %v2697_v26 = vpop.f32.mrf.mxu1  ;;  %3786 = vmatprep.subr.bf16.mxu1 %v4477_v17  ;;  %v4543_v13 = vld [vmem:[#allocation8 + $0x1a4] ss:$8 sps:$4 sm:$0xff]   ;;  %v4541_v17 = vld [vmem:[#allocation8 + $0x1a0] ss:$8 sps:$4 sm:$0xff]   ;;  %v2652_v20 = vadd.f32 %v4917_v10, %v2611_v14 }
 0x1cc   :  { %v4547_v23 = vld [vmem:[#allocation8 + $0x190] ss:$8 sps:$4 sm:$0xff]   ;;  %v4555_v49 = vld [vmem:[#allocation8 + $0x184] ss:$8 sps:$4 sm:$0xff]   ;;  %v2945_v26 = vmax.f32 %v4902_v48, 0.0 }
 0x1cd   :  { %v2956_v27 = vpack.c.bf16 %v2948_v25, %v2948_v25  ;;  %3746 = vmatpush1.bf16.msra.mxu0 %v4472_v61  ;;  %v4544_v61 = vld [vmem:[#allocation8 + $0x90] ss:$8 sps:$4 sm:$0xff]   ;;  %v4550_v25 = vld [vmem:[#allocation8 + $0x80] ss:$8 sps:$4 sm:$0xff]   ;;  %v4558_v10 = vld [vmem:[#allocation8 + $0x274] ss:$8 sps:$4 sm:$0xff]  }
 0x1ce   :  { %3787 = vmatpush1.bf16.msra.mxu1 %v4475_v32  ;;  %3747 = vmatprep.subr.bf16.mxu0 %v4480_v24  ;;  %v4552_v32 = vld [vmem:[#allocation8 + $0x84] ss:$8 sps:$4 sm:$0xff]   ;;  %v2693_v24 = vadd.f32 %v4921_v59, %v2652_v20  ;;  %v4604_v59 = vld [vmem:[#allocation8 + $0x370] ss:$8 sps:$4 sm:$0xff]   ;;  %v4624_v6 = vld [vmem:[#allocation8 + $0x314] ss:$8 sps:$4 sm:$0xff]  }
 0x1cf   :  { %3814 = vmatprep.mubr.bf16.mxu1 %v2956_v27  ;;  %3788 = vmatprep.subr.bf16.mxu1 %v4483_v53  ;;  %v4553_v53 = vld [vmem:[#allocation8 + $0x180] ss:$8 sps:$4 sm:$0xff]   ;;  %v4585_v14 = vld [vmem:[#allocation8 + $0x2e4] ss:$8 sps:$4 sm:$0xff]   ;;  %v4588_v20 = vld [vmem:[#allocation8 + $0x2d4] ss:$8 sps:$4 sm:$0xff]  }
 0x1d0   :  { %v2947_v27 = vmax.f32 %v2693_v24, 0.0  ;;  %v4634_v24 = vld [vmem:[#allocation8 + $0x3d0] ss:$8 sps:$4 sm:$0xff]  }
 0x1d1   :  { %3748 = vmatpush1.bf16.msra.mxu0 %v4478_v54  ;;  %v4606_v54 = vld [vmem:[#allocation8 + $0x374] ss:$8 sps:$4 sm:$0xff]  }
 0x1d2   :  { %3789 = vmatpush1.bf16.msra.mxu1 %v4481_v30  ;;  %3749 = vmatprep.subr.bf16.mxu0 %v4486_v31  ;;  %v4556_v30 = vld [vmem:[#allocation8 + $0x270] ss:$8 sps:$4 sm:$0xff]   ;;  %v2953_v31 = vpack.c.bf16 %v2945_v26, %v2945_v26  ;;  %v4594_v26 = vld [vmem:[#allocation8 + $0x2b4] ss:$8 sps:$4 sm:$0xff]  }
 0x1d3   :  { %3790 = vmatprep.subr.bf16.mxu1 %v4489_v33  ;;  %v4561_v33 = vld [vmem:[#allocation8 + $0x264] ss:$8 sps:$4 sm:$0xff]  }
 0x1d5   :  { %3750 = vmatpush1.bf16.msra.mxu0 %v4484_v34  ;;  %v2955_v34 = vpack.c.bf16 %v2947_v27, %v2947_v27  ;;  %v4592_v27 = vld [vmem:[#allocation8 + $0x2b0] ss:$8 sps:$4 sm:$0xff]  }
 0x1d6   :  { %3791 = vmatpush1.bf16.msra.mxu1 %v4487_v35  ;;  %3751 = vmatprep.subr.bf16.mxu0 %v4492_v36  ;;  %v4609_v35 = vld [vmem:[#allocation8 + $0x364] ss:$8 sps:$4 sm:$0xff]  }
 0x1d7   :  { %3792 = vmatprep.subr.bf16.mxu1 %v4495_v37  ;;  %v4559_v37 = vld [vmem:[#allocation8 + $0x260] ss:$8 sps:$4 sm:$0xff]  }
 0x1d9   :  { %3752 = vmatpush1.bf16.msra.mxu0 %v4490_v38 }
 0x1da   :  { %3793 = vmatpush1.bf16.msra.mxu1 %v4493_v39  ;;  %3753 = vmatprep.subr.bf16.mxu0 %v4498_v40  ;;  %v4564_v39 = vld [vmem:[#allocation8 + $0x254] ss:$8 sps:$4 sm:$0xff]   ;;  %v4607_v40 = vld [vmem:[#allocation8 + $0x360] ss:$8 sps:$4 sm:$0xff]  }
 0x1db   :  { %3794 = vmatprep.subr.bf16.mxu1 %v4501_v41 }
 0x1dd   :  { %3754 = vmatpush1.bf16.msra.mxu0 %v4496_v19  ;;  %v4612_v19 = vld [vmem:[#allocation8 + $0x354] ss:$8 sps:$4 sm:$0xff]  }
 0x1de   :  { %3795 = vmatpush1.bf16.msra.mxu1 %v4499_v58  ;;  %3755 = vmatprep.subr.bf16.mxu0 %v4504_v43 }
 0x1df   :  { %3796 = vmatprep.subr.bf16.mxu1 %v4507_v44  ;;  %v4562_v44 = vld [vmem:[#allocation8 + $0x250] ss:$8 sps:$4 sm:$0xff]  }
 0x1e1   :  { %3756 = vmatpush1.bf16.msra.mxu0 %v4502_v45 }
 0x1e2   :  { %3797 = vmatpush1.bf16.msra.mxu1 %v4505_v46  ;;  %3757 = vmatprep.subr.bf16.mxu0 %v4510_v47  ;;  %v4567_v46 = vld [vmem:[#allocation8 + $0x244] ss:$8 sps:$4 sm:$0xff]   ;;  %v4610_v47 = vld [vmem:[#allocation8 + $0x350] ss:$8 sps:$4 sm:$0xff]  }
 0x1e3   :  { %3798 = vmatprep.subr.bf16.mxu1 %v4513_v50 }
 0x1e5   :  { %3758 = vmatpush2.bf16.msra.mxu0 %v4508_v56  ;;  %v4615_v56 = vld [vmem:[#allocation8 + $0x344] ss:$8 sps:$4 sm:$0xff]  }
 0x1e6   :  { %3799 = vmatpush2.bf16.msra.mxu1 %v4511_v57  ;;  %3759 = vmatprep.subr.bf16.mxu0 %v4516_v62  ;;  %v4565_v57 = vld [vmem:[#allocation8 + $0x240] ss:$8 sps:$4 sm:$0xff]   ;;  %v4570_v62 = vld [vmem:[#allocation8 + $0x234] ss:$8 sps:$4 sm:$0xff]  }
 0x1e7   :  { %3800 = vmatprep.subr.bf16.mxu1 %v4519_v63  ;;  %v4613_v63 = vld [vmem:[#allocation8 + $0x340] ss:$8 sps:$4 sm:$0xff]  }
 0x1e9   :  { %3760 = vmatpush2.bf16.msra.mxu0 %v4514_v0  ;;  %v4618_v0 = vld [vmem:[#allocation8 + $0x334] ss:$8 sps:$4 sm:$0xff]  }
 0x1ea   :  { %3801 = vmatpush2.bf16.msra.mxu1 %v4517_v21  ;;  %3761 = vmatprep.subr.bf16.mxu0 %v4522_v1  ;;  %v4568_v21 = vld [vmem:[#allocation8 + $0x230] ss:$8 sps:$4 sm:$0xff]   ;;  %v4573_v1 = vld [vmem:[#allocation8 + $0x224] ss:$8 sps:$4 sm:$0xff]  }
 0x1eb   :  { %3802 = vmatprep.subr.bf16.mxu1 %v4525_v2  ;;  %v4616_v2 = vld [vmem:[#allocation8 + $0x330] ss:$8 sps:$4 sm:$0xff]  }
 0x1ed   :  { %3762 = vmatpush2.bf16.msra.mxu0 %v4520_v16  ;;  %v4621_v16 = vld [vmem:[#allocation8 + $0x324] ss:$8 sps:$4 sm:$0xff]  }
 0x1ee   :  { %3803 = vmatpush2.bf16.msra.mxu1 %v4523_v3  ;;  %3763 = vmatprep.subr.bf16.mxu0 %v4528_v4  ;;  %v4571_v3 = vld [vmem:[#allocation8 + $0x220] ss:$8 sps:$4 sm:$0xff]   ;;  %v4576_v4 = vld [vmem:[#allocation8 + $0x214] ss:$8 sps:$4 sm:$0xff]  }
 0x1ef   :  { %3804 = vmatprep.subr.bf16.mxu1 %v4531_v5  ;;  %v4619_v5 = vld [vmem:[#allocation8 + $0x320] ss:$8 sps:$4 sm:$0xff]  }
 0x1f1   :  { %3764 = vmatpush2.bf16.msra.mxu0 %v4526_v7  ;;  %v4574_v7 = vld [vmem:[#allocation8 + $0x210] ss:$8 sps:$4 sm:$0xff]  }
 0x1f2   :  { %3805 = vmatpush2.bf16.msra.mxu1 %v4529_v8  ;;  %3765 = vmatprep.subr.bf16.mxu0 %v4534_v29  ;;  %v4579_v8 = vld [vmem:[#allocation8 + $0x204] ss:$8 sps:$4 sm:$0xff]   ;;  %v4622_v29 = vld [vmem:[#allocation8 + $0x310] ss:$8 sps:$4 sm:$0xff]  }
 0x1f3   :  { %3806 = vmatprep.subr.bf16.mxu1 %v4537_v52  ;;  %v4627_v52 = vld [vmem:[#allocation8 + $0x304] ss:$8 sps:$4 sm:$0xff]  }
 0x1f5   :  { %3766 = vmatpush2.bf16.msra.mxu0 %v4532_v55  ;;  %v4582_v55 = vld [vmem:[#allocation8 + $0x2f4] ss:$8 sps:$4 sm:$0xff]  }
 0x1f6   :  { %3807 = vmatpush2.bf16.msra.mxu1 %v4535_v12  ;;  %3767 = vmatprep.subr.bf16.mxu0 %v4540_v28  ;;  %v4625_v12 = vld [vmem:[#allocation8 + $0x300] ss:$8 sps:$4 sm:$0xff]   ;;  %v4630_v28 = vld [vmem:[#allocation8 + $0x3f4] ss:$8 sps:$4 sm:$0xff]  }
 0x1f7   :  { %3808 = vmatprep.subr.bf16.mxu1 %v4543_v13  ;;  %v4580_v13 = vld [vmem:[#allocation8 + $0x2f0] ss:$8 sps:$4 sm:$0xff]  }
 0x1f9   :  { %3768 = vmatpush2.bf16.msra.mxu0 %v4538_v15  ;;  %v4628_v15 = vld [vmem:[#allocation8 + $0x3f0] ss:$8 sps:$4 sm:$0xff]  }
 0x1fa   :  { %3809 = vmatpush2.bf16.msra.mxu1 %v4541_v17  ;;  %3769 = vmatprep.subr.bf16.mxu0 %v4546_v18  ;;  %v4633_v17 = vld [vmem:[#allocation8 + $0x3e4] ss:$8 sps:$4 sm:$0xff]   ;;  %v4583_v18 = vld [vmem:[#allocation8 + $0x2e0] ss:$8 sps:$4 sm:$0xff]  }
 0x1fb   :  { %3810 = vmatprep.subr.bf16.mxu1 %v4549_v22  ;;  %v4631_v22 = vld [vmem:[#allocation8 + $0x3e0] ss:$8 sps:$4 sm:$0xff]  }
 0x1fd   :  { %3770 = vmatpush2.bf16.msra.mxu0 %v4544_v61  ;;  %v4636_v61 = vld [vmem:[#allocation8 + $0x3d4] ss:$8 sps:$4 sm:$0xff]  }
 0x1fe   :  { %3811 = vmatpush2.bf16.msra.mxu1 %v4547_v23  ;;  %3771 = vmatprep.subr.bf16.mxu0 %v4552_v32  ;;  %v4586_v23 = vld [vmem:[#allocation8 + $0x2d0] ss:$8 sps:$4 sm:$0xff]   ;;  %v4591_v32 = vld [vmem:[#allocation8 + $0x2c4] ss:$8 sps:$4 sm:$0xff]  }
 0x1ff   :  { %3812 = vmatprep.subr.bf16.mxu1 %v4555_v49  ;;  %v4639_v49 = vld [vmem:[#allocation8 + $0x3c4] ss:$8 sps:$4 sm:$0xff]  }
 0x201   :  { %3772 = vmatpush2.bf16.msra.mxu0 %v4550_v25  ;;  %v4589_v25 = vld [vmem:[#allocation8 + $0x2c0] ss:$8 sps:$4 sm:$0xff]  }
 0x202   :  { %3813 = vmatpush2.bf16.msra.mxu1 %v4553_v53  ;;  %3823 = vmatprep.subr.bf16.mxu0 %v4558_v10  ;;  %v4637_v53 = vld [vmem:[#allocation8 + $0x3c0] ss:$8 sps:$4 sm:$0xff]   ;;  %v4642_v10 = vld [vmem:[#allocation8 + $0x3b4] ss:$8 sps:$4 sm:$0xff]  }
 0x203   :  { %3864 = vmatprep.subr.bf16.mxu1 %v4606_v54  ;;  %v4597_v54 = vld [vmem:[#allocation8 + $0x2a4] ss:$8 sps:$4 sm:$0xff]  }
 0x204   :  { %v4932_v36 = vpop.f32.mrf.mxu0  ;;  %3774 = vmatmul.mubr.bf16.vlgmr.msra.gmra.mxu0 %v2953_v31  ;;  %v4645_v31 = vld [vmem:[#allocation8 + $0x3a4] ss:$8 sps:$4 sm:$0xff]  }
 0x205   :  { %v4934_v48 = vpop.f32.mrf.mxu1  ;;  %3815 = vmatmul.mubr.bf16.vlgmr.msra.gmra.mxu1 %v2955_v34  ;;  %3824 = vmatpush1.bf16.msra.mxu0 %v4556_v30  ;;  %v4640_v30 = vld [vmem:[#allocation8 + $0x3b0] ss:$8 sps:$4 sm:$0xff]   ;;  %v4643_v34 = vld [vmem:[#allocation8 + $0x3a0] ss:$8 sps:$4 sm:$0xff]  }
 0x206   :  { %v4936_v38 = vpop.f32.mrf.mxu0  ;;  %3825 = vmatprep.subr.bf16.mxu0 %v4561_v33  ;;  %3865 = vmatpush1.bf16.msra.mxu1 %v4604_v59  ;;  %v4595_v33 = vld [vmem:[#allocation8 + $0x2a0] ss:$8 sps:$4 sm:$0xff]   ;;  %v4600_v59 = vld [vmem:[#allocation8 + $0x294] ss:$8 sps:$4 sm:$0xff]  }
 0x207   :  { %v4938_v41 = vpop.f32.mrf.mxu1  ;;  %3866 = vmatprep.subr.bf16.mxu1 %v4609_v35  ;;  %v490_v35 = vsub.s32 4, %v4880_v42 }
 0x208   :  { %v2737_v58 = vpop.f32.mrf.mxu0 }
 0x209   :  { %v2778_v43 = vpop.f32.mrf.mxu1  ;;  %3826 = vmatpush1.bf16.msra.mxu0 %v4559_v37  ;;  %v4648_v37 = vld [vmem:[#allocation8 + $0x394] ss:$8 sps:$4 sm:$0xff]   ;;  %v4646_v58 = vld [vmem:[#allocation8 + $0x390] ss:$8 sps:$4 sm:$0xff]  }
 0x20a   :  { %v2738_v45 = vpop.f32.mrf.mxu0  ;;  %3827 = vmatprep.subr.bf16.mxu0 %v4564_v39  ;;  %3867 = vmatpush1.bf16.msra.mxu1 %v4607_v40  ;;  %v494_v39 = vsub.s32 5, %v4880_v42  ;;  %v4598_v40 = vld [vmem:[#allocation8 + $0x290] ss:$8 sps:$4 sm:$0xff]   ;;  %v491_v43 = vrot.slane %v4925_v9, %v490_v35 }
 0x20b   :  { %v2779_v50 = vpop.f32.mrf.mxu1  ;;  %3868 = vmatprep.subr.bf16.mxu1 %v4612_v19  ;;  %v4603_v19 = vld [vmem:[#allocation8 + $0x284] ss:$8 sps:$4 sm:$0xff]  }
 0x20c   :  { %v495_v45 = vrot.slane %v4925_v9, %v494_v39  ;;  %v2734_v50 = vadd.f32 %v4932_v36, %v491_v43 }
 0x20d   :  { %3828 = vmatpush1.bf16.msra.mxu0 %v4562_v44  ;;  %v4651_v44 = vld [vmem:[#allocation8 + $0x384] ss:$8 sps:$4 sm:$0xff]  }
 0x20e   :  { %3829 = vmatprep.subr.bf16.mxu0 %v4567_v46  ;;  %3869 = vmatpush1.bf16.msra.mxu1 %v4610_v47  ;;  %v4601_v46 = vld [vmem:[#allocation8 + $0x280] ss:$8 sps:$4 sm:$0xff]  }
 0x20f   :  { %3870 = vmatprep.subr.bf16.mxu1 %v4615_v56  ;;  %v4649_v47 = vld [vmem:[#allocation8 + $0x380] ss:$8 sps:$4 sm:$0xff]   ;;  %v2736_v56 = vadd.f32 %v4936_v38, %v495_v45 }
 0x211   :  { %3830 = vmatpush1.bf16.msra.mxu0 %v4565_v57  ;;  %v2775_v57 = vadd.f32 %v4934_v48, %v2734_v50  ;;  %v498_v48 = vsub.s32 6, %v4880_v42 }
 0x212   :  { %3831 = vmatprep.subr.bf16.mxu0 %v4570_v62  ;;  %3871 = vmatpush1.bf16.msra.mxu1 %v4613_v63  ;;  %v2777_v63 = vadd.f32 %v4938_v41, %v2736_v56 }
 0x213   :  { %3872 = vmatprep.subr.bf16.mxu1 %v4618_v0  ;;  %v499_v41 = vrot.slane %v4925_v9, %v498_v48 }
 0x215   :  { %3832 = vmatpush1.bf16.msra.mxu0 %v4568_v21 }
 0x216   :  { %3833 = vmatprep.subr.bf16.mxu0 %v4573_v1  ;;  %3873 = vmatpush1.bf16.msra.mxu1 %v4616_v2 }
 0x217   :  { %3874 = vmatprep.subr.bf16.mxu1 %v4621_v16 }
 0x219   :  { %3834 = vmatpush1.bf16.msra.mxu0 %v4571_v3 }
 0x21a   :  { %3835 = vmatprep.subr.bf16.mxu0 %v4576_v4  ;;  %3875 = vmatpush1.bf16.msra.mxu1 %v4619_v5 }
 0x21b   :  { %3876 = vmatprep.subr.bf16.mxu1 %v4624_v6 }
 0x21d   :  { %3836 = vmatpush1.bf16.msra.mxu0 %v4574_v7 }
 0x21e   :  { %3837 = vmatprep.subr.bf16.mxu0 %v4579_v8  ;;  %3877 = vmatpush1.bf16.msra.mxu1 %v4622_v29  ;;  %v502_v29 = vsub.s32 7, %v4880_v42 }
 0x21f   :  { %3878 = vmatprep.subr.bf16.mxu1 %v4627_v52 }
 0x220   :  { %v503_v52 = vrot.slane %v4925_v9, %v502_v29  ;;  %v3089_v9 = vld [vmem:[#allocation10] sm:$0x3] }
 0x221   :  { %3838 = vmatpush1.bf16.msra.mxu0 %v4577_v11 }
 0x222   :  { %3839 = vmatprep.subr.bf16.mxu0 %v4582_v55  ;;  %3879 = vmatpush1.bf16.msra.mxu1 %v4625_v12 }
 0x223   :  { %3880 = vmatprep.subr.bf16.mxu1 %v4630_v28 }
 0x225   :  { %3840 = vmatpush2.bf16.msra.mxu0 %v4580_v13 }
 0x226   :  { %3841 = vmatprep.subr.bf16.mxu0 %v4585_v14  ;;  %3881 = vmatpush2.bf16.msra.mxu1 %v4628_v15 }
 0x227   :  { %3882 = vmatprep.subr.bf16.mxu1 %v4633_v17 }
 0x229   :  { %3842 = vmatpush2.bf16.msra.mxu0 %v4583_v18 }
 0x22a   :  { %3843 = vmatprep.subr.bf16.mxu0 %v4588_v20  ;;  %3883 = vmatpush2.bf16.msra.mxu1 %v4631_v22 }
 0x22b   :  { %3884 = vmatprep.subr.bf16.mxu1 %v4636_v61 }
 0x22d   :  { %3844 = vmatpush2.bf16.msra.mxu0 %v4586_v23 }
 0x22e   :  { %3845 = vmatprep.subr.bf16.mxu0 %v4591_v32  ;;  %3885 = vmatpush2.bf16.msra.mxu1 %v4634_v24 }
 0x22f   :  { %3886 = vmatprep.subr.bf16.mxu1 %v4639_v49 }
 0x231   :  { %3846 = vmatpush2.bf16.msra.mxu0 %v4589_v25 }
 0x232   :  { %3847 = vmatprep.subr.bf16.mxu0 %v4594_v26  ;;  %3887 = vmatpush2.bf16.msra.mxu1 %v4637_v53  ;;  %v3094_v53 = vrot.slane %v3089_v9, %v474_v51 }
 0x233   :  { %3888 = vmatprep.subr.bf16.mxu1 %v4642_v10  ;;  %v3098_v10 = vrot.slane %v3089_v9, %v478_v60 }
 0x235   :  { %3848 = vmatpush2.bf16.msra.mxu0 %v4592_v27 }
 0x236   :  { %3849 = vmatprep.subr.bf16.mxu0 %v4597_v54  ;;  %3889 = vmatpush2.bf16.msra.mxu1 %v4640_v30 }
 0x237   :  { %3890 = vmatprep.subr.bf16.mxu1 %v4645_v31 }
 0x239   :  { %3850 = vmatpush2.bf16.msra.mxu0 %v4595_v33 }
 0x23a   :  { %3851 = vmatprep.subr.bf16.mxu0 %v4600_v59  ;;  %3891 = vmatpush2.bf16.msra.mxu1 %v4643_v34 }
 0x23b   :  { %3892 = vmatprep.subr.bf16.mxu1 %v4648_v37 }
 0x23d   :  { %3852 = vmatpush2.bf16.msra.mxu0 %v4598_v40 }
 0x23e   :  { %3853 = vmatprep.subr.bf16.mxu0 %v4603_v19  ;;  %3893 = vmatpush2.bf16.msra.mxu1 %v4646_v58 }
 0x23f   :  { %3894 = vmatprep.subr.bf16.mxu1 %v4651_v44 }
 0x241   :  { %3854 = vmatpush2.bf16.msra.mxu0 %v4601_v46 }
 0x242   :  { %3895 = vmatpush2.bf16.msra.mxu1 %v4649_v47 }
 0x244   :  { %v2815_v62 = vpop.f32.mrf.mxu0 }
 0x245   :  { %v2816_v0 = vadd.f32 %v2815_v62, %v2775_v57  ;;  %v2856_v21 = vpop.f32.mrf.mxu1 }
 0x246   :  { %v2817_v1 = vpop.f32.mrf.mxu0  ;;  %v2857_v11 = vadd.f32 %v2856_v21, %v499_v41 }
 0x247   :  { %v2818_v2 = vadd.f32 %v2817_v1, %v2777_v63  ;;  %v2858_v16 = vpop.f32.mrf.mxu1  ;;  %v2949_v3 = vmax.f32 %v2816_v0, 0.0 }
 0x248   :  { %v2819_v4 = vpop.f32.mrf.mxu0  ;;  %v2859_v12 = vadd.f32 %v2858_v16, %v503_v52 }
 0x249   :  { %v2950_v5 = vmax.f32 %v2818_v2, 0.0  ;;  %v2860_v6 = vpop.f32.mrf.mxu1  ;;  %v2957_v38 = vpack.c.bf16 %v2949_v3, %v2949_v3 }
 0x24a   :  { %v2820_v36 = vpop.f32.mrf.mxu0 }
 0x24b   :  { %v2958_v7 = vpack.c.bf16 %v2950_v5, %v2950_v5  ;;  %v2861_v8 = vpop.f32.mrf.mxu1 }
 0x24d   :  { %3855 = vmatprep.mubr.bf16.mxu0 %v2958_v7 }
 0x24e   :  { %3856 = vmatmul.mubr.bf16.vlgmr.msra.gmra.mxu0 %v2957_v38 }
 0x284   :  { %v2897_v55 = vpop.f32.mrf.mxu0 }
 0x285   :  { %v2898_v28 = vadd.f32 %v2897_v55, %v2857_v11  ;;  %v2938_v13 = vpop.f32.mrf.mxu1 }
 0x286   :  { %v2899_v14 = vpop.f32.mrf.mxu0 }
 0x287   :  { %v2939_v15 = vadd.f32 %v2938_v13, %v2898_v28  ;;  %v2900_v17 = vadd.f32 %v2899_v14, %v2859_v12  ;;  %v2940_v18 = vpop.f32.mrf.mxu1 }
 0x288   :  { %v2901_v20 = vpop.f32.mrf.mxu0 }
 0x289   :  { %v2941_v22 = vadd.f32 %v2940_v18, %v2900_v17  ;;  %v2942_v61 = vpop.f32.mrf.mxu1  ;;  %v2951_v23 = vmax.f32 %v2939_v15, 0.0 }
 0x28a   :  { %v2902_v32 = vpop.f32.mrf.mxu0 }
 0x28b   :  { %v2952_v24 = vmax.f32 %v2941_v22, 0.0  ;;  %v2943_v49 = vpop.f32.mrf.mxu1  ;;  %v2959_v26 = vpack.c.bf16 %v2951_v23, %v2951_v23 }
 0x28d   :  { %v2960_v25 = vpack.c.bf16 %v2952_v24, %v2952_v24 }
 0x28f   :  { %3896 = vmatprep.mubr.bf16.mxu1 %v2960_v25 }
 0x290   :  { %3897 = vmatmul.mubr.bf16.vlgmr.msra.gmra.mxu1 %v2959_v26 }
 0x2c4   :  { %v3775_v27 = vpop.f32.mrf.mxu0 }
 0x2c5   :  { %v3776_v54 = vadd.f32 %v3775_v27, %v3094_v53  ;;  %v3816_v30 = vpop.f32.mrf.mxu1 }
 0x2c6   :  { %v3777_v31 = vpop.f32.mrf.mxu0 }
 0x2c7   :  { %v3817_v33 = vadd.f32 %v3816_v30, %v3776_v54  ;;  %v3778_v59 = vadd.f32 %v3777_v31, %v3098_v10  ;;  %v3818_v34 = vpop.f32.mrf.mxu1 }
 0x2c8   :  { %v3779_v35 = vpop.f32.mrf.mxu0 }
 0x2c9   :  { %v3819_v37 = vadd.f32 %v3818_v34, %v3778_v59  ;;  %v3820_v39 = vpop.f32.mrf.mxu1 }
 0x2ca   :  { %v3780_v40 = vpop.f32.mrf.mxu0 }
 0x2cb   :  { %v3821_v19 = vpop.f32.mrf.mxu1 }
 0x30e   :  { %v3857_v58 = vpop.f32.mrf.mxu0 }
 0x30f   :  { %v3858_v43 = vadd.f32 %v3857_v58, %v3817_v33 }
 0x310   :  { %v3859_v44 = vpop.f32.mrf.mxu0 }
 0x311   :  { %v3860_v45 = vadd.f32 %v3859_v44, %v3819_v37 }
 0x312   :  { %v3861_v51 = vpop.f32.mrf.mxu0 }
 0x314   :  { %v3862_v46 = vpop.f32.mrf.mxu0 }
 0x350   :  { %v3898_v42 = vpop.f32.mrf.mxu1 }
 0x351   :  { %v3899_v60 = vadd.f32 %v3898_v42, %v3858_v43 }
 0x352   :  { %v3900_v47 = vpop.f32.mrf.mxu1 }
 0x353   :  { %v3905_v50 = vmax.f32 %v3899_v60, 0.0  ;;  %v3901_v56 = vadd.f32 %v3900_v47, %v3860_v45 }
 0x354   :  { %v3902_v57 = vpop.f32.mrf.mxu1 }
 0x355   :  { %3907 = vst [vmem:[#allocation11] sm:$0xff] %v3905_v50  ;;  %v3906_v62 = vmax.f32 %v3901_v56, 0.0 }
 0x356   :  { %v3903_v63 = vpop.f32.mrf.mxu1 }
 0x357   :  { %3908 = vst [vmem:[#allocation11 + $0x8] sm:$0xff] %v3906_v62 }
 0x358   :  { %4764 = shalt.err (!%p4761_p1)
}
 0x359   :  { %3918 = dma.vmem_to_hbm [thread:$0]  %s3916_s4, 256, %s4964_s5, [#allocation4]  }
 0x35a   :  { %4779 = dma.done.wait [#allocation4], 256  }
 0x35b   :  { %4780 = vsyncadd [#allocation4], 4294967040 }
 0x35c   :  { %3922 = vsyncpa [#allocation3], 1 }
 0x35d   :  { %3923 = vsyncpa [#allocation6], 1 }
 0x35e   :  { %3924 = vsyncpa [#allocation9], 1 }
 0x35f   :  { %3925 = vsyncpa [#allocation4], 1 }

</bundles_post_ra>
